<compile_context>
chip_gen: v7x
topology: tpu7x:2x2x1
jax: 0.10.0
libtpu: 0.0.40
codegen_flags: <defaults>
</compile_context>

<pallas_src>
import functools

import jax
import jax.numpy as jnp
import numpy as np
from jax.experimental import pallas as pl
from jax.experimental.pallas import tpu as pltpu


# ----------------------------------------------------------------------------
# Tiling helpers
# ----------------------------------------------------------------------------
def _round_up(x, m):
    return (x + m - 1) // m * m


@functools.lru_cache(maxsize=None)
def _tile_caps():
    """(TM, TN, TK) caps; bigger working set on 128 MiB VMEM parts."""
    try:
        info = pltpu.get_tpu_info()
        vmem = getattr(info, "vmem_capacity_bytes", 64 << 20)
    except Exception:  # pragma: no cover - conservative fallback
        vmem = 64 << 20
    if vmem >= (100 << 20):   # v5e / v6e (128 MiB)
        return 512, 256, 512
    return 256, 256, 512      # v7x-safe (64 MiB physical, 32 MiB default scoped)


def _choose_tile(dim, cap, base):
    """Return (tile, padded_dim): tile is a multiple of `base`, <= cap (or the
    whole aligned dim if smaller), and divides padded_dim."""
    aligned = _round_up(dim, base)
    if aligned <= cap:
        return aligned, aligned
    cap = (cap // base) * base
    t = cap
    while t >= base:
        if aligned % t == 0:
            break
        t -= base
    if t * 2 >= cap:            # found a reasonably large divisor -> no padding
        return t, aligned
    return cap, _round_up(aligned, cap)


# ----------------------------------------------------------------------------
# Pallas kernel 1: tiled fused  out = act(x @ w + b)
# ----------------------------------------------------------------------------
def _mm_bias_act_kernel(x_ref, w_ref, b_ref, o_ref, acc_ref, *, act):
    @pl.when(pl.program_id(2) == 0)
    def _():
        acc_ref[...] = jnp.zeros_like(acc_ref)

    acc_ref[...] += jnp.dot(x_ref[...], w_ref[...],
                            preferred_element_type=jnp.float32)

    @pl.when(pl.program_id(2) == pl.num_programs(2) - 1)
    def _():
        y = acc_ref[...] + b_ref[...]          # (1, tn) broadcasts over rows
        if act == "leaky_relu":
            y = jnp.where(y > 0, y, jnp.float32(0.01) * y)  # PyTorch default slope
        elif act == "relu":
            y = jnp.maximum(y, jnp.float32(0.0))
        o_ref[...] = y.astype(o_ref.dtype)


def matmul_bias_act(x, w, b, act="none", out_dtype=jnp.float32):
    """x: (M, K), w: (K, N), b: (N,) -> (M, N); bf16 MXU operands, f32 accum."""
    M, K = x.shape
    K2, N = w.shape
    assert K == K2, (x.shape, w.shape)
    TM, TN, TK = _tile_caps()
    tm, Mp = _choose_tile(M, TM, 8)
    tk, Kp = _choose_tile(K, TK, 128)
    tn, Np = _choose_tile(N, TN, 128)

    xb = x.astype(jnp.bfloat16)
    wb = w.astype(jnp.bfloat16)
    if (Mp, Kp) != (M, K):
        xb = jnp.pad(xb, ((0, Mp - M), (0, Kp - K)))
    if (Kp, Np) != (K, N):
        wb = jnp.pad(wb, ((0, Kp - K), (0, Np - N)))
    bb = b.astype(jnp.float32).reshape(1, N)
    if Np != N:
        bb = jnp.pad(bb, ((0, 0), (0, Np - N)))

    out = pl.pallas_call(
        functools.partial(_mm_bias_act_kernel, act=act),
        out_shape=jax.ShapeDtypeStruct((Mp, Np), out_dtype),
        grid_spec=pltpu.PrefetchScalarGridSpec(
            num_scalar_prefetch=0,
            grid=(Mp // tm, Np // tn, Kp // tk),
            in_specs=[
                pl.BlockSpec((tm, tk), lambda i, j, k: (i, k)),
                pl.BlockSpec((tk, tn), lambda i, j, k: (k, j)),
                pl.BlockSpec((1, tn), lambda i, j, k: (0, j)),
            ],
            out_specs=pl.BlockSpec((tm, tn), lambda i, j, k: (i, j)),
            scratch_shapes=[pltpu.VMEM((tm, tn), jnp.float32)],
        ),
        compiler_params=pltpu.CompilerParams(
            dimension_semantics=("parallel", "parallel", "arbitrary")),
    )(xb, wb, bb)
    if (Mp, Np) != (M, N):
        out = out[:M, :N]
    return out


# ----------------------------------------------------------------------------
# Pallas kernel 2: fused predictor FC tail  (fc1->ReLU->fc2->ReLU->fc3)
# ----------------------------------------------------------------------------
def _fc_tail_kernel(x_ref, w1_ref, b1_ref, w2_ref, b2_ref, w3_ref, b3_ref,
                    o_ref, acc_ref):
    k = pl.program_id(1)

    @pl.when(k == 0)
    def _():
        acc_ref[...] = jnp.zeros_like(acc_ref)

    acc_ref[...] += jnp.dot(x_ref[...], w1_ref[...],
                            preferred_element_type=jnp.float32)

    @pl.when(k == pl.num_programs(1) - 1)
    def _():
        h1 = jnp.maximum(acc_ref[...] + b1_ref[...], jnp.float32(0.0))
        h2 = jnp.dot(h1.astype(jnp.bfloat16), w2_ref[...],
                     preferred_element_type=jnp.float32) + b2_ref[...]
        h2 = jnp.maximum(h2, jnp.float32(0.0))
        y = jnp.dot(h2.astype(jnp.bfloat16), w3_ref[...],
                    preferred_element_type=jnp.float32) + b3_ref[...]
        o_ref[...] = y.astype(o_ref.dtype)


def predictor_fc_tail(feat, p):
    """feat: (B, K_pad) with K_pad a multiple of 512 -> (B, 512) float32."""
    feat = feat.astype(jnp.bfloat16)
    M, K = feat.shape
    tk = 512
    assert K % tk == 0
    tm, Mp = _choose_tile(M, 256, 8)
    if Mp != M:
        feat = jnp.pad(feat, ((0, Mp - M), (0, 0)))
    b1 = p["fc1_b"].reshape(1, 512)
    b2 = p["fc2_b"].reshape(1, 512)
    b3 = p["fc3_b"].reshape(1, 512)

    out = pl.pallas_call(
        _fc_tail_kernel,
        out_shape=jax.ShapeDtypeStruct((Mp, 512), jnp.float32),
        grid_spec=pltpu.PrefetchScalarGridSpec(
            num_scalar_prefetch=0,
            grid=(Mp // tm, K // tk),
            in_specs=[
                pl.BlockSpec((tm, tk), lambda m, k: (m, k)),
                pl.BlockSpec((tk, 512), lambda m, k: (k, 0)),
                pl.BlockSpec((1, 512), lambda m, k: (0, 0)),
                pl.BlockSpec((512, 512), lambda m, k: (0, 0)),
                pl.BlockSpec((1, 512), lambda m, k: (0, 0)),
                pl.BlockSpec((512, 512), lambda m, k: (0, 0)),
                pl.BlockSpec((1, 512), lambda m, k: (0, 0)),
            ],
            out_specs=pl.BlockSpec((tm, 512), lambda m, k: (m, 0)),
            scratch_shapes=[pltpu.VMEM((tm, 512), jnp.float32)],
        ),
        compiler_params=pltpu.CompilerParams(
            dimension_semantics=("parallel", "arbitrary")),
    )(feat, p["fc1_w"], b1, p["fc2_w"], b2, p["fc3_w"], b3)
    return out[:M]


# ----------------------------------------------------------------------------
# Conv-as-matmul glue (NHWC im2col; column order i*k*C + j*C + c)
# ----------------------------------------------------------------------------
def _im2col_nhwc(x, k, stride):
    B, H, W, C = x.shape
    OH = (H - k) // stride + 1
    OW = (W - k) // stride + 1
    cols = []
    for i in range(k):
        for j in range(k):
            cols.append(x[:, i:i + stride * OH:stride, j:j + stride * OW:stride, :])
    patches = jnp.concatenate(cols, axis=-1)          # (B, OH, OW, k*k*C)
    return patches.reshape(B * OH * OW, k * k * C), OH, OW


def conv2d_nhwc(x, wm, b, *, k, stride, act):
    B = x.shape[0]
    O = wm.shape[1]
    patches, OH, OW = _im2col_nhwc(x, k, stride)
    y = matmul_bias_act(patches, wm, b, act=act, out_dtype=jnp.bfloat16)
    return y.reshape(B, OH, OW, O)


# ----------------------------------------------------------------------------
# Parameter init (orthogonal, gain=sqrt(2); bias=0) matching layer_init,
# converted once into kernel-friendly layouts (merged trunk, NHWC, bf16, (in,out)).
# ----------------------------------------------------------------------------
FC1_K = 7 * 7 * 64       # 3136 (PyTorch feature_output)
FC1_K_PAD = 3584         # padded to a multiple of 512 for clean K tiling


def orthogonal_init(key, shape, gain):
    rows = shape[0]
    cols = int(np.prod(shape[1:]))
    n, m = (rows, cols) if rows >= cols else (cols, rows)
    a = jax.random.normal(key, (n, m), dtype=jnp.float32)
    q, r = jnp.linalg.qr(a)
    q = q * jnp.sign(jnp.diag(r))
    if rows < cols:
        q = q.T
    return (gain * q).reshape(shape).astype(jnp.float32)


def _raw_tower(key, with_tail):
    gain = float(np.sqrt(2.0))
    keys = jax.random.split(key, 6)
    p = {
        "c1_w": orthogonal_init(keys[0], (32, 1, 8, 8), gain),
        "c2_w": orthogonal_init(keys[1], (64, 32, 4, 4), gain),
        "c3_w": orthogonal_init(keys[2], (64, 64, 3, 3), gain),
        "fc1_w": orthogonal_init(keys[3], (512, FC1_K), gain),   # NCHW flatten cols
    }
    if with_tail:
        p["fc2_w"] = orthogonal_init(keys[4], (512, 512), gain)
        p["fc3_w"] = orthogonal_init(keys[5], (512, 512), gain)
    return p


def _conv_to_mm(w):
    # (O, C, kh, kw) -> (kh*kw*C, O): row index i*(kw*C) + j*C + c (NHWC im2col order)
    O, C, kh, kw = w.shape
    return jnp.transpose(w, (2, 3, 1, 0)).reshape(kh * kw * C, O)


def _fc1_nhwc_perm(H=7, W=7, C=64):
    # new column p = h*(W*C) + w*C + c  reads old NCHW column c*(H*W) + h*W + w
    hh, ww, cc = np.meshgrid(np.arange(H), np.arange(W), np.arange(C), indexing="ij")
    return (cc * (H * W) + hh * W + ww).reshape(-1)


def make_rnd_params(key):
    kp, kt = jax.random.split(key)
    pred = _raw_tower(kp, with_tail=True)
    tgt = _raw_tower(kt, with_tail=False)

    # --- merged conv trunk (predictor channels first, target channels second) ---
    c1 = jnp.concatenate([pred["c1_w"], tgt["c1_w"]], axis=0)            # (64,1,8,8)
    c2 = jnp.zeros((128, 64, 4, 4), jnp.float32)
    c2 = c2.at[:64, :32].set(pred["c2_w"]).at[64:, 32:].set(tgt["c2_w"])  # block-diag
    c3 = jnp.zeros((128, 128, 3, 3), jnp.float32)
    c3 = c3.at[:64, :64].set(pred["c3_w"]).at[64:, 64:].set(tgt["c3_w"])  # block-diag

    perm = _fc1_nhwc_perm()

    def fc1_mm(w):  # (512, 3136) NCHW-order -> (3584, 512) bf16, NHWC-order, padded
        wt = w[:, perm].T
        wt = jnp.pad(wt, ((0, FC1_K_PAD - FC1_K), (0, 0)))
        return wt.astype(jnp.bfloat16)

    return {
        "trunk": {
            "c1_w": _conv_to_mm(c1).astype(jnp.bfloat16),
            "c1_b": jnp.zeros((64,), jnp.float32),
            "c2_w": _conv_to_mm(c2).astype(jnp.bfloat16),
            "c2_b": jnp.zeros((128,), jnp.float32),
            "c3_w": _conv_to_mm(c3).astype(jnp.bfloat16),
            "c3_b": jnp.zeros((128,), jnp.float32),
        },
        "pred": {
            "fc1_w": fc1_mm(pred["fc1_w"]), "fc1_b": jnp.zeros((512,), jnp.float32),
            "fc2_w": pred["fc2_w"].T.astype(jnp.bfloat16),
            "fc2_b": jnp.zeros((512,), jnp.float32),
            "fc3_w": pred["fc3_w"].T.astype(jnp.bfloat16),
            "fc3_b": jnp.zeros((512,), jnp.float32),
        },
        "tgt": {
            "fc1_w": fc1_mm(tgt["fc1_w"]), "fc1_b": jnp.zeros((512,), jnp.float32),
        },
    }


# ----------------------------------------------------------------------------
# RNDModel forward
# ----------------------------------------------------------------------------
def rnd_model_forward(next_obs, params):
    tr, pf, tf = params["trunk"], params["pred"], params["tgt"]
    x = jnp.transpose(next_obs, (0, 2, 3, 1)).astype(jnp.bfloat16)       # NCHW -> NHWC
    x = conv2d_nhwc(x, tr["c1_w"], tr["c1_b"], k=8, stride=4, act="leaky_relu")  # (B,20,20,64)
    x = conv2d_nhwc(x, tr["c2_w"], tr["c2_b"], k=4, stride=2, act="leaky_relu")  # (B,9,9,128)
    x = conv2d_nhwc(x, tr["c3_w"], tr["c3_b"], k=3, stride=1, act="leaky_relu")  # (B,7,7,128)

    B = x.shape[0]
    pred_feat = x[..., :64].reshape(B, FC1_K)    # predictor's channels (NHWC flatten)
    tgt_feat = x[..., 64:].reshape(B, FC1_K)     # target's channels
    pad = FC1_K_PAD - FC1_K
    pred_feat = jnp.pad(pred_feat, ((0, 0), (0, pad)))
    tgt_feat = jnp.pad(tgt_feat, ((0, 0), (0, pad)))

    target_feature = matmul_bias_act(tgt_feat, tf["fc1_w"], tf["fc1_b"],
                                     act="none", out_dtype=jnp.float32)
    predict_feature = predictor_fc_tail(pred_feat, pf)
    return predict_feature, target_feature


if __name__ == "__main__":
    key = jax.random.PRNGKey(0)
    k_obs, k_params = jax.random.split(key)

    # Spatial size must be 84x84 so the trunk yields 7*7*64 features (as in the
    # PyTorch module); batch kept small.
    next_obs = jax.random.normal(k_obs, (2, 1, 84, 84), dtype=jnp.float32)
    params = make_rnd_params(k_params)

    fwd = jax.jit(rnd_model_forward)
    predict_feature, target_feature = fwd(next_obs, params)
    jax.block_until_ready((predict_feature, target_feature))

    assert predict_feature.shape == (2, 512) and predict_feature.dtype == jnp.float32
    assert target_feature.shape == (2, 512) and target_feature.dtype == jnp.float32
    assert bool(jnp.all(jnp.isfinite(predict_feature)))
    assert bool(jnp.all(jnp.isfinite(target_feature)))
    print("KERNEL_OK")
</pallas_src>

<mosaic_0001>
module attributes {stable_mosaic.version = 11 : i64} {
  func.func @_mm_bias_act_kernel(%arg0: i32, %arg1: i32, %arg2: i32, %arg3: memref<200x128xbf16, #tpu.memory_space<vmem>>, %arg4: memref<128x128xbf16, #tpu.memory_space<vmem>>, %arg5: memref<1x128xf32, #tpu.memory_space<vmem>>, %arg6: memref<200x128xbf16, #tpu.memory_space<vmem>>, %arg7: memref<200x128xf32, #tpu.memory_space<vmem>>) attributes {dimension_semantics = [#tpu.dimension_semantics<parallel>, #tpu.dimension_semantics<parallel>, #tpu.dimension_semantics<arbitrary>], iteration_bounds = array<i64: 4, 1, 1>, scalar_prefetch = 0 : i64, scratch_operands = 1 : i64, tpu.core_type = #tpu.core_type<tc>, window_params = [{transform_indices = @transform_0, window_bounds = array<i64: 200, 128>}, {transform_indices = @transform_1, window_bounds = array<i64: 128, 128>}, {transform_indices = @transform_2, window_bounds = array<i64: 1, 128>}, {transform_indices = @transform_3, window_bounds = array<i64: 200, 128>}]} {
    %c0_i32 = arith.constant 0 : i32
    %0 = arith.cmpi eq, %arg2, %c0_i32 : i32
    %1 = arith.extui %0 : i1 to i32
    %c0_i32_0 = arith.constant 0 : i32
    %2 = arith.cmpi ne, %1, %c0_i32_0 : i32
    scf.if %2 {
      %cst_10 = arith.constant 0.000000e+00 : f32
      %12 = vector.broadcast %cst_10 : f32 to vector<200x128xf32>
      %c0_11 = arith.constant 0 : index
      %c0_12 = arith.constant 0 : index
      %13 = vector.load %arg7[%c0_11, %c0_12] : memref<200x128xf32, #tpu.memory_space<vmem>>, vector<200x128xf32>
      tpu.vector_store %arg7[%c0_11, %c0_12], %12 {strides = array<i32>} : memref<200x128xf32, #tpu.memory_space<vmem>>, vector<200x128xf32>,
    } else {
    }
    %c0 = arith.constant 0 : index
    %c0_1 = arith.constant 0 : index
    %3 = vector.load %arg7[%c0, %c0_1] : memref<200x128xf32, #tpu.memory_space<vmem>>, vector<200x128xf32>
    %c0_2 = arith.constant 0 : index
    %c0_3 = arith.constant 0 : index
    %4 = vector.load %arg3[%c0_2, %c0_3] : memref<200x128xbf16, #tpu.memory_space<vmem>>, vector<200x128xbf16>
    %c0_4 = arith.constant 0 : index
    %c0_5 = arith.constant 0 : index
    %5 = vector.load %arg4[%c0_4, %c0_5] : memref<128x128xbf16, #tpu.memory_space<vmem>>, vector<128x128xbf16>
    %cst = arith.constant dense<0.000000e+00> : vector<200x128xf32>
    %6 = tpu.matmul %4, %5, %cst {dimension_numbers = #tpu.dot_dimension_numbers<[1], [0], [0], [1], [0, 0, 1, 1], [], []>} : vector<200x128xbf16>, vector<128x128xbf16>, vector<200x128xf32> -> vector<200x128xf32>
    %7 = arith.addf %3, %6 : vector<200x128xf32>
    %c0_6 = arith.constant 0 : index
    %c0_7 = arith.constant 0 : index
    %8 = vector.load %arg7[%c0_6, %c0_7] : memref<200x128xf32, #tpu.memory_space<vmem>>, vector<200x128xf32>
    tpu.vector_store %arg7[%c0_6, %c0_7], %7 {strides = array<i32>} : memref<200x128xf32, #tpu.memory_space<vmem>>, vector<200x128xf32>,
    %c0_i32_8 = arith.constant 0 : i32
    %9 = arith.cmpi eq, %arg2, %c0_i32_8 : i32
    %10 = arith.extui %9 : i1 to i32
    %c0_i32_9 = arith.constant 0 : i32
    %11 = arith.cmpi ne, %10, %c0_i32_9 : i32
    scf.if %11 {
      %c0_10 = arith.constant 0 : index
      %c0_11 = arith.constant 0 : index
      %12 = vector.load %arg7[%c0_10, %c0_11] : memref<200x128xf32, #tpu.memory_space<vmem>>, vector<200x128xf32>
      %c0_12 = arith.constant 0 : index
      %c0_13 = arith.constant 0 : index
      %13 = vector.load %arg5[%c0_12, %c0_13] : memref<1x128xf32, #tpu.memory_space<vmem>>, vector<1x128xf32>
      %14 = vector.broadcast %13 : vector<1x128xf32> to vector<200x128xf32>
      %15 = arith.addf %12, %14 : vector<200x128xf32>
      %cst_14 = arith.constant 0.000000e+00 : f32
      %16 = vector.broadcast %cst_14 : f32 to vector<200x128xf32>
      %17 = arith.cmpf ogt, %15, %16 : vector<200x128xf32>
      %cst_15 = arith.constant 0.00999999977 : f32
      %18 = vector.broadcast %cst_15 : f32 to vector<200x128xf32>
      %19 = arith.mulf %18, %15 : vector<200x128xf32>
      %20 = arith.select %17, %15, %19 : vector<200x128xi1>, vector<200x128xf32>
      %21 = arith.truncf %20 : vector<200x128xf32> to vector<200x128xbf16>
      %c0_16 = arith.constant 0 : index
      %c0_17 = arith.constant 0 : index
      %22 = vector.load %arg6[%c0_16, %c0_17] : memref<200x128xbf16, #tpu.memory_space<vmem>>, vector<200x128xbf16>
      tpu.vector_store %arg6[%c0_16, %c0_17], %21 {strides = array<i32>} : memref<200x128xbf16, #tpu.memory_space<vmem>>, vector<200x128xbf16>,
    } else {
    }
    return
  }
  func.func @transform_0(%arg0: i32, %arg1: i32, %arg2: i32) -> (i32, i32) {
    %c0_i32 = arith.constant 0 : i32
    return %arg0, %arg2 : i32, i32
  }
  func.func @transform_1(%arg0: i32, %arg1: i32, %arg2: i32) -> (i32, i32) {
    %c0_i32 = arith.constant 0 : i32
    return %arg2, %arg1 : i32, i32
  }
  func.func @transform_2(%arg0: i32, %arg1: i32, %arg2: i32) -> (i32, i32) {
    %c0_i32 = arith.constant 0 : i32
    %c0_i32_0 = arith.constant 0 : i32
    return %c0_i32, %arg1 : i32, i32
  }
  func.func @transform_3(%arg0: i32, %arg1: i32, %arg2: i32) -> (i32, i32) {
    %c0_i32 = arith.constant 0 : i32
    return %arg0, %arg1 : i32, i32
  }
}

module attributes {stable_mosaic.version = 11 : i64} {
  func.func @_mm_bias_act_kernel(%arg0: i32, %arg1: i32, %arg2: i32, %arg3: memref<168x512xbf16, #tpu.memory_space<vmem>>, %arg4: memref<512x128xbf16, #tpu.memory_space<vmem>>, %arg5: memref<1x128xf32, #tpu.memory_space<vmem>>, %arg6: memref<168x128xbf16, #tpu.memory_space<vmem>>, %arg7: memref<168x128xf32, #tpu.memory_space<vmem>>) attributes {dimension_semantics = [#tpu.dimension_semantics<parallel>, #tpu.dimension_semantics<parallel>, #tpu.dimension_semantics<arbitrary>], iteration_bounds = array<i64: 1, 1, 2>, scalar_prefetch = 0 : i64, scratch_operands = 1 : i64, tpu.core_type = #tpu.core_type<tc>, window_params = [{transform_indices = @transform_0, window_bounds = array<i64: 168, 512>}, {transform_indices = @transform_1, window_bounds = array<i64: 512, 128>}, {transform_indices = @transform_2, window_bounds = array<i64: 1, 128>}, {transform_indices = @transform_3, window_bounds = array<i64: 168, 128>}]} {
    %c0_i32 = arith.constant 0 : i32
    %0 = arith.cmpi eq, %arg2, %c0_i32 : i32
    %1 = arith.extui %0 : i1 to i32
    %c0_i32_0 = arith.constant 0 : i32
    %2 = arith.cmpi ne, %1, %c0_i32_0 : i32
    scf.if %2 {
      %cst_9 = arith.constant 0.000000e+00 : f32
      %12 = vector.broadcast %cst_9 : f32 to vector<168x128xf32>
      %c0_10 = arith.constant 0 : index
      %c0_11 = arith.constant 0 : index
      %13 = vector.load %arg7[%c0_10, %c0_11] : memref<168x128xf32, #tpu.memory_space<vmem>>, vector<168x128xf32>
      tpu.vector_store %arg7[%c0_10, %c0_11], %12 {strides = array<i32>} : memref<168x128xf32, #tpu.memory_space<vmem>>, vector<168x128xf32>,
    } else {
    }
    %c0 = arith.constant 0 : index
    %c0_1 = arith.constant 0 : index
    %3 = vector.load %arg7[%c0, %c0_1] : memref<168x128xf32, #tpu.memory_space<vmem>>, vector<168x128xf32>
    %c0_2 = arith.constant 0 : index
    %c0_3 = arith.constant 0 : index
    %4 = vector.load %arg3[%c0_2, %c0_3] : memref<168x512xbf16, #tpu.memory_space<vmem>>, vector<168x512xbf16>
    %c0_4 = arith.constant 0 : index
    %c0_5 = arith.constant 0 : index
    %5 = vector.load %arg4[%c0_4, %c0_5] : memref<512x128xbf16, #tpu.memory_space<vmem>>, vector<512x128xbf16>
    %cst = arith.constant dense<0.000000e+00> : vector<168x128xf32>
    %6 = tpu.matmul %4, %5, %cst {dimension_numbers = #tpu.dot_dimension_numbers<[1], [0], [0], [1], [0, 0, 1, 1], [], []>} : vector<168x512xbf16>, vector<512x128xbf16>, vector<168x128xf32> -> vector<168x128xf32>
    %7 = arith.addf %3, %6 : vector<168x128xf32>
    %c0_6 = arith.constant 0 : index
    %c0_7 = arith.constant 0 : index
    %8 = vector.load %arg7[%c0_6, %c0_7] : memref<168x128xf32, #tpu.memory_space<vmem>>, vector<168x128xf32>
    tpu.vector_store %arg7[%c0_6, %c0_7], %7 {strides = array<i32>} : memref<168x128xf32, #tpu.memory_space<vmem>>, vector<168x128xf32>,
    %c1_i32 = arith.constant 1 : i32
    %9 = arith.cmpi eq, %arg2, %c1_i32 : i32
    %10 = arith.extui %9 : i1 to i32
    %c0_i32_8 = arith.constant 0 : i32
    %11 = arith.cmpi ne, %10, %c0_i32_8 : i32
    scf.if %11 {
      %c0_9 = arith.constant 0 : index
      %c0_10 = arith.constant 0 : index
      %12 = vector.load %arg7[%c0_9, %c0_10] : memref<168x128xf32, #tpu.memory_space<vmem>>, vector<168x128xf32>
      %c0_11 = arith.constant 0 : index
      %c0_12 = arith.constant 0 : index
      %13 = vector.load %arg5[%c0_11, %c0_12] : memref<1x128xf32, #tpu.memory_space<vmem>>, vector<1x128xf32>
      %14 = vector.broadcast %13 : vector<1x128xf32> to vector<168x128xf32>
      %15 = arith.addf %12, %14 : vector<168x128xf32>
      %cst_13 = arith.constant 0.000000e+00 : f32
      %16 = vector.broadcast %cst_13 : f32 to vector<168x128xf32>
      %17 = arith.cmpf ogt, %15, %16 : vector<168x128xf32>
      %cst_14 = arith.constant 0.00999999977 : f32
      %18 = vector.broadcast %cst_14 : f32 to vector<168x128xf32>
      %19 = arith.mulf %18, %15 : vector<168x128xf32>
      %20 = arith.select %17, %15, %19 : vector<168x128xi1>, vector<168x128xf32>
      %21 = arith.truncf %20 : vector<168x128xf32> to vector<168x128xbf16>
      %c0_15 = arith.constant 0 : index
      %c0_16 = arith.constant 0 : index
      %22 = vector.load %arg6[%c0_15, %c0_16] : memref<168x128xbf16, #tpu.memory_space<vmem>>, vector<168x128xbf16>
      tpu.vector_store %arg6[%c0_15, %c0_16], %21 {strides = array<i32>} : memref<168x128xbf16, #tpu.memory_space<vmem>>, vector<168x128xbf16>,
    } else {
    }
    return
  }
  func.func @transform_0(%arg0: i32, %arg1: i32, %arg2: i32) -> (i32, i32) {
    %c0_i32 = arith.constant 0 : i32
    return %arg0, %arg2 : i32, i32
  }
  func.func @transform_1(%arg0: i32, %arg1: i32, %arg2: i32) -> (i32, i32) {
    %c0_i32 = arith.constant 0 : i32
    return %arg2, %arg1 : i32, i32
  }
  func.func @transform_2(%arg0: i32, %arg1: i32, %arg2: i32) -> (i32, i32) {
    %c0_i32 = arith.constant 0 : i32
    %c0_i32_0 = arith.constant 0 : i32
    return %c0_i32, %arg1 : i32, i32
  }
  func.func @transform_3(%arg0: i32, %arg1: i32, %arg2: i32) -> (i32, i32) {
    %c0_i32 = arith.constant 0 : i32
    return %arg0, %arg1 : i32, i32
  }
}

module attributes {stable_mosaic.version = 11 : i64} {
  func.func @_mm_bias_act_kernel(%arg0: i32, %arg1: i32, %arg2: i32, %arg3: memref<104x384xbf16, #tpu.memory_space<vmem>>, %arg4: memref<384x128xbf16, #tpu.memory_space<vmem>>, %arg5: memref<1x128xf32, #tpu.memory_space<vmem>>, %arg6: memref<104x128xbf16, #tpu.memory_space<vmem>>, %arg7: memref<104x128xf32, #tpu.memory_space<vmem>>) attributes {dimension_semantics = [#tpu.dimension_semantics<parallel>, #tpu.dimension_semantics<parallel>, #tpu.dimension_semantics<arbitrary>], iteration_bounds = array<i64: 1, 1, 3>, scalar_prefetch = 0 : i64, scratch_operands = 1 : i64, tpu.core_type = #tpu.core_type<tc>, window_params = [{transform_indices = @transform_0, window_bounds = array<i64: 104, 384>}, {transform_indices = @transform_1, window_bounds = array<i64: 384, 128>}, {transform_indices = @transform_2, window_bounds = array<i64: 1, 128>}, {transform_indices = @transform_3, window_bounds = array<i64: 104, 128>}]} {
    %c0_i32 = arith.constant 0 : i32
    %0 = arith.cmpi eq, %arg2, %c0_i32 : i32
    %1 = arith.extui %0 : i1 to i32
    %c0_i32_0 = arith.constant 0 : i32
    %2 = arith.cmpi ne, %1, %c0_i32_0 : i32
    scf.if %2 {
      %cst_9 = arith.constant 0.000000e+00 : f32
      %12 = vector.broadcast %cst_9 : f32 to vector<104x128xf32>
      %c0_10 = arith.constant 0 : index
      %c0_11 = arith.constant 0 : index
      %13 = vector.load %arg7[%c0_10, %c0_11] : memref<104x128xf32, #tpu.memory_space<vmem>>, vector<104x128xf32>
      tpu.vector_store %arg7[%c0_10, %c0_11], %12 {strides = array<i32>} : memref<104x128xf32, #tpu.memory_space<vmem>>, vector<104x128xf32>,
    } else {
    }
    %c0 = arith.constant 0 : index
    %c0_1 = arith.constant 0 : index
    %3 = vector.load %arg7[%c0, %c0_1] : memref<104x128xf32, #tpu.memory_space<vmem>>, vector<104x128xf32>
    %c0_2 = arith.constant 0 : index
    %c0_3 = arith.constant 0 : index
    %4 = vector.load %arg3[%c0_2, %c0_3] : memref<104x384xbf16, #tpu.memory_space<vmem>>, vector<104x384xbf16>
    %c0_4 = arith.constant 0 : index
    %c0_5 = arith.constant 0 : index
    %5 = vector.load %arg4[%c0_4, %c0_5] : memref<384x128xbf16, #tpu.memory_space<vmem>>, vector<384x128xbf16>
    %cst = arith.constant dense<0.000000e+00> : vector<104x128xf32>
    %6 = tpu.matmul %4, %5, %cst {dimension_numbers = #tpu.dot_dimension_numbers<[1], [0], [0], [1], [0, 0, 1, 1], [], []>} : vector<104x384xbf16>, vector<384x128xbf16>, vector<104x128xf32> -> vector<104x128xf32>
    %7 = arith.addf %3, %6 : vector<104x128xf32>
    %c0_6 = arith.constant 0 : index
    %c0_7 = arith.constant 0 : index
    %8 = vector.load %arg7[%c0_6, %c0_7] : memref<104x128xf32, #tpu.memory_space<vmem>>, vector<104x128xf32>
    tpu.vector_store %arg7[%c0_6, %c0_7], %7 {strides = array<i32>} : memref<104x128xf32, #tpu.memory_space<vmem>>, vector<104x128xf32>,
    %c2_i32 = arith.constant 2 : i32
    %9 = arith.cmpi eq, %arg2, %c2_i32 : i32
    %10 = arith.extui %9 : i1 to i32
    %c0_i32_8 = arith.constant 0 : i32
    %11 = arith.cmpi ne, %10, %c0_i32_8 : i32
    scf.if %11 {
      %c0_9 = arith.constant 0 : index
      %c0_10 = arith.constant 0 : index
      %12 = vector.load %arg7[%c0_9, %c0_10] : memref<104x128xf32, #tpu.memory_space<vmem>>, vector<104x128xf32>
      %c0_11 = arith.constant 0 : index
      %c0_12 = arith.constant 0 : index
      %13 = vector.load %arg5[%c0_11, %c0_12] : memref<1x128xf32, #tpu.memory_space<vmem>>, vector<1x128xf32>
      %14 = vector.broadcast %13 : vector<1x128xf32> to vector<104x128xf32>
      %15 = arith.addf %12, %14 : vector<104x128xf32>
      %cst_13 = arith.constant 0.000000e+00 : f32
      %16 = vector.broadcast %cst_13 : f32 to vector<104x128xf32>
      %17 = arith.cmpf ogt, %15, %16 : vector<104x128xf32>
      %cst_14 = arith.constant 0.00999999977 : f32
      %18 = vector.broadcast %cst_14 : f32 to vector<104x128xf32>
      %19 = arith.mulf %18, %15 : vector<104x128xf32>
      %20 = arith.select %17, %15, %19 : vector<104x128xi1>, vector<104x128xf32>
      %21 = arith.truncf %20 : vector<104x128xf32> to vector<104x128xbf16>
      %c0_15 = arith.constant 0 : index
      %c0_16 = arith.constant 0 : index
      %22 = vector.load %arg6[%c0_15, %c0_16] : memref<104x128xbf16, #tpu.memory_space<vmem>>, vector<104x128xbf16>
      tpu.vector_store %arg6[%c0_15, %c0_16], %21 {strides = array<i32>} : memref<104x128xbf16, #tpu.memory_space<vmem>>, vector<104x128xbf16>,
    } else {
    }
    return
  }
  func.func @transform_0(%arg0: i32, %arg1: i32, %arg2: i32) -> (i32, i32) {
    %c0_i32 = arith.constant 0 : i32
    return %arg0, %arg2 : i32, i32
  }
  func.func @transform_1(%arg0: i32, %arg1: i32, %arg2: i32) -> (i32, i32) {
    %c0_i32 = arith.constant 0 : i32
    return %arg2, %arg1 : i32, i32
  }
  func.func @transform_2(%arg0: i32, %arg1: i32, %arg2: i32) -> (i32, i32) {
    %c0_i32 = arith.constant 0 : i32
    %c0_i32_0 = arith.constant 0 : i32
    return %c0_i32, %arg1 : i32, i32
  }
  func.func @transform_3(%arg0: i32, %arg1: i32, %arg2: i32) -> (i32, i32) {
    %c0_i32 = arith.constant 0 : i32
    return %arg0, %arg1 : i32, i32
  }
}

module attributes {stable_mosaic.version = 11 : i64} {
  func.func @_mm_bias_act_kernel(%arg0: i32, %arg1: i32, %arg2: i32, %arg3: memref<8x512xbf16, #tpu.memory_space<vmem>>, %arg4: memref<512x256xbf16, #tpu.memory_space<vmem>>, %arg5: memref<1x256xf32, #tpu.memory_space<vmem>>, %arg6: memref<8x256xf32, #tpu.memory_space<vmem>>, %arg7: memref<8x256xf32, #tpu.memory_space<vmem>>) attributes {dimension_semantics = [#tpu.dimension_semantics<parallel>, #tpu.dimension_semantics<parallel>, #tpu.dimension_semantics<arbitrary>], iteration_bounds = array<i64: 1, 2, 7>, scalar_prefetch = 0 : i64, scratch_operands = 1 : i64, tpu.core_type = #tpu.core_type<tc>, window_params = [{transform_indices = @transform_0, window_bounds = array<i64: 8, 512>}, {transform_indices = @transform_1, window_bounds = array<i64: 512, 256>}, {transform_indices = @transform_2, window_bounds = array<i64: 1, 256>}, {transform_indices = @transform_3, window_bounds = array<i64: 8, 256>}]} {
    %c0_i32 = arith.constant 0 : i32
    %0 = arith.cmpi eq, %arg2, %c0_i32 : i32
    %1 = arith.extui %0 : i1 to i32
    %c0_i32_0 = arith.constant 0 : i32
    %2 = arith.cmpi ne, %1, %c0_i32_0 : i32
    scf.if %2 {
      %cst_9 = arith.constant 0.000000e+00 : f32
      %12 = vector.broadcast %cst_9 : f32 to vector<8x256xf32>
      %c0_10 = arith.constant 0 : index
      %c0_11 = arith.constant 0 : index
      %13 = vector.load %arg7[%c0_10, %c0_11] : memref<8x256xf32, #tpu.memory_space<vmem>>, vector<8x256xf32>
      tpu.vector_store %arg7[%c0_10, %c0_11], %12 {strides = array<i32>} : memref<8x256xf32, #tpu.memory_space<vmem>>, vector<8x256xf32>,
    } else {
    }
    %c0 = arith.constant 0 : index
    %c0_1 = arith.constant 0 : index
    %3 = vector.load %arg7[%c0, %c0_1] : memref<8x256xf32, #tpu.memory_space<vmem>>, vector<8x256xf32>
    %c0_2 = arith.constant 0 : index
    %c0_3 = arith.constant 0 : index
    %4 = vector.load %arg3[%c0_2, %c0_3] : memref<8x512xbf16, #tpu.memory_space<vmem>>, vector<8x512xbf16>
    %c0_4 = arith.constant 0 : index
    %c0_5 = arith.constant 0 : index
    %5 = vector.load %arg4[%c0_4, %c0_5] : memref<512x256xbf16, #tpu.memory_space<vmem>>, vector<512x256xbf16>
    %cst = arith.constant dense<0.000000e+00> : vector<8x256xf32>
    %6 = tpu.matmul %4, %5, %cst {dimension_numbers = #tpu.dot_dimension_numbers<[1], [0], [0], [1], [0, 0, 1, 1], [], []>} : vector<8x512xbf16>, vector<512x256xbf16>, vector<8x256xf32> -> vector<8x256xf32>
    %7 = arith.addf %3, %6 : vector<8x256xf32>
    %c0_6 = arith.constant 0 : index
    %c0_7 = arith.constant 0 : index
    %8 = vector.load %arg7[%c0_6, %c0_7] : memref<8x256xf32, #tpu.memory_space<vmem>>, vector<8x256xf32>
    tpu.vector_store %arg7[%c0_6, %c0_7], %7 {strides = array<i32>} : memref<8x256xf32, #tpu.memory_space<vmem>>, vector<8x256xf32>,
    %c6_i32 = arith.constant 6 : i32
    %9 = arith.cmpi eq, %arg2, %c6_i32 : i32
    %10 = arith.extui %9 : i1 to i32
    %c0_i32_8 = arith.constant 0 : i32
    %11 = arith.cmpi ne, %10, %c0_i32_8 : i32
    scf.if %11 {
      %c0_9 = arith.constant 0 : index
      %c0_10 = arith.constant 0 : index
      %12 = vector.load %arg7[%c0_9, %c0_10] : memref<8x256xf32, #tpu.memory_space<vmem>>, vector<8x256xf32>
      %c0_11 = arith.constant 0 : index
      %c0_12 = arith.constant 0 : index
      %13 = vector.load %arg5[%c0_11, %c0_12] : memref<1x256xf32, #tpu.memory_space<vmem>>, vector<1x256xf32>
      %14 = vector.broadcast %13 : vector<1x256xf32> to vector<8x256xf32>
      %15 = arith.addf %12, %14 : vector<8x256xf32>
      %c0_13 = arith.constant 0 : index
      %c0_14 = arith.constant 0 : index
      %16 = vector.load %arg6[%c0_13, %c0_14] : memref<8x256xf32, #tpu.memory_space<vmem>>, vector<8x256xf32>
      tpu.vector_store %arg6[%c0_13, %c0_14], %15 {strides = array<i32>} : memref<8x256xf32, #tpu.memory_space<vmem>>, vector<8x256xf32>,
    } else {
    }
    return
  }
  func.func @transform_0(%arg0: i32, %arg1: i32, %arg2: i32) -> (i32, i32) {
    %c0_i32 = arith.constant 0 : i32
    return %arg0, %arg2 : i32, i32
  }
  func.func @transform_1(%arg0: i32, %arg1: i32, %arg2: i32) -> (i32, i32) {
    %c0_i32 = arith.constant 0 : i32
    return %arg2, %arg1 : i32, i32
  }
  func.func @transform_2(%arg0: i32, %arg1: i32, %arg2: i32) -> (i32, i32) {
    %c0_i32 = arith.constant 0 : i32
    %c0_i32_0 = arith.constant 0 : i32
    return %c0_i32, %arg1 : i32, i32
  }
  func.func @transform_3(%arg0: i32, %arg1: i32, %arg2: i32) -> (i32, i32) {
    %c0_i32 = arith.constant 0 : i32
    return %arg0, %arg1 : i32, i32
  }
}

module attributes {stable_mosaic.version = 11 : i64} {
  func.func @_fc_tail_kernel(%arg0: i32, %arg1: i32, %arg2: memref<8x512xbf16, #tpu.memory_space<vmem>>, %arg3: memref<512x512xbf16, #tpu.memory_space<vmem>>, %arg4: memref<1x512xf32, #tpu.memory_space<vmem>>, %arg5: memref<512x512xbf16, #tpu.memory_space<vmem>>, %arg6: memref<1x512xf32, #tpu.memory_space<vmem>>, %arg7: memref<512x512xbf16, #tpu.memory_space<vmem>>, %arg8: memref<1x512xf32, #tpu.memory_space<vmem>>, %arg9: memref<8x512xf32, #tpu.memory_space<vmem>>, %arg10: memref<8x512xf32, #tpu.memory_space<vmem>>) attributes {dimension_semantics = [#tpu.dimension_semantics<parallel>, #tpu.dimension_semantics<arbitrary>], iteration_bounds = array<i64: 1, 7>, scalar_prefetch = 0 : i64, scratch_operands = 1 : i64, tpu.core_type = #tpu.core_type<tc>, window_params = [{transform_indices = @transform_0, window_bounds = array<i64: 8, 512>}, {transform_indices = @transform_1, window_bounds = array<i64: 512, 512>}, {pipeline_mode = #tpu.pipeline_mode<synchronous>, transform_indices = @transform_2, window_bounds = array<i64: 1, 512>}, {pipeline_mode = #tpu.pipeline_mode<synchronous>, transform_indices = @transform_3, window_bounds = array<i64: 512, 512>}, {pipeline_mode = #tpu.pipeline_mode<synchronous>, transform_indices = @transform_4, window_bounds = array<i64: 1, 512>}, {pipeline_mode = #tpu.pipeline_mode<synchronous>, transform_indices = @transform_5, window_bounds = array<i64: 512, 512>}, {pipeline_mode = #tpu.pipeline_mode<synchronous>, transform_indices = @transform_6, window_bounds = array<i64: 1, 512>}, {transform_indices = @transform_7, window_bounds = array<i64: 8, 512>}]} {
    %c0_i32 = arith.constant 0 : i32
    %0 = arith.cmpi eq, %arg1, %c0_i32 : i32
    %1 = arith.extui %0 : i1 to i32
    %c0_i32_0 = arith.constant 0 : i32
    %2 = arith.cmpi ne, %1, %c0_i32_0 : i32
    scf.if %2 {
      %cst_9 = arith.constant 0.000000e+00 : f32
      %12 = vector.broadcast %cst_9 : f32 to vector<8x512xf32>
      %c0_10 = arith.constant 0 : index
      %c0_11 = arith.constant 0 : index
      %13 = vector.load %arg10[%c0_10, %c0_11] : memref<8x512xf32, #tpu.memory_space<vmem>>, vector<8x512xf32>
      tpu.vector_store %arg10[%c0_10, %c0_11], %12 {strides = array<i32>} : memref<8x512xf32, #tpu.memory_space<vmem>>, vector<8x512xf32>,
    } else {
    }
    %c0 = arith.constant 0 : index
    %c0_1 = arith.constant 0 : index
    %3 = vector.load %arg10[%c0, %c0_1] : memref<8x512xf32, #tpu.memory_space<vmem>>, vector<8x512xf32>
    %c0_2 = arith.constant 0 : index
    %c0_3 = arith.constant 0 : index
    %4 = vector.load %arg2[%c0_2, %c0_3] : memref<8x512xbf16, #tpu.memory_space<vmem>>, vector<8x512xbf16>
    %c0_4 = arith.constant 0 : index
    %c0_5 = arith.constant 0 : index
    %5 = vector.load %arg3[%c0_4, %c0_5] : memref<512x512xbf16, #tpu.memory_space<vmem>>, vector<512x512xbf16>
    %cst = arith.constant dense<0.000000e+00> : vector<8x512xf32>
    %6 = tpu.matmul %4, %5, %cst {dimension_numbers = #tpu.dot_dimension_numbers<[1], [0], [0], [1], [0, 0, 1, 1], [], []>} : vector<8x512xbf16>, vector<512x512xbf16>, vector<8x512xf32> -> vector<8x512xf32>
    %7 = arith.addf %3, %6 : vector<8x512xf32>
    %c0_6 = arith.constant 0 : index
    %c0_7 = arith.constant 0 : index
    %8 = vector.load %arg10[%c0_6, %c0_7] : memref<8x512xf32, #tpu.memory_space<vmem>>, vector<8x512xf32>
    tpu.vector_store %arg10[%c0_6, %c0_7], %7 {strides = array<i32>} : memref<8x512xf32, #tpu.memory_space<vmem>>, vector<8x512xf32>,
    %c6_i32 = arith.constant 6 : i32
    %9 = arith.cmpi eq, %arg1, %c6_i32 : i32
    %10 = arith.extui %9 : i1 to i32
    %c0_i32_8 = arith.constant 0 : i32
    %11 = arith.cmpi ne, %10, %c0_i32_8 : i32
    scf.if %11 {
      %c0_9 = arith.constant 0 : index
      %c0_10 = arith.constant 0 : index
      %12 = vector.load %arg10[%c0_9, %c0_10] : memref<8x512xf32, #tpu.memory_space<vmem>>, vector<8x512xf32>
      %c0_11 = arith.constant 0 : index
      %c0_12 = arith.constant 0 : index
      %13 = vector.load %arg4[%c0_11, %c0_12] : memref<1x512xf32, #tpu.memory_space<vmem>>, vector<1x512xf32>
      %14 = vector.broadcast %13 : vector<1x512xf32> to vector<8x512xf32>
      %15 = arith.addf %12, %14 : vector<8x512xf32>
      %cst_13 = arith.constant 0.000000e+00 : f32
      %16 = vector.broadcast %cst_13 : f32 to vector<8x512xf32>
      %17 = arith.maximumf %15, %16 : vector<8x512xf32>
      %18 = arith.truncf %17 : vector<8x512xf32> to vector<8x512xbf16>
      %c0_14 = arith.constant 0 : index
      %c0_15 = arith.constant 0 : index
      %19 = vector.load %arg5[%c0_14, %c0_15] : memref<512x512xbf16, #tpu.memory_space<vmem>>, vector<512x512xbf16>
      %cst_16 = arith.constant dense<0.000000e+00> : vector<8x512xf32>
      %20 = tpu.matmul %18, %19, %cst_16 {dimension_numbers = #tpu.dot_dimension_numbers<[1], [0], [0], [1], [0, 0, 1, 1], [], []>} : vector<8x512xbf16>, vector<512x512xbf16>, vector<8x512xf32> -> vector<8x512xf32>
      %c0_17 = arith.constant 0 : index
      %c0_18 = arith.constant 0 : index
      %21 = vector.load %arg6[%c0_17, %c0_18] : memref<1x512xf32, #tpu.memory_space<vmem>>, vector<1x512xf32>
      %22 = vector.broadcast %21 : vector<1x512xf32> to vector<8x512xf32>
      %23 = arith.addf %20, %22 : vector<8x512xf32>
      %cst_19 = arith.constant 0.000000e+00 : f32
      %24 = vector.broadcast %cst_19 : f32 to vector<8x512xf32>
      %25 = arith.maximumf %23, %24 : vector<8x512xf32>
      %26 = arith.truncf %25 : vector<8x512xf32> to vector<8x512xbf16>
      %c0_20 = arith.constant 0 : index
      %c0_21 = arith.constant 0 : index
      %27 = vector.load %arg7[%c0_20, %c0_21] : memref<512x512xbf16, #tpu.memory_space<vmem>>, vector<512x512xbf16>
      %cst_22 = arith.constant dense<0.000000e+00> : vector<8x512xf32>
      %28 = tpu.matmul %26, %27, %cst_22 {dimension_numbers = #tpu.dot_dimension_numbers<[1], [0], [0], [1], [0, 0, 1, 1], [], []>} : vector<8x512xbf16>, vector<512x512xbf16>, vector<8x512xf32> -> vector<8x512xf32>
      %c0_23 = arith.constant 0 : index
      %c0_24 = arith.constant 0 : index
      %29 = vector.load %arg8[%c0_23, %c0_24] : memref<1x512xf32, #tpu.memory_space<vmem>>, vector<1x512xf32>
      %30 = vector.broadcast %29 : vector<1x512xf32> to vector<8x512xf32>
      %31 = arith.addf %28, %30 : vector<8x512xf32>
      %c0_25 = arith.constant 0 : index
      %c0_26 = arith.constant 0 : index
      %32 = vector.load %arg9[%c0_25, %c0_26] : memref<8x512xf32, #tpu.memory_space<vmem>>, vector<8x512xf32>
      tpu.vector_store %arg9[%c0_25, %c0_26], %31 {strides = array<i32>} : memref<8x512xf32, #tpu.memory_space<vmem>>, vector<8x512xf32>,
    } else {
    }
    return
  }
  func.func @transform_0(%arg0: i32, %arg1: i32) -> (i32, i32) {
    %c0_i32 = arith.constant 0 : i32
    return %arg0, %arg1 : i32, i32
  }
  func.func @transform_1(%arg0: i32, %arg1: i32) -> (i32, i32) {
    %c0_i32 = arith.constant 0 : i32
    %c0_i32_0 = arith.constant 0 : i32
    return %arg1, %c0_i32 : i32, i32
  }
  func.func @transform_2(%arg0: i32, %arg1: i32) -> (i32, i32) {
    %c0_i32 = arith.constant 0 : i32
    %c0_i32_0 = arith.constant 0 : i32
    %c0_i32_1 = arith.constant 0 : i32
    return %c0_i32, %c0_i32_0 : i32, i32
  }
  func.func @transform_3(%arg0: i32, %arg1: i32) -> (i32, i32) {
    %c0_i32 = arith.constant 0 : i32
    %c0_i32_0 = arith.constant 0 : i32
    %c0_i32_1 = arith.constant 0 : i32
    return %c0_i32, %c0_i32_0 : i32, i32
  }
  func.func @transform_4(%arg0: i32, %arg1: i32) -> (i32, i32) {
    %c0_i32 = arith.constant 0 : i32
    %c0_i32_0 = arith.constant 0 : i32
    %c0_i32_1 = arith.constant 0 : i32
    return %c0_i32, %c0_i32_0 : i32, i32
  }
  func.func @transform_5(%arg0: i32, %arg1: i32) -> (i32, i32) {
    %c0_i32 = arith.constant 0 : i32
    %c0_i32_0 = arith.constant 0 : i32
    %c0_i32_1 = arith.constant 0 : i32
    return %c0_i32, %c0_i32_0 : i32, i32
  }
  func.func @transform_6(%arg0: i32, %arg1: i32) -> (i32, i32) {
    %c0_i32 = arith.constant 0 : i32
    %c0_i32_0 = arith.constant 0 : i32
    %c0_i32_1 = arith.constant 0 : i32
    return %c0_i32, %c0_i32_0 : i32, i32
  }
  func.func @transform_7(%arg0: i32, %arg1: i32) -> (i32, i32) {
    %c0_i32 = arith.constant 0 : i32
    %c0_i32_0 = arith.constant 0 : i32
    return %arg0, %c0_i32 : i32, i32
  }
}

</mosaic_0001>

<bundles_post_ra>
// kernel: rnd_model_forward.5
= control target key start
LH: loop header
LB: loop body
LE: loop exit
PB: predicated region body
PF: predicated region fallthrough
CT: control target
= control target key end

     0   :  { %s1389_s12 = smov 0   ;;  %s1391_s13 = smov 0   ;;  %s1555_s0 = inlined_call_operand.vmem [shape: bf16[800,128], index: 0, kind: input, shape index: {}]   ;;  %s1556_s1 = inlined_call_operand.vmem [shape: bf16[128,128], index: 1, kind: input, shape index: {}]   ;;  %s1557_s2 = inlined_call_operand.vmem [shape: f32[1,128], index: 2, kind: input, shape index: {}]   ;;  %s1558_s3 = inlined_call_operand.vmem [shape: bf16[800,128], index: 3, kind: output, shape index: {}]  }
   0x1   :  { %s1393_s14 = smov 0  }
   0x2 LB: > { %s32_s15 = sadd.s32 1, %s1361_s13  ;;  %p1043_p0 = scmp.ge.s32.totalorder %s1365_s14, 1  ;;  %s1365_s14 = sphi %s1393_s14, %s13_s14   ;;  %s1361_s13 = sphi %s1391_s13, %s1560_s13   ;;  %s1357_s12 = sphi %s1389_s12, %s1559_s12  }
   0x3   : > { %p34_p1 = scmp.ge.s32.totalorder %s32_s15, 4  ;;  %p188_p2 = scmp.lt.s32.totalorder %s1365_s14, 5 }
   0x5   : > { %s1562_s15 = smov (%p34_p1, %s32_s15), 0  ;;  %p189_p3 = pnand %p1043_p0, %p188_p2 }
   0x6   : > { %v1322_v0 = vld [vmem:[%s1556_s1] sm:$0xff] (!%p189_p3)   ;;  %v1367_v1 = vmov (!%p189_p3), 0.0   ;;  %v1323_v2 = vld [vmem:[%s1556_s1 + $0x8] sm:$0xff] (!%p189_p3)   ;;  %s229_s20 = smul.u32 (!%p189_p3), 25, %s1357_s12  ;;  %vm1368_vm0 = vmmov (!%p189_p3), 0   ;;  %v1324_v3 = vld [vmem:[%s1556_s1 + $0x10] sm:$0xff] (!%p189_p3)  }
   0x7   : > { %192 = sbr.rel (%p189_p3) target bundleno = 309 (0x135), region = 32  ;;  %1212 = vmatprep.subr.bf16.mxu0 (!%p189_p3), %v1367_v1  ;;  %1280 = vmatprep.subr.bf16.mxu1 (!%p189_p3), %v1367_v1  ;;  %v1325_v4 = vld [vmem:[%s1556_s1 + $0x18] sm:$0xff] (!%p189_p3)   ;;  %v1326_v5 = vld [vmem:[%s1556_s1 + $0x20] sm:$0xff] (!%p189_p3)   ;;  %v1327_v6 = vld [vmem:[%s1556_s1 + $0x28] sm:$0xff] (!%p189_p3)  }
   0x8   : > { %1213 = vmatpush3.bf16.msra.mxu0 (!%p189_p3), %v1322_v0  ;;  %1288 = vmatpush3.bf16.msra.mxu1 (!%p189_p3), %v1322_v0  ;;  %p230_p4 = scmp.lt.s32.totalorder (!%p189_p3), %s229_s20, 99  ;;  %v1328_v7 = vld [vmem:[%s1556_s1 + $0x30] sm:$0xff] (!%p189_p3)   ;;  %v1329_v8 = vld [vmem:[%s1556_s1 + $0x38] sm:$0xff] (!%p189_p3)   ;;  %v1499_v22 = vld [vmem:[%s1557_s2] ss:$0 sm:$0xff] (!%p189_p3) }
   0x9   : > { %1214 = vmatprep.subr.bf16.mxu0 (!%p189_p3), %v1367_v1  ;;  %1281 = vmatprep.subr.bf16.mxu1 (!%p189_p3), %v1367_v1 }
   0xa   : > { %1228 = vmatprep.mubr.msk.bf16.mxu0 (!%p189_p3), %vm1368_vm0, %v1367_v1  ;;  %1256 = vmatprep.mubr.msk.bf16.mxu1 (!%p189_p3), %vm1368_vm0, %v1367_v1 }
   0xc   : > { %1215 = vmatpush3.bf16.msra.mxu0 (!%p189_p3), %v1323_v2  ;;  %1289 = vmatpush3.bf16.msra.mxu1 (!%p189_p3), %v1323_v2 }
   0xd   : > { %1216 = vmatprep.subr.bf16.mxu0 (!%p189_p3), %v1367_v1  ;;  %1282 = vmatprep.subr.bf16.mxu1 (!%p189_p3), %v1367_v1 }
   0xe   : > { %s1564_s20 = smov (!%p230_p4, %s229_s20), 99 }
   0xf   : > { %s1044_s23 = sshll.u32 %s1564_s20, 2 }
  0x10   : > { %s1434_s26 = scalar_lea.vmem %s1555_s0, %s1044_s23  ;;  %1217 = vmatpush3.bf16.msra.mxu0 %v1324_v3  ;;  %1290 = vmatpush3.bf16.msra.mxu1 %v1324_v3  ;;  %s1510_s17 = scalar_lea.vmem %s1558_s3, %s1044_s23 }
  0x11   : > { %1218 = vmatprep.subr.bf16.mxu0 %v1367_v1  ;;  %1283 = vmatprep.subr.bf16.mxu1 %v1367_v1  ;;  %v1330_v9 = vld [vmem:[%s1434_s26] sm:$0xff]   ;;  %v1331_v10 = vld [vmem:[%s1434_s26 + $0x38] sm:$0xff]   ;;  %v1332_v11 = vld [vmem:[%s1434_s26 + $0x8] sm:$0xff]  }
  0x12   : > { %v1333_v12 = vld [vmem:[%s1434_s26 + $0x40] sm:$0xff]   ;;  %v1334_v13 = vld [vmem:[%s1434_s26 + $0x10] sm:$0xff]   ;;  %v1335_v14 = vld [vmem:[%s1434_s26 + $0x48] sm:$0xff]  }
  0x13   : > { %v1336_v15 = vld [vmem:[%s1434_s26 + $0x18] sm:$0xff]   ;;  %v1337_v16 = vld [vmem:[%s1434_s26 + $0x50] sm:$0xff]   ;;  %v1338_v17 = vld [vmem:[%s1434_s26 + $0x20] sm:$0xff]  }
  0x14   : > { %1219 = vmatpush3.bf16.msra.mxu0 %v1325_v4  ;;  %1291 = vmatpush3.bf16.msra.mxu1 %v1325_v4  ;;  %v1339_v18 = vld [vmem:[%s1434_s26 + $0x58] sm:$0xff]   ;;  %v1340_v19 = vld [vmem:[%s1434_s26 + $0x28] sm:$0xff]   ;;  %v1341_v20 = vld [vmem:[%s1434_s26 + $0x60] ss:$0 sps:$4 sm:$0xff]  }
  0x15   : > { %1220 = vmatprep.subr.bf16.mxu0 %v1367_v1  ;;  %1284 = vmatprep.subr.bf16.mxu1 %v1367_v1  ;;  %v1342_v21 = vld [vmem:[%s1434_s26 + $0x30] sm:$0xff]  }
  0x18   : > { %1221 = vmatpush3.bf16.msra.mxu0 %v1326_v5  ;;  %1292 = vmatpush3.bf16.msra.mxu1 %v1326_v5 }
  0x19   : > { %1222 = vmatprep.subr.bf16.mxu0 %v1367_v1  ;;  %1285 = vmatprep.subr.bf16.mxu1 %v1367_v1 }
  0x1c   : > { %1223 = vmatpush3.bf16.msra.mxu0 %v1327_v6  ;;  %1293 = vmatpush3.bf16.msra.mxu1 %v1327_v6 }
  0x1d   : > { %1224 = vmatprep.subr.bf16.mxu0 %v1367_v1  ;;  %1286 = vmatprep.subr.bf16.mxu1 %v1367_v1 }
  0x20   : > { %1225 = vmatpush3.bf16.msra.mxu0 %v1328_v7  ;;  %1294 = vmatpush3.bf16.msra.mxu1 %v1328_v7 }
  0x21   : > { %1226 = vmatprep.subr.bf16.mxu0 %v1367_v1  ;;  %1287 = vmatprep.subr.bf16.mxu1 %v1367_v1 }
  0x24   : > { %1227 = vmatpush3.bf16.msra.mxu0 %v1329_v8  ;;  %1295 = vmatpush3.bf16.msra.mxu1 %v1329_v8 }
  0x27   : > { %1229 = vmatmul.mubr.bf16.vlgmr.msra.gmra.mrb[0].mxu0 %v1330_v9  ;;  %1257 = vmatmul.mubr.bf16.vlgmr.msra.gmra.mrb[0].mxu1 %v1331_v10 }
  0x28   : > { %1232 = vmatprep.mubr.msk.bf16.mxu0 %vm1368_vm0, %v1367_v1  ;;  %1260 = vmatprep.mubr.msk.bf16.mxu1 %vm1368_vm0, %v1367_v1 }
  0x2f   : > { %1233 = vmatmul.mubr.bf16.gmra.mrb[4].mxu0 %v1332_v11  ;;  %1261 = vmatmul.mubr.bf16.gmra.mrb[4].mxu1 %v1333_v12 }
  0x30   : > { %1236 = vmatprep.mubr.msk.bf16.mxu0 %vm1368_vm0, %v1367_v1  ;;  %1264 = vmatprep.mubr.msk.bf16.mxu1 %vm1368_vm0, %v1367_v1 }
  0x37   : > { %1237 = vmatmul.mubr.bf16.gmra.mrb[8].mxu0 %v1334_v13  ;;  %1265 = vmatmul.mubr.bf16.gmra.mrb[8].mxu1 %v1335_v14 }
  0x38   : > { %1240 = vmatprep.mubr.msk.bf16.mxu0 %vm1368_vm0, %v1367_v1  ;;  %1268 = vmatprep.mubr.msk.bf16.mxu1 %vm1368_vm0, %v1367_v1 }
  0x3f   : > { %1241 = vmatmul.mubr.bf16.gmra.mrb[12].mxu0 %v1336_v15  ;;  %1269 = vmatmul.mubr.bf16.gmra.mrb[12].mxu1 %v1337_v16 }
  0x40   : > { %1244 = vmatprep.mubr.msk.bf16.mxu0 %vm1368_vm0, %v1367_v1  ;;  %1272 = vmatprep.mubr.msk.bf16.mxu1 %vm1368_vm0, %v1367_v1 }
  0x47   : > { %1245 = vmatmul.mubr.bf16.gmra.mrb[16].mxu0 %v1338_v17  ;;  %1273 = vmatmul.mubr.bf16.gmra.mrb[16].mxu1 %v1339_v18 }
  0x48   : > { %1248 = vmatprep.mubr.msk.bf16.mxu0 %vm1368_vm0, %v1367_v1  ;;  %1276 = vmatprep.mubr.msk.bf16.mxu1 %vm1368_vm0, %v1367_v1 }
  0x4f   : > { %1249 = vmatmul.mubr.bf16.gmra.mrb[20].mxu0 %v1340_v19  ;;  %1277 = vmatmul.mubr.bf16.gmra.mrb[20].mxu1 %v1341_v20 }
  0x50   : > { %1252 = vmatprep.mubr.msk.bf16.mxu0 %vm1368_vm0, %v1367_v1 }
  0x57   : > { %1253 = vmatmul.mubr.bf16.gmra.mrb[24].mxu0 %v1342_v21 }
  0xfa   : > { %v513_v23 = vpop.f32.mrb[0].mxu0  ;;  %v569_v24 = vpop.f32.mrb[0].mxu1 }
  0xfb   : > { %v700_v25 = vadd.f32 %v1499_v22, %v513_v23  ;;  %v1230_v26 = vpop.f32.mrb[1].mxu0  ;;  %v714_v27 = vadd.f32 %v1499_v22, %v569_v24  ;;  %v1258_v28 = vpop.f32.mrb[1].mxu1 }
  0xfc   : > { %v516_v29 = vpop.f32.mrb[2].mxu0  ;;  %v572_v30 = vpop.f32.mrb[2].mxu1 }
  0xfd   : > { %v750_v31 = vmul.f32 0.01, %v700_v25  ;;  %v701_v32 = vadd.f32 %v1499_v22, %v516_v29  ;;  %v1231_v33 = vpop.f32.mrb[3].mxu0  ;;  %vm739_vm1 = vcmp.gt.f32.partialorder %v714_v27, 0.0  ;;  %v1259_v34 = vpop.f32.mrb[3].mxu1  ;;  %vm725_vm2 = vcmp.gt.f32.partialorder %v700_v25, 0.0 }
  0xfe   : > { %v764_v35 = vmul.f32 0.01, %v714_v27  ;;  %v715_v36 = vadd.f32 %v1499_v22, %v572_v30 }
  0xff   : > { %vm726_vm3 = vcmp.gt.f32.partialorder %v701_v32, 0.0  ;;  %v751_v37 = vmul.f32 0.01, %v701_v32  ;;  %v775_v40 = vsel %vm725_vm2, %v700_v25, %v750_v31 }
 0x100   : > { %v789_v38 = vsel %vm739_vm1, %v714_v27, %v764_v35  ;;  %vm740_vm4 = vcmp.gt.f32.partialorder %v715_v36, 0.0  ;;  %v765_v39 = vmul.f32 0.01, %v715_v36 }
 0x101   : > { %v776_v41 = vsel %vm726_vm3, %v701_v32, %v751_v37 }
 0x102   : > { %v1123_v42 = vpack.c.bf16 %v776_v41, %v775_v40  ;;  %v521_v43 = vpop.f32.mrb[4].mxu0  ;;  %v790_v44 = vsel %vm740_vm4, %v715_v36, %v765_v39  ;;  %v577_v45 = vpop.f32.mrb[4].mxu1 }
 0x103   : > { %v702_v46 = vadd.f32 %v1499_v22, %v521_v43  ;;  %v1158_v47 = vpack.c.bf16 %v790_v44, %v789_v38  ;;  %v1234_v48 = vpop.f32.mrb[5].mxu0  ;;  %v716_v49 = vadd.f32 %v1499_v22, %v577_v45  ;;  %v1262_v50 = vpop.f32.mrb[5].mxu1 }
 0x104   : > { %1124 = vst [vmem:[%s1510_s17] sm:$0xff] %v1123_v42   ;;  %v524_v51 = vpop.f32.mrb[6].mxu0  ;;  %v580_v52 = vpop.f32.mrb[6].mxu1 }
 0x105   : > { %v752_v53 = vmul.f32 0.01, %v702_v46  ;;  %1186 = vst [vmem:[%s1510_s17 + $0x38] sm:$0xff] %v1158_v47   ;;  %v703_v54 = vadd.f32 %v1499_v22, %v524_v51  ;;  %v1235_v55 = vpop.f32.mrb[7].mxu0  ;;  %vm741_vm5 = vcmp.gt.f32.partialorder %v716_v49, 0.0  ;;  %v1263_v56 = vpop.f32.mrb[7].mxu1  ;;  %v717_v58 = vadd.f32 %v1499_v22, %v580_v52 }
 0x106   : > { %vm727_vm6 = vcmp.gt.f32.partialorder %v702_v46, 0.0  ;;  %v766_v57 = vmul.f32 0.01, %v716_v49 }
 0x107   : > { %vm728_vm7 = vcmp.gt.f32.partialorder %v703_v54, 0.0  ;;  %v753_v59 = vmul.f32 0.01, %v703_v54  ;;  %vm742_vm8 = vcmp.gt.f32.partialorder %v717_v58, 0.0  ;;  %v767_v61 = vmul.f32 0.01, %v717_v58 }
 0x108   : > { %v791_v60 = vsel %vm741_vm5, %v716_v49, %v766_v57  ;;  %v777_v62 = vsel %vm727_vm6, %v702_v46, %v752_v53 }
 0x109   : > { %v778_v63 = vsel %vm728_vm7, %v703_v54, %v753_v59  ;;  %v792_v2 = vsel %vm742_vm8, %v717_v58, %v767_v61 }
 0x10a   : > { %v1128_v0 = vpack.c.bf16 %v778_v63, %v777_v62  ;;  %v529_v1 = vpop.f32.mrb[8].mxu0  ;;  %v585_v3 = vpop.f32.mrb[8].mxu1  ;;  %v1163_v5 = vpack.c.bf16 %v792_v2, %v791_v60 }
 0x10b   : > { %v704_v4 = vadd.f32 %v1499_v22, %v529_v1  ;;  %v1238_v6 = vpop.f32.mrb[9].mxu0  ;;  %v718_v7 = vadd.f32 %v1499_v22, %v585_v3  ;;  %v1266_v8 = vpop.f32.mrb[9].mxu1 }
 0x10c   : > { %1180 = vst [vmem:[%s1510_s17 + $0x8] sm:$0xff] %v1128_v0   ;;  %v532_v9 = vpop.f32.mrb[10].mxu0  ;;  %v588_v10 = vpop.f32.mrb[10].mxu1  ;;  %1187 = vst [vmem:[%s1510_s17 + $0x40] sm:$0xff] %v1163_v5  }
 0x10d   : > { %v754_v11 = vmul.f32 0.01, %v704_v4  ;;  %v705_v12 = vadd.f32 %v1499_v22, %v532_v9  ;;  %v1239_v13 = vpop.f32.mrb[11].mxu0  ;;  %vm743_vm9 = vcmp.gt.f32.partialorder %v718_v7, 0.0  ;;  %v1267_v14 = vpop.f32.mrb[11].mxu1  ;;  %vm729_vm10 = vcmp.gt.f32.partialorder %v704_v4, 0.0 }
 0x10e   : > { %v768_v15 = vmul.f32 0.01, %v718_v7  ;;  %v719_v16 = vadd.f32 %v1499_v22, %v588_v10 }
 0x10f   : > { %vm730_vm11 = vcmp.gt.f32.partialorder %v705_v12, 0.0  ;;  %v755_v17 = vmul.f32 0.01, %v705_v12  ;;  %v779_v20 = vsel %vm729_vm10, %v704_v4, %v754_v11 }
 0x110   : > { %v793_v18 = vsel %vm743_vm9, %v718_v7, %v768_v15  ;;  %vm744_vm12 = vcmp.gt.f32.partialorder %v719_v16, 0.0  ;;  %v769_v19 = vmul.f32 0.01, %v719_v16 }
 0x111   : > { %v780_v21 = vsel %vm730_vm11, %v705_v12, %v755_v17 }
 0x112   : > { %v1133_v23 = vpack.c.bf16 %v780_v21, %v779_v20  ;;  %v537_v24 = vpop.f32.mrb[12].mxu0  ;;  %v794_v25 = vsel %vm744_vm12, %v719_v16, %v769_v19  ;;  %v593_v26 = vpop.f32.mrb[12].mxu1 }
 0x113   : > { %v706_v27 = vadd.f32 %v1499_v22, %v537_v24  ;;  %v1168_v28 = vpack.c.bf16 %v794_v25, %v793_v18  ;;  %v1242_v29 = vpop.f32.mrb[13].mxu0  ;;  %v720_v30 = vadd.f32 %v1499_v22, %v593_v26  ;;  %v1270_v31 = vpop.f32.mrb[13].mxu1 }
 0x114   : > { %1181 = vst [vmem:[%s1510_s17 + $0x10] sm:$0xff] %v1133_v23   ;;  %v540_v32 = vpop.f32.mrb[14].mxu0  ;;  %v596_v33 = vpop.f32.mrb[14].mxu1 }
 0x115   : > { %v756_v34 = vmul.f32 0.01, %v706_v27  ;;  %1188 = vst [vmem:[%s1510_s17 + $0x48] sm:$0xff] %v1168_v28   ;;  %v707_v35 = vadd.f32 %v1499_v22, %v540_v32  ;;  %v1243_v36 = vpop.f32.mrb[15].mxu0  ;;  %vm745_vm13 = vcmp.gt.f32.partialorder %v720_v30, 0.0  ;;  %v1271_v37 = vpop.f32.mrb[15].mxu1  ;;  %v721_v39 = vadd.f32 %v1499_v22, %v596_v33 }
 0x116   : > { %vm731_vm14 = vcmp.gt.f32.partialorder %v706_v27, 0.0  ;;  %v770_v38 = vmul.f32 0.01, %v720_v30 }
 0x117   : > { %vm732_vm15 = vcmp.gt.f32.partialorder %v707_v35, 0.0  ;;  %v757_v40 = vmul.f32 0.01, %v707_v35  ;;  %vm746_vm0 = vcmp.gt.f32.partialorder %v721_v39, 0.0  ;;  %v771_v42 = vmul.f32 0.01, %v721_v39 }
 0x118   : > { %v795_v41 = vsel %vm745_vm13, %v720_v30, %v770_v38  ;;  %v781_v43 = vsel %vm731_vm14, %v706_v27, %v756_v34 }
 0x119   : > { %v782_v44 = vsel %vm732_vm15, %v707_v35, %v757_v40  ;;  %v796_v47 = vsel %vm746_vm0, %v721_v39, %v771_v42 }
 0x11a   : > { %v1138_v45 = vpack.c.bf16 %v782_v44, %v781_v43  ;;  %v545_v46 = vpop.f32.mrb[16].mxu0  ;;  %v601_v48 = vpop.f32.mrb[16].mxu1  ;;  %v1173_v50 = vpack.c.bf16 %v796_v47, %v795_v41 }
 0x11b   : > { %v708_v49 = vadd.f32 %v1499_v22, %v545_v46  ;;  %v1246_v51 = vpop.f32.mrb[17].mxu0  ;;  %v722_v52 = vadd.f32 %v1499_v22, %v601_v48  ;;  %v1274_v53 = vpop.f32.mrb[17].mxu1 }
 0x11c   : > { %1182 = vst [vmem:[%s1510_s17 + $0x18] sm:$0xff] %v1138_v45   ;;  %v548_v54 = vpop.f32.mrb[18].mxu0  ;;  %v604_v55 = vpop.f32.mrb[18].mxu1  ;;  %1189 = vst [vmem:[%s1510_s17 + $0x50] sm:$0xff] %v1173_v50  }
 0x11d   : > { %v758_v56 = vmul.f32 0.01, %v708_v49  ;;  %v709_v57 = vadd.f32 %v1499_v22, %v548_v54  ;;  %v1247_v58 = vpop.f32.mrb[19].mxu0  ;;  %vm747_vm1 = vcmp.gt.f32.partialorder %v722_v52, 0.0  ;;  %v1275_v59 = vpop.f32.mrb[19].mxu1  ;;  %vm733_vm2 = vcmp.gt.f32.partialorder %v708_v49, 0.0 }
 0x11e   : > { %v772_v60 = vmul.f32 0.01, %v722_v52  ;;  %v723_v61 = vadd.f32 %v1499_v22, %v604_v55 }
 0x11f   : > { %vm734_vm3 = vcmp.gt.f32.partialorder %v709_v57, 0.0  ;;  %v759_v62 = vmul.f32 0.01, %v709_v57  ;;  %v783_v1 = vsel %vm733_vm2, %v708_v49, %v758_v56 }
 0x120   : > { %v797_v63 = vsel %vm747_vm1, %v722_v52, %v772_v60  ;;  %vm748_vm4 = vcmp.gt.f32.partialorder %v723_v61, 0.0  ;;  %v773_v0 = vmul.f32 0.01, %v723_v61 }
 0x121   : > { %v784_v2 = vsel %vm734_vm3, %v709_v57, %v759_v62 }
 0x122   : > { %v1143_v3 = vpack.c.bf16 %v784_v2, %v783_v1  ;;  %v553_v4 = vpop.f32.mrb[20].mxu0  ;;  %v798_v5 = vsel %vm748_vm4, %v723_v61, %v773_v0  ;;  %v609_v6 = vpop.f32.mrb[20].mxu1 }
 0x123   : > { %v710_v7 = vadd.f32 %v1499_v22, %v553_v4  ;;  %v1178_v8 = vpack.c.bf16 %v798_v5, %v797_v63  ;;  %v1250_v9 = vpop.f32.mrb[21].mxu0  ;;  %v724_v10 = vadd.f32 %v1499_v22, %v609_v6  ;;  %v1278_v11 = vpop.f32.mrb[21].mxu1 }
 0x124   : > { %1183 = vst [vmem:[%s1510_s17 + $0x20] sm:$0xff] %v1143_v3   ;;  %v556_v12 = vpop.f32.mrb[22].mxu0  ;;  %v612_v13 = vpop.f32.mrb[22].mxu1 }
 0x125   : > { %v760_v14 = vmul.f32 0.01, %v710_v7  ;;  %1190 = vst [vmem:[%s1510_s17 + $0x58] sm:$0xff] %v1178_v8   ;;  %v711_v15 = vadd.f32 %v1499_v22, %v556_v12  ;;  %v1251_v16 = vpop.f32.mrb[23].mxu0  ;;  %vm749_vm5 = vcmp.gt.f32.partialorder %v724_v10, 0.0  ;;  %v1279_v17 = vpop.f32.mrb[23].mxu1 }
 0x126   : > { %vm735_vm6 = vcmp.gt.f32.partialorder %v710_v7, 0.0  ;;  %v774_v18 = vmul.f32 0.01, %v724_v10 }
 0x127   : > { %vm736_vm7 = vcmp.gt.f32.partialorder %v711_v15, 0.0  ;;  %v761_v19 = vmul.f32 0.01, %v711_v15  ;;  %v785_v21 = vsel %vm735_vm6, %v710_v7, %v760_v14 }
 0x128   : > { %v799_v20 = vsel %vm749_vm5, %v724_v10, %v774_v18 }
 0x129   : > { %v786_v23 = vsel %vm736_vm7, %v711_v15, %v761_v19  ;;  %v1119_v24 = vpack.c.bf16 %v799_v20, %v799_v20 }
 0x12a   : > { %v1148_v25 = vpack.c.bf16 %v786_v23, %v785_v21  ;;  %v561_v26 = vpop.f32.mrb[24].mxu0 }
 0x12b   : > { %925 = vst [vmem:[%s1510_s17 + $0x60] sm:$0xf] %v1119_v24  ;;  %v712_v27 = vadd.f32 %v1499_v22, %v561_v26  ;;  %v1254_v28 = vpop.f32.mrb[25].mxu0 }
 0x12c   : > { %1184 = vst [vmem:[%s1510_s17 + $0x28] sm:$0xff] %v1148_v25   ;;  %v564_v29 = vpop.f32.mrb[26].mxu0 }
 0x12d   : > { %v762_v30 = vmul.f32 0.01, %v712_v27  ;;  %v713_v31 = vadd.f32 %v1499_v22, %v564_v29  ;;  %v1255_v32 = vpop.f32.mrb[27].mxu0  ;;  %vm737_vm8 = vcmp.gt.f32.partialorder %v712_v27, 0.0 }
 0x12f   : > { %vm738_vm9 = vcmp.gt.f32.partialorder %v713_v31, 0.0  ;;  %v763_v33 = vmul.f32 0.01, %v713_v31  ;;  %v787_v34 = vsel %vm737_vm8, %v712_v27, %v762_v30 }
 0x131   : > { %v788_v35 = vsel %vm738_vm9, %v713_v31, %v763_v33 }
 0x132   : > { %v1153_v36 = vpack.c.bf16 %v788_v35, %v787_v34 }
 0x134   : > { %1185 = vst [vmem:[%s1510_s17 + $0x30] sm:$0xff] %v1153_v36  }
 0x135 PF: > { %s13_s14 = sadd.s32 1, %s1365_s14   ;;  %s1559_s12 = smov %s1361_s13 }
 0x136   : > { %p10_p5 = scmp.ge.s32.totalorder %s13_s14, 6   ;;  %s1560_s13 = smov %s1562_s15 }
 0x138   :  { %12 = sbr.rel (!%p10_p5) target bundleno = 2 (0x2), region = 76 }

// kernel: rnd_model_forward.6
= control target key start
LH: loop header
LB: loop body
LE: loop exit
PB: predicated region body
PF: predicated region fallthrough
CT: control target
= control target key end

     0   :  { %s2087_s12 = smov 0   ;;  %s2089_s13 = smov 0   ;;  %s2379_s0 = inlined_call_operand.vmem [shape: bf16[168,1024], index: 0, kind: input, shape index: {}]   ;;  %s2380_s1 = inlined_call_operand.vmem [shape: bf16[1024,128], index: 1, kind: input, shape index: {}]   ;;  %s2381_s2 = inlined_call_operand.vmem [shape: f32[1,128], index: 2, kind: input, shape index: {}]   ;;  %s2382_s3 = inlined_call_operand.vmem [shape: bf16[168,128], index: 3, kind: output, shape index: {}]  }
   0x1   :  { %s2091_s14 = smov 0   ;;  %s2093_s15 = smov 0  }
   0x2   :  { %s2095_s16 = smov 0  }
   0x3 LB: > { %s25_s17 = sadd.s32 1, %s2060_s15  ;;  %p48_p1 = scmp.ne.s32.totalorder %s2052_s13, %s2048_s12  ;;  %s2064_s16 = sphi %s2095_s16, %s13_s16   ;;  %s2060_s15 = sphi %s2093_s15, %s2386_s15   ;;  %s2056_s14 = sphi %s2091_s14, %s2385_s14   ;;  %s2052_s13 = sphi %s2089_s13, %s2384_s13   ;;  %s2048_s12 = sphi %s2087_s12, %s2383_s12  }
   0x4   : > { %p26_p0 = scmp.ge.s32.totalorder %s25_s17, 2  ;;  %p49_p2 = scmp.eq.s32.totalorder %s2064_s16, 0 }
   0x5   : > { %s41_s19 = sadd.s32 1, %s2052_s13  ;;  %p1532_p5 = scmp.ge.s32.totalorder %s2064_s16, 2 }
   0x6   : > { %s2388_s17 = smov (%p26_p0, %s25_s17), 0  ;;  %p50_p3 = por %p49_p2, %p48_p1 }
   0x7   : > { %s37_s18 = ssub.s32 %s2060_s15, %s2388_s17  ;;  %162 = sbr.rel (%p1532_p5) target bundleno = 39 (0x27), region = 20 }
   0x8   : > { %p39_p4 = scmp.eq.s32.totalorder %s37_s18, 0 }
   0xa   : > { %s2122_s20 = scalar_select %p39_p4, %s2052_s13, %s41_s19  }
   0xe   : > { %165 = sbr.rel (!%p50_p3) target bundleno = 39 (0x27), region = 24  ;;  %s167_s21 = sand.u32 (%p50_p3), 1, %s2052_s13  }
   0xf   : > { %s1642_s22 = sshll.u32 (%p50_p3), %s2060_s15, 4  ;;  %s1887_s23 = smul.u32 (%p50_p3), 336, %s167_s21 }
  0x10   : > { %s2130_s26 = scalar_lea.vmem (%p50_p3), %s2379_s0, %s1642_s22 }
  0x11   : > { %v188_v0 = vld [vmem:[%s2130_s26] sm:$0xff] (%p50_p3)  ;;  %v190_v1 = vld [vmem:[%s2130_s26 + $0x8] sm:$0xff] (%p50_p3)  ;;  %s2138_s27 = scalar_lea.vmem (%p50_p3), [#allocation3], %s1887_s23 }
  0x12   : > { %v192_v2 = vld [vmem:[%s2130_s26 + $0x20] sm:$0xff] (%p50_p3)  ;;  %v194_v3 = vld [vmem:[%s2130_s26 + $0x28] sm:$0xff] (%p50_p3)  ;;  %189 = vst [vmem:[%s2138_s27] sm:$0xff] (%p50_p3), %v188_v0  ;;  %191 = vst [vmem:[%s2138_s27 + $0x8] sm:$0xff] (%p50_p3), %v190_v1 }
  0x13   : > { %v196_v4 = vld [vmem:[%s2130_s26 + $0x40] sm:$0xff] (%p50_p3)  ;;  %v198_v5 = vld [vmem:[%s2130_s26 + $0x48] sm:$0xff] (%p50_p3)  ;;  %193 = vst [vmem:[%s2138_s27 + $0x10] sm:$0xff] (%p50_p3), %v192_v2  ;;  %195 = vst [vmem:[%s2138_s27 + $0x18] sm:$0xff] (%p50_p3), %v194_v3 }
  0x14   : > { %197 = vst [vmem:[%s2138_s27 + $0x20] sm:$0xff] (%p50_p3), %v196_v4  ;;  %199 = vst [vmem:[%s2138_s27 + $0x28] sm:$0xff] (%p50_p3), %v198_v5  ;;  %v200_v6 = vld [vmem:[%s2130_s26 + $0x60] sm:$0xff] (%p50_p3)  ;;  %v202_v7 = vld [vmem:[%s2130_s26 + $0x68] sm:$0xff] (%p50_p3) }
  0x15   : > { %v204_v8 = vld [vmem:[%s2130_s26 + $0x80] sm:$0xff]  ;;  %201 = vst [vmem:[%s2138_s27 + $0x30] sm:$0xff] %v200_v6  ;;  %203 = vst [vmem:[%s2138_s27 + $0x38] sm:$0xff] %v202_v7  ;;  %v206_v9 = vld [vmem:[%s2130_s26 + $0x88] sm:$0xff] }
  0x16   : > { %205 = vst [vmem:[%s2138_s27 + $0x40] sm:$0xff] %v204_v8  ;;  %v208_v10 = vld [vmem:[%s2130_s26 + $0xa0] sm:$0xff]  ;;  %v210_v11 = vld [vmem:[%s2130_s26 + $0xa8] sm:$0xff]  ;;  %207 = vst [vmem:[%s2138_s27 + $0x48] sm:$0xff] %v206_v9 }
  0x17   : > { %209 = vst [vmem:[%s2138_s27 + $0x50] sm:$0xff] %v208_v10  ;;  %211 = vst [vmem:[%s2138_s27 + $0x58] sm:$0xff] %v210_v11  ;;  %v212_v12 = vld [vmem:[%s2130_s26 + $0xc0] sm:$0xff]  ;;  %v214_v13 = vld [vmem:[%s2130_s26 + $0xc8] sm:$0xff] }
  0x18   : > { %v216_v14 = vld [vmem:[%s2130_s26 + $0xe0] sm:$0xff]  ;;  %213 = vst [vmem:[%s2138_s27 + $0x60] sm:$0xff] %v212_v12  ;;  %215 = vst [vmem:[%s2138_s27 + $0x68] sm:$0xff] %v214_v13  ;;  %v218_v15 = vld [vmem:[%s2130_s26 + $0xe8] sm:$0xff] }
  0x19   : > { %217 = vst [vmem:[%s2138_s27 + $0x70] sm:$0xff] %v216_v14  ;;  %v220_v16 = vld [vmem:[%s2130_s26 + $0x100] sm:$0xff]  ;;  %v222_v17 = vld [vmem:[%s2130_s26 + $0x108] sm:$0xff]  ;;  %219 = vst [vmem:[%s2138_s27 + $0x78] sm:$0xff] %v218_v15 }
  0x1a   : > { %221 = vst [vmem:[%s2138_s27 + $0x80] sm:$0xff] %v220_v16  ;;  %223 = vst [vmem:[%s2138_s27 + $0x88] sm:$0xff] %v222_v17  ;;  %v224_v18 = vld [vmem:[%s2130_s26 + $0x120] sm:$0xff]  ;;  %v226_v19 = vld [vmem:[%s2130_s26 + $0x128] sm:$0xff] }
  0x1b   : > { %v228_v20 = vld [vmem:[%s2130_s26 + $0x140] sm:$0xff]  ;;  %225 = vst [vmem:[%s2138_s27 + $0x90] sm:$0xff] %v224_v18  ;;  %227 = vst [vmem:[%s2138_s27 + $0x98] sm:$0xff] %v226_v19  ;;  %v230_v21 = vld [vmem:[%s2130_s26 + $0x148] sm:$0xff] }
  0x1c   : > { %229 = vst [vmem:[%s2138_s27 + $0xa0] sm:$0xff] %v228_v20  ;;  %v232_v22 = vld [vmem:[%s2130_s26 + $0x160] sm:$0xff]  ;;  %v234_v23 = vld [vmem:[%s2130_s26 + $0x168] sm:$0xff]  ;;  %231 = vst [vmem:[%s2138_s27 + $0xa8] sm:$0xff] %v230_v21 }
  0x1d   : > { %233 = vst [vmem:[%s2138_s27 + $0xb0] sm:$0xff] %v232_v22  ;;  %235 = vst [vmem:[%s2138_s27 + $0xb8] sm:$0xff] %v234_v23  ;;  %v236_v24 = vld [vmem:[%s2130_s26 + $0x180] sm:$0xff]  ;;  %v238_v25 = vld [vmem:[%s2130_s26 + $0x188] sm:$0xff] }
  0x1e   : > { %v240_v26 = vld [vmem:[%s2130_s26 + $0x1a0] sm:$0xff]  ;;  %237 = vst [vmem:[%s2138_s27 + $0xc0] sm:$0xff] %v236_v24  ;;  %239 = vst [vmem:[%s2138_s27 + $0xc8] sm:$0xff] %v238_v25  ;;  %v242_v27 = vld [vmem:[%s2130_s26 + $0x1a8] sm:$0xff] }
  0x1f   : > { %241 = vst [vmem:[%s2138_s27 + $0xd0] sm:$0xff] %v240_v26  ;;  %v244_v28 = vld [vmem:[%s2130_s26 + $0x1c0] sm:$0xff]  ;;  %v246_v29 = vld [vmem:[%s2130_s26 + $0x1c8] sm:$0xff]  ;;  %243 = vst [vmem:[%s2138_s27 + $0xd8] sm:$0xff] %v242_v27 }
  0x20   : > { %245 = vst [vmem:[%s2138_s27 + $0xe0] sm:$0xff] %v244_v28  ;;  %247 = vst [vmem:[%s2138_s27 + $0xe8] sm:$0xff] %v246_v29  ;;  %v248_v30 = vld [vmem:[%s2130_s26 + $0x1e0] sm:$0xff]  ;;  %v250_v31 = vld [vmem:[%s2130_s26 + $0x1e8] sm:$0xff] }
  0x21   : > { %v252_v32 = vld [vmem:[%s2130_s26 + $0x200] sm:$0xff]  ;;  %249 = vst [vmem:[%s2138_s27 + $0xf0] sm:$0xff] %v248_v30  ;;  %251 = vst [vmem:[%s2138_s27 + $0xf8] sm:$0xff] %v250_v31  ;;  %v254_v33 = vld [vmem:[%s2130_s26 + $0x208] sm:$0xff] }
  0x22   : > { %253 = vst [vmem:[%s2138_s27 + $0x100] sm:$0xff] %v252_v32  ;;  %v256_v34 = vld [vmem:[%s2130_s26 + $0x220] sm:$0xff]  ;;  %v258_v35 = vld [vmem:[%s2130_s26 + $0x228] sm:$0xff]  ;;  %255 = vst [vmem:[%s2138_s27 + $0x108] sm:$0xff] %v254_v33 }
  0x23   : > { %257 = vst [vmem:[%s2138_s27 + $0x110] sm:$0xff] %v256_v34  ;;  %259 = vst [vmem:[%s2138_s27 + $0x118] sm:$0xff] %v258_v35  ;;  %v260_v36 = vld [vmem:[%s2130_s26 + $0x240] sm:$0xff]  ;;  %v262_v37 = vld [vmem:[%s2130_s26 + $0x248] sm:$0xff] }
  0x24   : > { %v264_v38 = vld [vmem:[%s2130_s26 + $0x260] sm:$0xff]  ;;  %261 = vst [vmem:[%s2138_s27 + $0x120] sm:$0xff] %v260_v36  ;;  %263 = vst [vmem:[%s2138_s27 + $0x128] sm:$0xff] %v262_v37  ;;  %v266_v39 = vld [vmem:[%s2130_s26 + $0x268] sm:$0xff] }
  0x25   : > { %265 = vst [vmem:[%s2138_s27 + $0x130] sm:$0xff] %v264_v38  ;;  %v268_v40 = vld [vmem:[%s2130_s26 + $0x280] sm:$0xff]  ;;  %v270_v41 = vld [vmem:[%s2130_s26 + $0x288] sm:$0xff]  ;;  %267 = vst [vmem:[%s2138_s27 + $0x138] sm:$0xff] %v266_v39 }
  0x26   : > { %269 = vst [vmem:[%s2138_s27 + $0x140] sm:$0xff] %v268_v40  ;;  %271 = vst [vmem:[%s2138_s27 + $0x148] sm:$0xff] %v270_v41 }
  0x27 PF: > { %p1535_p6 = scmp.ge.s32.totalorder %s2064_s16, 1  ;;  %p288_p7 = scmp.lt.s32.totalorder %s2064_s16, 3 }
  0x29   : > { %p289_p8 = pnand %p1535_p6, %p288_p7 }
  0x2a   : > { %s295_s28 = sand.u32 (!%p289_p8), 1, %s2048_s12   ;;  %s1536_s29 = sshll.u32 (!%p289_p8), %s2056_s14, 6 }
  0x2b   : > { %292 = sbr.rel (%p289_p8) target bundleno = 413 (0x19d), region = 51  ;;  %p335_p9 = scmp.lt.s32.totalorder (!%p289_p8), %s1536_s29, 127 }
  0x2c   : > { %s1888_s30 = smul.u32 (!%p289_p8), 336, %s295_s28  ;;  %p1538_p10 = scmp.ne.s32.totalorder (!%p289_p8), %s2056_s14, 0 }
  0x2e   : > { %s2227_s8 = scalar_lea.vmem (!%p289_p8), [#allocation3], %s1888_s30 }
  0x32   : > { %s2390_s29 = smov (!%p335_p9, %s1536_s29), 127  ;;  %359 = sbr.rel (%p1538_p10) target bundleno = 63 (0x3f), region = 59 }
  0x33   : > { %s1537_s4 = sshll.u32 %s2390_s29, 2  ;;  %v2066_v42 = vmov (!%p1538_p10), 0.0  }
  0x34   : > { %s2225_s7 = scalar_lea.vmem %s2380_s1, %s1537_s4  ;;  %360 = vst [vmem:[#allocation2] sm:$0xff] (!%p1538_p10), %v2066_v42  ;;  %361 = vst [vmem:[#allocation2 + $0x8] sm:$0xff] (!%p1538_p10), %v2066_v42 }
  0x35   : > { %362 = vst [vmem:[#allocation2 + $0x10] sm:$0xff] (!%p1538_p10), %v2066_v42  ;;  %363 = vst [vmem:[#allocation2 + $0x18] sm:$0xff] (!%p1538_p10), %v2066_v42 }
  0x36   : > { %364 = vst [vmem:[#allocation2 + $0x20] sm:$0xff] (!%p1538_p10), %v2066_v42  ;;  %365 = vst [vmem:[#allocation2 + $0x28] sm:$0xff] (!%p1538_p10), %v2066_v42 }
  0x37   : > { %366 = vst [vmem:[#allocation2 + $0x30] sm:$0xff] (!%p1538_p10), %v2066_v42  ;;  %367 = vst [vmem:[#allocation2 + $0x38] sm:$0xff] (!%p1538_p10), %v2066_v42 }
  0x38   : > { %368 = vst [vmem:[#allocation2 + $0x40] sm:$0xff] (!%p1538_p10), %v2066_v42  ;;  %369 = vst [vmem:[#allocation2 + $0x48] sm:$0xff] (!%p1538_p10), %v2066_v42 }
  0x39   : > { %370 = vst [vmem:[#allocation2 + $0x50] sm:$0xff] %v2066_v42  ;;  %371 = vst [vmem:[#allocation2 + $0x58] sm:$0xff] %v2066_v42 }
  0x3a   : > { %372 = vst [vmem:[#allocation2 + $0x60] sm:$0xff] %v2066_v42  ;;  %373 = vst [vmem:[#allocation2 + $0x68] sm:$0xff] %v2066_v42 }
  0x3b   : > { %374 = vst [vmem:[#allocation2 + $0x70] sm:$0xff] %v2066_v42  ;;  %375 = vst [vmem:[#allocation2 + $0x78] sm:$0xff] %v2066_v42 }
  0x3c   : > { %376 = vst [vmem:[#allocation2 + $0x80] sm:$0xff] %v2066_v42  ;;  %377 = vst [vmem:[#allocation2 + $0x88] sm:$0xff] %v2066_v42 }
  0x3d   : > { %378 = vst [vmem:[#allocation2 + $0x90] sm:$0xff] %v2066_v42  ;;  %379 = vst [vmem:[#allocation2 + $0x98] sm:$0xff] %v2066_v42 }
  0x3e   : > { %380 = vst [vmem:[#allocation2 + $0xa0] sm:$0xff] %v2066_v42 }
  0x3f PF: > { %v1930_v43 = vld [vmem:[%s2225_s7 + $0x40] sm:$0xff]   ;;  %v1934_v47 = vld [vmem:[%s2225_s7 + $0x48] sm:$0xff]   ;;  %v1938_v51 = vld [vmem:[%s2225_s7 + $0x50] sm:$0xff]   ;;  %p1615_p11 = scmp.ne.s32.totalorder %s2056_s14, 1 }
  0x40   : > { %v1931_v44 = vld [vmem:[%s2225_s7 + $0xc0] sm:$0xff]   ;;  %1723 = vmatprep.subr.bf16.mxu0 %v1930_v43  ;;  %v1935_v48 = vld [vmem:[%s2225_s7 + $0xc8] sm:$0xff]   ;;  %v1939_v52 = vld [vmem:[%s2225_s7 + $0xd0] sm:$0xff]  }
  0x41   : > { %v1932_v45 = vld [vmem:[%s2225_s7] sm:$0xff]   ;;  %1805 = vmatprep.subr.bf16.mxu1 %v1931_v44  ;;  %v1936_v49 = vld [vmem:[%s2225_s7 + $0x8] sm:$0xff]   ;;  %v1940_v53 = vld [vmem:[%s2225_s7 + $0x10] sm:$0xff]  }
  0x42   : > { %v1933_v46 = vld [vmem:[%s2225_s7 + $0x80] sm:$0xff]   ;;  %1724 = vmatpush3.bf16.msra.mxu0 %v1932_v45  ;;  %v1937_v50 = vld [vmem:[%s2225_s7 + $0x88] sm:$0xff]   ;;  %v1941_v54 = vld [vmem:[%s2225_s7 + $0x90] sm:$0xff]  }
  0x43   : > { %1806 = vmatpush3.bf16.msra.mxu1 %v1933_v46  ;;  %1725 = vmatprep.subr.bf16.mxu0 %v1934_v47  ;;  %v1942_v55 = vld [vmem:[%s2225_s7 + $0x58] sm:$0xff]   ;;  %v1946_v59 = vld [vmem:[%s2225_s7 + $0x60] sm:$0xff]   ;;  %v1950_v63 = vld [vmem:[%s2225_s7 + $0x68] sm:$0xff]  }
  0x44   : > { %1807 = vmatprep.subr.bf16.mxu1 %v1935_v48  ;;  %v1943_v56 = vld [vmem:[%s2225_s7 + $0xd8] sm:$0xff]   ;;  %v1947_v60 = vld [vmem:[%s2225_s7 + $0xe0] sm:$0xff]   ;;  %v1951_v0 = vld [vmem:[%s2225_s7 + $0xe8] sm:$0xff]  }
  0x45   : > { %v1944_v57 = vld [vmem:[%s2225_s7 + $0x18] sm:$0xff]   ;;  %v1948_v61 = vld [vmem:[%s2225_s7 + $0x20] sm:$0xff]   ;;  %v1952_v1 = vld [vmem:[%s2225_s7 + $0x28] sm:$0xff]  }
  0x46   : > { %1726 = vmatpush3.bf16.msra.mxu0 %v1936_v49  ;;  %v1945_v58 = vld [vmem:[%s2225_s7 + $0x98] sm:$0xff]   ;;  %v1949_v62 = vld [vmem:[%s2225_s7 + $0xa0] sm:$0xff]   ;;  %v1953_v2 = vld [vmem:[%s2225_s7 + $0xa8] sm:$0xff]  }
  0x47   : > { %1808 = vmatpush3.bf16.msra.mxu1 %v1937_v50  ;;  %1727 = vmatprep.subr.bf16.mxu0 %v1938_v51  ;;  %v1954_v3 = vld [vmem:[%s2225_s7 + $0x70] sm:$0xff]   ;;  %v1958_v7 = vld [vmem:[%s2225_s7 + $0x78] sm:$0xff]  }
  0x48   : > { %1809 = vmatprep.subr.bf16.mxu1 %v1939_v52  ;;  %v1955_v4 = vld [vmem:[%s2225_s7 + $0xf0] sm:$0xff]   ;;  %v1959_v8 = vld [vmem:[%s2225_s7 + $0xf8] sm:$0xff]  }
  0x49   : > { %v1956_v5 = vld [vmem:[%s2225_s7 + $0x30] sm:$0xff]   ;;  %v1960_v9 = vld [vmem:[%s2225_s7 + $0x38] sm:$0xff]  }
  0x4a   : > { %1728 = vmatpush3.bf16.msra.mxu0 %v1940_v53  ;;  %v1957_v6 = vld [vmem:[%s2225_s7 + $0xb0] sm:$0xff]   ;;  %v1961_v10 = vld [vmem:[%s2225_s7 + $0xb8] sm:$0xff]  }
  0x4b   : > { %1810 = vmatpush3.bf16.msra.mxu1 %v1941_v54  ;;  %1729 = vmatprep.subr.bf16.mxu0 %v1942_v55  ;;  %v1962_v11 = vld [vmem:[%s2227_s8] ss:$16 sps:$4 sm:$0xff]   ;;  %v1964_v12 = vld [vmem:[%s2227_s8 + $0x4] ss:$16 sps:$4 sm:$0xff]   ;;  %v1965_v13 = vld [vmem:[%s2227_s8 + $0x8] ss:$16 sps:$4 sm:$0xff]  }
  0x4c   : > { %1811 = vmatprep.subr.bf16.mxu1 %v1943_v56  ;;  %v1967_v14 = vld [vmem:[%s2227_s8 + $0xc] ss:$16 sps:$4 sm:$0xff]   ;;  %946 = vmatprep.mubr.bf16.mxu0 %v1964_v12  ;;  %v1968_v15 = vld [vmem:[%s2227_s8 + $0x24] ss:$16 sps:$4 sm:$0xff]   ;;  %v1972_v17 = vld [vmem:[%s2227_s8 + $0x20] ss:$16 sps:$4 sm:$0xff]  }
  0x4d   : > { %1066 = vmatprep.mubr.bf16.mxu1 %v1967_v14  ;;  %v1970_v16 = vld [vmem:[%s2227_s8 + $0x2c] ss:$16 sps:$4 sm:$0xff]   ;;  %v1973_v18 = vld [vmem:[%s2227_s8 + $0x28] ss:$16 sps:$4 sm:$0xff]   ;;  %v1974_v19 = vld [vmem:[%s2227_s8 + $0x44] ss:$16 sps:$4 sm:$0xff]  }
  0x4e   : > { %1730 = vmatpush3.bf16.msra.mxu0 %v1944_v57  ;;  %v1976_v20 = vld [vmem:[%s2227_s8 + $0x4c] ss:$16 sps:$4 sm:$0xff]   ;;  %v1978_v21 = vld [vmem:[%s2227_s8 + $0x40] ss:$16 sps:$4 sm:$0xff]   ;;  %v1979_v22 = vld [vmem:[%s2227_s8 + $0x48] ss:$16 sps:$4 sm:$0xff]  }
  0x4f   : > { %1812 = vmatpush3.bf16.msra.mxu1 %v1945_v58  ;;  %1731 = vmatprep.subr.bf16.mxu0 %v1946_v59  ;;  %v1980_v23 = vld [vmem:[%s2227_s8 + $0x64] ss:$16 sps:$4 sm:$0xff]   ;;  %v1982_v24 = vld [vmem:[%s2227_s8 + $0x6c] ss:$16 sps:$4 sm:$0xff]   ;;  %v1984_v25 = vld [vmem:[%s2227_s8 + $0x60] ss:$16 sps:$4 sm:$0xff]  }
  0x50   : > { %1813 = vmatprep.subr.bf16.mxu1 %v1947_v60  ;;  %v1985_v26 = vld [vmem:[%s2227_s8 + $0x68] ss:$16 sps:$4 sm:$0xff]   ;;  %v1986_v27 = vld [vmem:[%s2227_s8 + $0x84] ss:$16 sps:$4 sm:$0xff]   ;;  %v1988_v28 = vld [vmem:[%s2227_s8 + $0x8c] ss:$16 sps:$4 sm:$0xff]  }
  0x51   : > { %v1990_v29 = vld [vmem:[%s2227_s8 + $0x80] ss:$16 sps:$4 sm:$0xff]   ;;  %v1991_v30 = vld [vmem:[%s2227_s8 + $0x88] ss:$16 sps:$4 sm:$0xff]   ;;  %v1992_v31 = vld [vmem:[%s2227_s8 + $0xa4] ss:$16 sps:$4 sm:$0xff]  }
  0x52   : > { %1732 = vmatpush3.bf16.msra.mxu0 %v1948_v61  ;;  %v1994_v32 = vld [vmem:[%s2227_s8 + $0xac] ss:$16 sps:$4 sm:$0xff]   ;;  %v1996_v33 = vld [vmem:[%s2227_s8 + $0xa0] ss:$16 sps:$4 sm:$0xff]   ;;  %v1997_v34 = vld [vmem:[%s2227_s8 + $0xa8] ss:$16 sps:$4 sm:$0xff]  }
  0x53   : > { %1814 = vmatpush3.bf16.msra.mxu1 %v1949_v62  ;;  %1733 = vmatprep.subr.bf16.mxu0 %v1950_v63  ;;  %v1998_v35 = vld [vmem:[%s2227_s8 + $0xc4] ss:$16 sps:$4 sm:$0xff]   ;;  %v2000_v36 = vld [vmem:[%s2227_s8 + $0xcc] ss:$16 sps:$4 sm:$0xff]   ;;  %v2002_v37 = vld [vmem:[%s2227_s8 + $0xc0] ss:$16 sps:$4 sm:$0xff]  }
  0x54   : > { %1815 = vmatprep.subr.bf16.mxu1 %v1951_v0  ;;  %v2003_v38 = vld [vmem:[%s2227_s8 + $0xc8] ss:$16 sps:$4 sm:$0xff]   ;;  %v2004_v39 = vld [vmem:[%s2227_s8 + $0xe4] ss:$16 sps:$4 sm:$0xff]   ;;  %v2006_v40 = vld [vmem:[%s2227_s8 + $0xec] ss:$16 sps:$4 sm:$0xff]  }
  0x55   : > { %v2008_v41 = vld [vmem:[%s2227_s8 + $0xe0] ss:$16 sps:$4 sm:$0xff]   ;;  %v2009_v42 = vld [vmem:[%s2227_s8 + $0xe8] ss:$16 sps:$4 sm:$0xff]   ;;  %v2010_v43 = vld [vmem:[%s2227_s8 + $0x104] ss:$16 sps:$4 sm:$0xff]  }
  0x56   : > { %1734 = vmatpush3.bf16.msra.mxu0 %v1952_v1  ;;  %v2012_v44 = vld [vmem:[%s2227_s8 + $0x10c] ss:$16 sps:$4 sm:$0xff]   ;;  %v2014_v45 = vld [vmem:[%s2227_s8 + $0x100] ss:$16 sps:$4 sm:$0xff]   ;;  %v2015_v46 = vld [vmem:[%s2227_s8 + $0x108] ss:$16 sps:$4 sm:$0xff]  }
  0x57   : > { %1816 = vmatpush3.bf16.msra.mxu1 %v1953_v2  ;;  %1735 = vmatprep.subr.bf16.mxu0 %v1954_v3  ;;  %v2016_v47 = vld [vmem:[%s2227_s8 + $0x124] ss:$16 sps:$4 sm:$0xff]   ;;  %v2018_v48 = vld [vmem:[%s2227_s8 + $0x12c] ss:$16 sps:$4 sm:$0xff]   ;;  %v2020_v51 = vld [vmem:[%s2227_s8 + $0x120] ss:$16 sps:$4 sm:$0xff]  }
  0x58   : > { %1817 = vmatprep.subr.bf16.mxu1 %v1955_v4  ;;  %v442_v49 = vld [vmem:[%s2227_s8 + $0x140] sm:$0xff]  ;;  %v443_v50 = vld [vmem:[%s2227_s8 + $0x148] sm:$0xff] }
  0x59   : > { %v2021_v52 = vld [vmem:[%s2227_s8 + $0x128] ss:$16 sps:$4 sm:$0xff]   ;;  %v1580_v53 = vcombine.high %v442_v49, %v442_v49  ;;  %v1582_v54 = vcombine.high %v443_v50, %v443_v50  ;;  %v1579_v55 = vcombine.low %v442_v49, %v442_v49  ;;  %v1581_v56 = vcombine.low %v443_v50, %v443_v50 }
  0x5a   : > { %1736 = vmatpush3.bf16.msra.mxu0 %v1956_v5  ;;  %v381_v2 = vld [vmem:[#allocation2] sm:$0xff] }
  0x5b   : > { %1818 = vmatpush3.bf16.msra.mxu1 %v1957_v6  ;;  %1737 = vmatprep.subr.bf16.mxu0 %v1958_v7  ;;  %v382_v7 = vld [vmem:[#allocation2 + $0x8] sm:$0xff] }
  0x5c   : > { %1819 = vmatprep.subr.bf16.mxu1 %v1959_v8 }
  0x5e   : > { %1738 = vmatpush3.bf16.msra.mxu0 %v1960_v9 }
  0x5f   : > { %1820 = vmatpush3.bf16.msra.mxu1 %v1961_v10 }
  0x61   : > { %947 = vmatmul.mubr.bf16.vlgmr.msra.gmra.mrb[0].mxu0 %v1962_v11 }
  0x62   : > { %1067 = vmatmul.mubr.bf16.vlgmr.msra.gmra.mrb[0].mxu1 %v1965_v13  ;;  %954 = vmatprep.mubr.bf16.mxu0 %v1968_v15 }
  0x63   : > { %1074 = vmatprep.mubr.bf16.mxu1 %v1970_v16 }
  0x69   : > { %955 = vmatmul.mubr.bf16.gmra.mrb[4].mxu0 %v1972_v17 }
  0x6a   : > { %1075 = vmatmul.mubr.bf16.gmra.mrb[4].mxu1 %v1973_v18  ;;  %962 = vmatprep.mubr.bf16.mxu0 %v1974_v19 }
  0x6b   : > { %1082 = vmatprep.mubr.bf16.mxu1 %v1976_v20  ;;  %v383_v20 = vld [vmem:[#allocation2 + $0x10] sm:$0xff] }
  0x71   : > { %963 = vmatmul.mubr.bf16.gmra.mrb[8].mxu0 %v1978_v21 }
  0x72   : > { %1083 = vmatmul.mubr.bf16.gmra.mrb[8].mxu1 %v1979_v22  ;;  %970 = vmatprep.mubr.bf16.mxu0 %v1980_v23 }
  0x73   : > { %1090 = vmatprep.mubr.bf16.mxu1 %v1982_v24 }
  0x79   : > { %971 = vmatmul.mubr.bf16.gmra.mrb[12].mxu0 %v1984_v25  ;;  %v384_v25 = vld [vmem:[#allocation2 + $0x18] sm:$0xff] }
  0x7a   : > { %1091 = vmatmul.mubr.bf16.gmra.mrb[12].mxu1 %v1985_v26  ;;  %978 = vmatprep.mubr.bf16.mxu0 %v1986_v27 }
  0x7b   : > { %1098 = vmatprep.mubr.bf16.mxu1 %v1988_v28 }
  0x81   : > { %979 = vmatmul.mubr.bf16.gmra.mrb[16].mxu0 %v1990_v29 }
  0x82   : > { %1099 = vmatmul.mubr.bf16.gmra.mrb[16].mxu1 %v1991_v30  ;;  %986 = vmatprep.mubr.bf16.mxu0 %v1992_v31 }
  0x83   : > { %1106 = vmatprep.mubr.bf16.mxu1 %v1994_v32 }
  0x89   : > { %987 = vmatmul.mubr.bf16.gmra.mrb[20].mxu0 %v1996_v33 }
  0x8a   : > { %1107 = vmatmul.mubr.bf16.gmra.mrb[20].mxu1 %v1997_v34  ;;  %994 = vmatprep.mubr.bf16.mxu0 %v1998_v35 }
  0x8b   : > { %1114 = vmatprep.mubr.bf16.mxu1 %v2000_v36 }
  0x91   : > { %995 = vmatmul.mubr.bf16.gmra.mrb[24].mxu0 %v2002_v37 }
  0x92   : > { %1115 = vmatmul.mubr.bf16.gmra.mrb[24].mxu1 %v2003_v38  ;;  %1002 = vmatprep.mubr.bf16.mxu0 %v2004_v39  ;;  %v385_v38 = vld [vmem:[#allocation2 + $0x20] sm:$0xff] }
  0x93   : > { %1122 = vmatprep.mubr.bf16.mxu1 %v2006_v40 }
  0x99   : > { %1003 = vmatmul.mubr.bf16.gmra.mrb[28].mxu0 %v2008_v41 }
  0x9a   : > { %1123 = vmatmul.mubr.bf16.gmra.mrb[28].mxu1 %v2009_v42  ;;  %1010 = vmatprep.mubr.bf16.mxu0 %v2010_v43  ;;  %v386_v43 = vld [vmem:[#allocation2 + $0x28] sm:$0xff] }
  0x9b   : > { %1130 = vmatprep.mubr.bf16.mxu1 %v2012_v44 }
  0xa1   : > { %1011 = vmatmul.mubr.bf16.gmra.mrb[32].mxu0 %v2014_v45 }
  0xa2   : > { %1131 = vmatmul.mubr.bf16.gmra.mrb[32].mxu1 %v2015_v46  ;;  %1018 = vmatprep.mubr.bf16.mxu0 %v2016_v47 }
  0xa3   : > { %1138 = vmatprep.mubr.bf16.mxu1 %v2018_v48 }
  0xa9   : > { %1019 = vmatmul.mubr.bf16.gmra.mrb[36].mxu0 %v2020_v51 }
  0xaa   : > { %1139 = vmatmul.mubr.bf16.gmra.mrb[36].mxu1 %v2021_v52  ;;  %1026 = vmatprep.mubr.bf16.mxu0 %v1580_v53 }
  0xab   : > { %1146 = vmatprep.mubr.bf16.mxu1 %v1582_v54 }
  0xb1   : > { %1027 = vmatmul.mubr.bf16.gmra.mrb[40].mxu0 %v1579_v55 }
  0xb2   : > { %1147 = vmatmul.mubr.bf16.gmra.mrb[40].mxu1 %v1581_v56  ;;  %v387_v56 = vld [vmem:[#allocation2 + $0x30] sm:$0xff] }
 0x134   : > { %v1739_v57 = vpop.f32.mrb[0].mxu0 }
 0x135   : > { %v1821_v58 = vpop.f32.mrb[0].mxu1  ;;  %v1740_v59 = vpop.f32.mrb[1].mxu0 }
 0x136   : > { %v1741_v60 = vadd.f32 %v1740_v59, %v1739_v57  ;;  %v1822_v61 = vpop.f32.mrb[1].mxu1  ;;  %v1742_v62 = vpop.f32.mrb[2].mxu0 }
 0x137   : > { %v1823_v63 = vadd.f32 %v1822_v61, %v1821_v58  ;;  %v1824_v0 = vpop.f32.mrb[2].mxu1  ;;  %v1743_v1 = vpop.f32.mrb[3].mxu0  ;;  %v388_v61 = vld [vmem:[#allocation2 + $0x38] sm:$0xff] }
 0x138   : > { %v1744_v3 = vadd.f32 %v1743_v1, %v1742_v62  ;;  %v1825_v4 = vpop.f32.mrb[3].mxu1 }
 0x139   : > { %v1069_v5 = vadd.f32 %v1823_v63, %v1741_v60  ;;  %v1826_v6 = vadd.f32 %v1825_v4, %v1824_v0 }
 0x13b   : > { %v1154_v8 = vadd.f32 %v1069_v5, %v381_v2  ;;  %v1072_v9 = vadd.f32 %v1826_v6, %v1744_v3 }
 0x13c   : > { %v1745_v10 = vpop.f32.mrb[4].mxu0 }
 0x13d   : > { %1175 = vst [vmem:[#allocation2] sm:$0xff] %v1154_v8  ;;  %v1155_v11 = vadd.f32 %v1072_v9, %v382_v7  ;;  %v1827_v12 = vpop.f32.mrb[4].mxu1  ;;  %v1746_v13 = vpop.f32.mrb[5].mxu0 }
 0x13e   : > { %v1747_v14 = vadd.f32 %v1746_v13, %v1745_v10  ;;  %v1828_v15 = vpop.f32.mrb[5].mxu1  ;;  %v1748_v16 = vpop.f32.mrb[6].mxu0  ;;  %v389_v10 = vld [vmem:[#allocation2 + $0x40] sm:$0xff] }
 0x13f   : > { %1176 = vst [vmem:[#allocation2 + $0x8] sm:$0xff] %v1155_v11  ;;  %v1829_v17 = vadd.f32 %v1828_v15, %v1827_v12  ;;  %v1830_v18 = vpop.f32.mrb[6].mxu1  ;;  %v1749_v19 = vpop.f32.mrb[7].mxu0  ;;  %v390_v15 = vld [vmem:[#allocation2 + $0x48] sm:$0xff] }
 0x140   : > { %v1750_v21 = vadd.f32 %v1749_v19, %v1748_v16  ;;  %v1831_v22 = vpop.f32.mrb[7].mxu1 }
 0x141   : > { %v1077_v23 = vadd.f32 %v1829_v17, %v1747_v14  ;;  %v1832_v24 = vadd.f32 %v1831_v22, %v1830_v18 }
 0x143   : > { %v1156_v26 = vadd.f32 %v1077_v23, %v383_v20  ;;  %v1080_v27 = vadd.f32 %v1832_v24, %v1750_v21 }
 0x144   : > { %v1751_v28 = vpop.f32.mrb[8].mxu0 }
 0x145   : > { %1177 = vst [vmem:[#allocation2 + $0x10] sm:$0xff] %v1156_v26  ;;  %v1157_v29 = vadd.f32 %v1080_v27, %v384_v25  ;;  %v1833_v30 = vpop.f32.mrb[8].mxu1  ;;  %v1752_v31 = vpop.f32.mrb[9].mxu0 }
 0x146   : > { %v1753_v32 = vadd.f32 %v1752_v31, %v1751_v28  ;;  %v1834_v33 = vpop.f32.mrb[9].mxu1  ;;  %v1754_v34 = vpop.f32.mrb[10].mxu0  ;;  %v391_v28 = vld [vmem:[#allocation2 + $0x50] sm:$0xff] }
 0x147   : > { %1178 = vst [vmem:[#allocation2 + $0x18] sm:$0xff] %v1157_v29  ;;  %v1835_v35 = vadd.f32 %v1834_v33, %v1833_v30  ;;  %v1836_v36 = vpop.f32.mrb[10].mxu1  ;;  %v1755_v37 = vpop.f32.mrb[11].mxu0  ;;  %v392_v33 = vld [vmem:[#allocation2 + $0x58] sm:$0xff] }
 0x148   : > { %v1756_v39 = vadd.f32 %v1755_v37, %v1754_v34  ;;  %v1837_v40 = vpop.f32.mrb[11].mxu1 }
 0x149   : > { %v1085_v41 = vadd.f32 %v1835_v35, %v1753_v32  ;;  %v1838_v42 = vadd.f32 %v1837_v40, %v1836_v36 }
 0x14b   : > { %v1158_v44 = vadd.f32 %v1085_v41, %v385_v38  ;;  %v1088_v45 = vadd.f32 %v1838_v42, %v1756_v39 }
 0x14c   : > { %v1757_v46 = vpop.f32.mrb[12].mxu0 }
 0x14d   : > { %1179 = vst [vmem:[#allocation2 + $0x20] sm:$0xff] %v1158_v44  ;;  %v1159_v47 = vadd.f32 %v1088_v45, %v386_v43  ;;  %v1839_v48 = vpop.f32.mrb[12].mxu1  ;;  %v1758_v49 = vpop.f32.mrb[13].mxu0 }
 0x14e   : > { %v1759_v50 = vadd.f32 %v1758_v49, %v1757_v46  ;;  %v1840_v51 = vpop.f32.mrb[13].mxu1  ;;  %v1760_v52 = vpop.f32.mrb[14].mxu0  ;;  %v393_v46 = vld [vmem:[#allocation2 + $0x60] sm:$0xff] }
 0x14f   : > { %1180 = vst [vmem:[#allocation2 + $0x28] sm:$0xff] %v1159_v47  ;;  %v1841_v53 = vadd.f32 %v1840_v51, %v1839_v48  ;;  %v1842_v54 = vpop.f32.mrb[14].mxu1  ;;  %v1761_v55 = vpop.f32.mrb[15].mxu0  ;;  %v394_v51 = vld [vmem:[#allocation2 + $0x68] sm:$0xff] }
 0x150   : > { %v1762_v57 = vadd.f32 %v1761_v55, %v1760_v52  ;;  %v1843_v58 = vpop.f32.mrb[15].mxu1 }
 0x151   : > { %v1093_v59 = vadd.f32 %v1841_v53, %v1759_v50  ;;  %v1844_v60 = vadd.f32 %v1843_v58, %v1842_v54 }
 0x153   : > { %v1160_v62 = vadd.f32 %v1093_v59, %v387_v56  ;;  %v1096_v63 = vadd.f32 %v1844_v60, %v1762_v57 }
 0x154   : > { %v1763_v0 = vpop.f32.mrb[16].mxu0 }
 0x155   : > { %1181 = vst [vmem:[#allocation2 + $0x30] sm:$0xff] %v1160_v62  ;;  %v1161_v1 = vadd.f32 %v1096_v63, %v388_v61  ;;  %v1845_v2 = vpop.f32.mrb[16].mxu1  ;;  %v1764_v3 = vpop.f32.mrb[17].mxu0 }
 0x156   : > { %v1765_v4 = vadd.f32 %v1764_v3, %v1763_v0  ;;  %v1846_v5 = vpop.f32.mrb[17].mxu1  ;;  %v1766_v6 = vpop.f32.mrb[18].mxu0  ;;  %v395_v0 = vld [vmem:[#allocation2 + $0x70] sm:$0xff] }
 0x157   : > { %1182 = vst [vmem:[#allocation2 + $0x38] sm:$0xff] %v1161_v1  ;;  %v1847_v7 = vadd.f32 %v1846_v5, %v1845_v2  ;;  %v1848_v8 = vpop.f32.mrb[18].mxu1  ;;  %v1767_v9 = vpop.f32.mrb[19].mxu0  ;;  %v396_v5 = vld [vmem:[#allocation2 + $0x78] sm:$0xff] }
 0x158   : > { %v1768_v11 = vadd.f32 %v1767_v9, %v1766_v6  ;;  %v1849_v12 = vpop.f32.mrb[19].mxu1 }
 0x159   : > { %v1101_v13 = vadd.f32 %v1847_v7, %v1765_v4  ;;  %v1850_v14 = vadd.f32 %v1849_v12, %v1848_v8 }
 0x15b   : > { %v1162_v16 = vadd.f32 %v1101_v13, %v389_v10  ;;  %v1104_v17 = vadd.f32 %v1850_v14, %v1768_v11 }
 0x15c   : > { %v1769_v18 = vpop.f32.mrb[20].mxu0 }
 0x15d   : > { %1183 = vst [vmem:[#allocation2 + $0x40] sm:$0xff] %v1162_v16  ;;  %v1163_v19 = vadd.f32 %v1104_v17, %v390_v15  ;;  %v1851_v20 = vpop.f32.mrb[20].mxu1  ;;  %v1770_v21 = vpop.f32.mrb[21].mxu0 }
 0x15e   : > { %v1771_v22 = vadd.f32 %v1770_v21, %v1769_v18  ;;  %v1852_v23 = vpop.f32.mrb[21].mxu1  ;;  %v1772_v24 = vpop.f32.mrb[22].mxu0  ;;  %v397_v18 = vld [vmem:[#allocation2 + $0x80] sm:$0xff] }
 0x15f   : > { %1184 = vst [vmem:[#allocation2 + $0x48] sm:$0xff] %v1163_v19  ;;  %v1853_v25 = vadd.f32 %v1852_v23, %v1851_v20  ;;  %v1854_v26 = vpop.f32.mrb[22].mxu1  ;;  %v1773_v27 = vpop.f32.mrb[23].mxu0  ;;  %v398_v23 = vld [vmem:[#allocation2 + $0x88] sm:$0xff] }
 0x160   : > { %v1774_v29 = vadd.f32 %v1773_v27, %v1772_v24  ;;  %v1855_v30 = vpop.f32.mrb[23].mxu1 }
 0x161   : > { %v1109_v31 = vadd.f32 %v1853_v25, %v1771_v22  ;;  %v1856_v32 = vadd.f32 %v1855_v30, %v1854_v26 }
 0x163   : > { %v1164_v34 = vadd.f32 %v1109_v31, %v391_v28  ;;  %v1112_v35 = vadd.f32 %v1856_v32, %v1774_v29 }
 0x164   : > { %v1775_v36 = vpop.f32.mrb[24].mxu0 }
 0x165   : > { %1185 = vst [vmem:[#allocation2 + $0x50] sm:$0xff] %v1164_v34  ;;  %v1165_v37 = vadd.f32 %v1112_v35, %v392_v33  ;;  %v1857_v38 = vpop.f32.mrb[24].mxu1  ;;  %v1776_v39 = vpop.f32.mrb[25].mxu0 }
 0x166   : > { %v1777_v40 = vadd.f32 %v1776_v39, %v1775_v36  ;;  %v1858_v41 = vpop.f32.mrb[25].mxu1  ;;  %v1778_v42 = vpop.f32.mrb[26].mxu0  ;;  %v399_v36 = vld [vmem:[#allocation2 + $0x90] sm:$0xff] }
 0x167   : > { %1186 = vst [vmem:[#allocation2 + $0x58] sm:$0xff] %v1165_v37  ;;  %v1859_v43 = vadd.f32 %v1858_v41, %v1857_v38  ;;  %v1860_v44 = vpop.f32.mrb[26].mxu1  ;;  %v1779_v45 = vpop.f32.mrb[27].mxu0  ;;  %v400_v41 = vld [vmem:[#allocation2 + $0x98] sm:$0xff] }
 0x168   : > { %v1780_v47 = vadd.f32 %v1779_v45, %v1778_v42  ;;  %v1861_v48 = vpop.f32.mrb[27].mxu1 }
 0x169   : > { %v1117_v49 = vadd.f32 %v1859_v43, %v1777_v40  ;;  %v1862_v50 = vadd.f32 %v1861_v48, %v1860_v44 }
 0x16b   : > { %v1166_v52 = vadd.f32 %v1117_v49, %v393_v46  ;;  %v1120_v53 = vadd.f32 %v1862_v50, %v1780_v47 }
 0x16c   : > { %v1781_v54 = vpop.f32.mrb[28].mxu0 }
 0x16d   : > { %1187 = vst [vmem:[#allocation2 + $0x60] sm:$0xff] %v1166_v52  ;;  %v1167_v55 = vadd.f32 %v1120_v53, %v394_v51  ;;  %v1863_v56 = vpop.f32.mrb[28].mxu1  ;;  %v1782_v57 = vpop.f32.mrb[29].mxu0 }
 0x16e   : > { %v1783_v58 = vadd.f32 %v1782_v57, %v1781_v54  ;;  %v1864_v59 = vpop.f32.mrb[29].mxu1  ;;  %v1784_v60 = vpop.f32.mrb[30].mxu0  ;;  %v401_v54 = vld [vmem:[#allocation2 + $0xa0] sm:$0xff] }
 0x16f   : > { %1188 = vst [vmem:[#allocation2 + $0x68] sm:$0xff] %v1167_v55  ;;  %v1865_v61 = vadd.f32 %v1864_v59, %v1863_v56  ;;  %v1866_v62 = vpop.f32.mrb[30].mxu1  ;;  %v1785_v63 = vpop.f32.mrb[31].mxu0  ;;  %v1201_v59 = vld [vmem:[#allocation2 + $0x8] sm:$0xff] (!%p1615_p11) }
 0x170   : > { %v1786_v1 = vadd.f32 %v1785_v63, %v1784_v60  ;;  %v1867_v2 = vpop.f32.mrb[31].mxu1  ;;  %v2308_v60 = vld [vmem:[%s2381_s2] ss:$0 sm:$0xff] (!%p1615_p11)  ;;  %v1202_v63 = vld [vmem:[#allocation2 + $0x10] sm:$0xff] (!%p1615_p11) }
 0x171   : > { %v1125_v3 = vadd.f32 %v1865_v61, %v1783_v58  ;;  %v1868_v4 = vadd.f32 %v1867_v2, %v1866_v62  ;;  %v1200_v58 = vld [vmem:[#allocation2] sm:$0xff] (!%p1615_p11)  ;;  %v1229_v62 = vadd.f32 (!%p1615_p11), %v2308_v60, %v1201_v59  ;;  %v1230_v2 = vadd.f32 (!%p1615_p11), %v2308_v60, %v1202_v63 }
 0x172   : > { %v1228_v61 = vadd.f32 (!%p1615_p11), %v2308_v60, %v1200_v58 }
 0x173   : > { %v1168_v6 = vadd.f32 %v1125_v3, %v395_v0  ;;  %v1128_v7 = vadd.f32 %v1868_v4, %v1786_v1  ;;  %v1203_v0 = vld [vmem:[#allocation2 + $0x18] sm:$0xff] (!%p1615_p11)  ;;  %v1204_v1 = vld [vmem:[#allocation2 + $0x20] sm:$0xff] (!%p1615_p11)  ;;  %v1205_v4 = vld [vmem:[#allocation2 + $0x28] sm:$0xff] (!%p1615_p11)  ;;  %vm1250_vm1 = vcmp.gt.f32.partialorder (!%p1615_p11), %v1229_v62, 0.0  ;;  %vm1251_vm2 = vcmp.gt.f32.partialorder (!%p1615_p11), %v1230_v2, 0.0 }
 0x174   : > { %v1787_v8 = vpop.f32.mrb[32].mxu0  ;;  %v1231_v3 = vadd.f32 (!%p1615_p11), %v2308_v60, %v1203_v0  ;;  %vm1249_vm0 = vcmp.gt.f32.partialorder (!%p1615_p11), %v1228_v61, 0.0 }
 0x175   : > { %1189 = vst [vmem:[#allocation2 + $0x70] sm:$0xff] %v1168_v6  ;;  %v1169_v9 = vadd.f32 %v1128_v7, %v396_v5  ;;  %v1869_v10 = vpop.f32.mrb[32].mxu1  ;;  %v1788_v11 = vpop.f32.mrb[33].mxu0  ;;  %v1232_v5 = vadd.f32 (!%p1615_p11), %v2308_v60, %v1204_v1  ;;  %v1206_v6 = vld [vmem:[#allocation2 + $0x30] sm:$0xff] (!%p1615_p11)  ;;  %v1270_v7 = vmul.f32 (!%p1615_p11), 0.01, %v1228_v61 }
 0x176   : > { %v1789_v12 = vadd.f32 %v1788_v11, %v1787_v8  ;;  %v1870_v13 = vpop.f32.mrb[33].mxu1  ;;  %v1790_v14 = vpop.f32.mrb[34].mxu0  ;;  %v1271_v8 = vmul.f32 (!%p1615_p11), 0.01, %v1229_v62  ;;  %vm1252_vm3 = vcmp.gt.f32.partialorder (!%p1615_p11), %v1231_v3, 0.0 }
 0x177   : > { %1190 = vst [vmem:[#allocation2 + $0x78] sm:$0xff] %v1169_v9  ;;  %v1871_v15 = vadd.f32 %v1870_v13, %v1869_v10  ;;  %v1872_v16 = vpop.f32.mrb[34].mxu1  ;;  %v1791_v17 = vpop.f32.mrb[35].mxu0  ;;  %v1272_v9 = vmul.f32 (!%p1615_p11), 0.01, %v1230_v2  ;;  %v1291_v11 = vsel (!%p1615_p11), %vm1249_vm0, %v1228_v61, %v1270_v7  ;;  %v1233_v13 = vadd.f32 (!%p1615_p11), %v2308_v60, %v1205_v4 }
 0x178   : > { %v1792_v19 = vadd.f32 %v1791_v17, %v1790_v14  ;;  %v1873_v20 = vpop.f32.mrb[35].mxu1  ;;  %v1273_v10 = vmul.f32 (!%p1615_p11), 0.01, %v1231_v3  ;;  %vm1253_vm4 = vcmp.gt.f32.partialorder (!%p1615_p11), %v1232_v5, 0.0  ;;  %v1207_v14 = vld [vmem:[#allocation2 + $0x38] sm:$0xff] (!%p1615_p11) }
 0x179   : > { %v1133_v21 = vadd.f32 %v1871_v15, %v1789_v12  ;;  %v1874_v22 = vadd.f32 %v1873_v20, %v1872_v16  ;;  %v1292_v12 = vsel (!%p1615_p11), %vm1250_vm1, %v1229_v62, %v1271_v8  ;;  %v1208_v15 = vld [vmem:[#allocation2 + $0x40] sm:$0xff] (!%p1615_p11)  ;;  %v1209_v16 = vld [vmem:[#allocation2 + $0x48] sm:$0xff] (!%p1615_p11)  ;;  %v1274_v20 = vmul.f32 (!%p1615_p11), 0.01, %v1232_v5 }
 0x17a   : > { %v1667_v17 = vpack.c.bf16 (!%p1615_p11), %v1292_v12, %v1291_v11  ;;  %vm1254_vm5 = vcmp.gt.f32.partialorder (!%p1615_p11), %v1233_v13, 0.0 }
 0x17b   : > { %v1170_v24 = vadd.f32 %v1133_v21, %v397_v18  ;;  %v1136_v25 = vadd.f32 %v1874_v22, %v1792_v19  ;;  %v1293_v18 = vsel (!%p1615_p11), %vm1251_vm2, %v1230_v2, %v1272_v9  ;;  %v1294_v19 = vsel (!%p1615_p11), %vm1252_vm3, %v1231_v3, %v1273_v10  ;;  %v1210_v21 = vld [vmem:[#allocation2 + $0x50] sm:$0xff] (!%p1615_p11) }
 0x17c   : > { %v1793_v26 = vpop.f32.mrb[36].mxu0  ;;  %v1672_v22 = vpack.c.bf16 (!%p1615_p11), %v1294_v19, %v1293_v18  ;;  %1668 = vst [vmem:[%s2382_s3] sm:$0xff] (!%p1615_p11), %v1667_v17  }
 0x17d   : > { %1191 = vst [vmem:[#allocation2 + $0x80] sm:$0xff] %v1170_v24  ;;  %v1171_v27 = vadd.f32 %v1136_v25, %v398_v23  ;;  %v1875_v28 = vpop.f32.mrb[36].mxu1  ;;  %v1794_v29 = vpop.f32.mrb[37].mxu0  ;;  %v1275_v23 = vmul.f32 (!%p1615_p11), 0.01, %v1233_v13  ;;  %v1234_v24 = vadd.f32 (!%p1615_p11), %v2308_v60, %v1206_v6  ;;  %v1295_v25 = vsel (!%p1615_p11), %vm1253_vm4, %v1232_v5, %v1274_v20 }
 0x17e   : > { %v1795_v30 = vadd.f32 %v1794_v29, %v1793_v26  ;;  %v1876_v31 = vpop.f32.mrb[37].mxu1  ;;  %v1796_v32 = vpop.f32.mrb[38].mxu0  ;;  %v1235_v26 = vadd.f32 (!%p1615_p11), %v2308_v60, %v1207_v14  ;;  %1714 = vst [vmem:[%s2382_s3 + $0x8] sm:$0xff] (!%p1615_p11), %v1672_v22  }
 0x17f   : > { %1192 = vst [vmem:[#allocation2 + $0x88] sm:$0xff] %v1171_v27  ;;  %v1877_v33 = vadd.f32 %v1876_v31, %v1875_v28  ;;  %v1878_v34 = vpop.f32.mrb[38].mxu1  ;;  %v1797_v35 = vpop.f32.mrb[39].mxu0  ;;  %v1236_v27 = vadd.f32 (!%p1615_p11), %v2308_v60, %v1208_v15  ;;  %v1237_v28 = vadd.f32 (!%p1615_p11), %v2308_v60, %v1209_v16  ;;  %v1296_v29 = vsel (!%p1615_p11), %vm1254_vm5, %v1233_v13, %v1275_v23  ;;  %v1211_v31 = vld [vmem:[#allocation2 + $0x58] sm:$0xff] (!%p1615_p11) }
 0x180   : > { %v1798_v37 = vadd.f32 %v1797_v35, %v1796_v32  ;;  %v1879_v38 = vpop.f32.mrb[39].mxu1  ;;  %vm1255_vm6 = vcmp.gt.f32.partialorder (!%p1615_p11), %v1234_v24, 0.0  ;;  %v1238_v32 = vadd.f32 (!%p1615_p11), %v2308_v60, %v1210_v21  ;;  %vm1256_vm7 = vcmp.gt.f32.partialorder (!%p1615_p11), %v1235_v26, 0.0  ;;  %v1212_v35 = vld [vmem:[#allocation2 + $0x60] sm:$0xff] (!%p1615_p11) }
 0x181   : > { %v1141_v39 = vadd.f32 %v1877_v33, %v1795_v30  ;;  %v1880_v40 = vadd.f32 %v1879_v38, %v1878_v34  ;;  %v1276_v30 = vmul.f32 (!%p1615_p11), 0.01, %v1234_v24  ;;  %v1677_v33 = vpack.c.bf16 (!%p1615_p11), %v1296_v29, %v1295_v25 }
 0x182   : > { %v1277_v34 = vmul.f32 (!%p1615_p11), 0.01, %v1235_v26  ;;  %vm1257_vm8 = vcmp.gt.f32.partialorder (!%p1615_p11), %v1236_v27, 0.0  ;;  %vm1258_vm9 = vcmp.gt.f32.partialorder (!%p1615_p11), %v1237_v28, 0.0  ;;  %v1279_v38 = vmul.f32 (!%p1615_p11), 0.01, %v1237_v28 }
 0x183   : > { %v1172_v42 = vadd.f32 %v1141_v39, %v399_v36  ;;  %v1144_v43 = vadd.f32 %v1880_v40, %v1798_v37  ;;  %v1297_v36 = vsel (!%p1615_p11), %vm1255_vm6, %v1234_v24, %v1276_v30  ;;  %v1278_v37 = vmul.f32 (!%p1615_p11), 0.01, %v1236_v27  ;;  %1715 = vst [vmem:[%s2382_s3 + $0x10] sm:$0xff] (!%p1615_p11), %v1677_v33  }
 0x184   : > { %v1799_v44 = vpop.f32.mrb[40].mxu0  ;;  %v1298_v39 = vsel (!%p1615_p11), %vm1256_vm7, %v1235_v26, %v1277_v34  ;;  %v1239_v40 = vadd.f32 (!%p1615_p11), %v2308_v60, %v1211_v31  ;;  %vm1259_vm10 = vcmp.gt.f32.partialorder (!%p1615_p11), %v1238_v32, 0.0 }
 0x185   : > { %1193 = vst [vmem:[#allocation2 + $0x90] sm:$0xff] %v1172_v42  ;;  %v1173_v45 = vadd.f32 %v1144_v43, %v400_v41  ;;  %v1881_v46 = vpop.f32.mrb[40].mxu1  ;;  %v1800_v47 = vpop.f32.mrb[41].mxu0  ;;  %v1280_v41 = vmul.f32 (!%p1615_p11), 0.01, %v1238_v32  ;;  %v1213_v42 = vld [vmem:[#allocation2 + $0x68] sm:$0xff] (!%p1615_p11) }
 0x186   : > { %v1801_v48 = vadd.f32 %v1800_v47, %v1799_v44  ;;  %v1882_v49 = vpop.f32.mrb[41].mxu1  ;;  %v1802_v50 = vpop.f32.mrb[42].mxu0  ;;  %v1214_v43 = vld [vmem:[#allocation2 + $0x70] sm:$0xff] (!%p1615_p11)  ;;  %v1682_v44 = vpack.c.bf16 (!%p1615_p11), %v1298_v39, %v1297_v36  ;;  %v1240_v47 = vadd.f32 (!%p1615_p11), %v2308_v60, %v1212_v35  ;;  %vm1260_vm11 = vcmp.gt.f32.partialorder (!%p1615_p11), %v1239_v40, 0.0 }
 0x187   : > { %1194 = vst [vmem:[#allocation2 + $0x98] sm:$0xff] %v1173_v45  ;;  %v1883_v51 = vadd.f32 %v1882_v49, %v1881_v46  ;;  %v1884_v52 = vpop.f32.mrb[42].mxu1  ;;  %v1803_v53 = vpop.f32.mrb[43].mxu0  ;;  %1199 = sbr.rel (%p1615_p11) target bundleno = 413 (0x19d), region = 63  ;;  %v1299_v45 = vsel (!%p1615_p11), %vm1257_vm8, %v1236_v27, %v1278_v37  ;;  %v1300_v46 = vsel (!%p1615_p11), %vm1258_vm9, %v1237_v28, %v1279_v38  ;;  %v1216_v49 = vld [vmem:[#allocation2 + $0x80] sm:$0xff] (!%p1615_p11)  ;;  %v1217_v50 = vld [vmem:[#allocation2 + $0x88] sm:$0xff] (!%p1615_p11) }
 0x188   : > { %v1885_v55 = vpop.f32.mrb[43].mxu1  ;;  %v1281_v52 = vmul.f32 (!%p1615_p11), 0.01, %v1239_v40  ;;  %v1301_v53 = vsel (!%p1615_p11), %vm1259_vm10, %v1238_v32, %v1280_v41  ;;  %1716 = vst [vmem:[%s2382_s3 + $0x18] sm:$0xff] (!%p1615_p11), %v1682_v44   ;;  %vm1261_vm12 = vcmp.gt.f32.partialorder (!%p1615_p11), %v1240_v47, 0.0  ;;  %v1244_v59 = vadd.f32 (!%p1615_p11), %v2308_v60, %v1216_v49 }
 0x189   : > { %v1149_v56 = vadd.f32 %v1883_v51, %v1801_v48  ;;  %v1215_v48 = vld [vmem:[#allocation2 + $0x78] sm:$0xff] (!%p1615_p11)  ;;  %v1687_v51 = vpack.c.bf16 (!%p1615_p11), %v1300_v46, %v1299_v45  ;;  %v1282_v55 = vmul.f32 (!%p1615_p11), 0.01, %v1240_v47  ;;  %v1245_v61 = vadd.f32 (!%p1615_p11), %v2308_v60, %v1217_v50 }
 0x18a   : > { %v1243_v58 = vadd.f32 (!%p1615_p11), %v2308_v60, %v1215_v48  ;;  %vm1265_vm0 = vcmp.gt.f32.partialorder (!%p1615_p11), %v1244_v59, 0.0  ;;  %v1286_v6 = vmul.f32 (!%p1615_p11), 0.01, %v1244_v59 }
 0x18b   : > { %v1174_v57 = vadd.f32 %v1149_v56, %v401_v54  ;;  %v1241_v54 = vadd.f32 (!%p1615_p11), %v2308_v60, %v1213_v42  ;;  %v1242_v56 = vadd.f32 (!%p1615_p11), %v2308_v60, %v1214_v43  ;;  %1717 = vst [vmem:[%s2382_s3 + $0x20] sm:$0xff] (!%p1615_p11), %v1687_v51   ;;  %v1303_v0 = vsel (!%p1615_p11), %vm1261_vm12, %v1240_v47, %v1282_v55 }
 0x18c   : > { %v1218_v1 = vld [vmem:[#allocation2 + $0x90] sm:$0xff] (!%p1615_p11)  ;;  %vm1264_vm15 = vcmp.gt.f32.partialorder (!%p1615_p11), %v1243_v58, 0.0  ;;  %v1285_v4 = vmul.f32 (!%p1615_p11), 0.01, %v1243_v58  ;;  %vm1266_vm1 = vcmp.gt.f32.partialorder (!%p1615_p11), %v1245_v61, 0.0  ;;  %v1307_v13 = vsel (!%p1615_p11), %vm1265_vm0, %v1244_v59, %v1286_v6 }
 0x18d   : > { %1195 = vst [vmem:[#allocation2 + $0xa0] sm:$0xff] %v1174_v57  ;;  %v1302_v57 = vsel (!%p1615_p11), %vm1260_vm11, %v1239_v40, %v1281_v52  ;;  %vm1262_vm13 = vcmp.gt.f32.partialorder (!%p1615_p11), %v1241_v54, 0.0  ;;  %v1283_v63 = vmul.f32 (!%p1615_p11), 0.01, %v1241_v54  ;;  %vm1263_vm14 = vcmp.gt.f32.partialorder (!%p1615_p11), %v1242_v56, 0.0 }
 0x18e   : > { %v1692_v62 = vpack.c.bf16 %v1302_v57, %v1301_v53  ;;  %v1219_v2 = vld [vmem:[#allocation2 + $0x98] sm:$0xff]  ;;  %v1284_v3 = vmul.f32 0.01, %v1242_v56  ;;  %v1306_v10 = vsel %vm1264_vm15, %v1243_v58, %v1285_v4  ;;  %v1287_v11 = vmul.f32 0.01, %v1245_v61 }
 0x18f   : > { %v1304_v5 = vsel %vm1262_vm13, %v1241_v54, %v1283_v63  ;;  %v1246_v14 = vadd.f32 %v2308_v60, %v1218_v1  ;;  %v1247_v15 = vadd.f32 %v2308_v60, %v1219_v2 }
 0x190   : > { %1718 = vst [vmem:[%s2382_s3 + $0x28] sm:$0xff] %v1692_v62   ;;  %v1697_v8 = vpack.c.bf16 %v1304_v5, %v1303_v0  ;;  %v1305_v9 = vsel %vm1263_vm14, %v1242_v56, %v1284_v3  ;;  %v1308_v16 = vsel %vm1266_vm1, %v1245_v61, %v1287_v11 }
 0x191   : > { %v1702_v12 = vpack.c.bf16 %v1306_v10, %v1305_v9  ;;  %v1707_v18 = vpack.c.bf16 %v1308_v16, %v1307_v13  ;;  %vm1267_vm2 = vcmp.gt.f32.partialorder %v1246_v14, 0.0  ;;  %vm1268_vm3 = vcmp.gt.f32.partialorder %v1247_v15, 0.0 }
 0x192   : > { %1719 = vst [vmem:[%s2382_s3 + $0x30] sm:$0xff] %v1697_v8   ;;  %v1288_v19 = vmul.f32 0.01, %v1246_v14  ;;  %v1289_v20 = vmul.f32 0.01, %v1247_v15 }
 0x193   : > { %1720 = vst [vmem:[%s2382_s3 + $0x38] sm:$0xff] %v1702_v12   ;;  %1721 = vst [vmem:[%s2382_s3 + $0x40] sm:$0xff] %v1707_v18  }
 0x194   : > { %v1220_v7 = vld [vmem:[#allocation2 + $0xa0] sm:$0xff]  ;;  %v1309_v22 = vsel %vm1267_vm2, %v1246_v14, %v1288_v19  ;;  %v1310_v23 = vsel %vm1268_vm3, %v1247_v15, %v1289_v20 }
 0x195   : > { %v1248_v17 = vadd.f32 %v2308_v60, %v1220_v7  ;;  %v1712_v25 = vpack.c.bf16 %v1310_v23, %v1309_v22 }
 0x197   : > { %vm1269_vm4 = vcmp.gt.f32.partialorder %v1248_v17, 0.0  ;;  %v1290_v21 = vmul.f32 0.01, %v1248_v17  ;;  %1722 = vst [vmem:[%s2382_s3 + $0x48] sm:$0xff] %v1712_v25  }
 0x199   : > { %v1311_v24 = vsel %vm1269_vm4, %v1248_v17, %v1290_v21 }
 0x19a   : > { %v1663_v60 = vpack.c.bf16 %v1311_v24, %v1311_v24 }
 0x19c   : > { %1417 = vst [vmem:[%s2382_s3 + $0x50] sm:$0xf] %v1663_v60 }
 0x19d PF: > { %s13_s16 = sadd.s32 1, %s2064_s16   ;;  %s2383_s12 = smov %s2052_s13 }
 0x19e   : > { %p10_p12 = scmp.ge.s32.totalorder %s13_s16, 4   ;;  %s2384_s13 = smov %s2122_s20 }
 0x19f   : > { %s2385_s14 = smov %s2060_s15  ;;  %s2386_s15 = smov %s2388_s17 }
 0x1a0   :  { %12 = sbr.rel (!%p10_p12) target bundleno = 3 (0x3), region = 104 }

// kernel: rnd_model_forward.7
= control target key start
LH: loop header
LB: loop body
LE: loop exit
PB: predicated region body
PF: predicated region fallthrough
CT: control target
= control target key end

     0   :  { %s1570_s12 = smov 0   ;;  %s1572_s13 = smov 0   ;;  %s1802_s0 = inlined_call_operand.vmem [shape: bf16[104,1152], index: 0, kind: input, shape index: {}]   ;;  %s1803_s1 = inlined_call_operand.vmem [shape: bf16[1152,128], index: 1, kind: input, shape index: {}]   ;;  %s1804_s2 = inlined_call_operand.vmem [shape: f32[1,128], index: 2, kind: input, shape index: {}]   ;;  %s1805_s3 = inlined_call_operand.vmem [shape: bf16[104,128], index: 3, kind: output, shape index: {}]  }
   0x1   :  { %s1574_s14 = smov 0   ;;  %s1576_s15 = smov 0  }
   0x2   :  { %s1578_s16 = smov 0  }
   0x3 LB: > { %s25_s17 = sadd.s32 1, %s1541_s15  ;;  %p48_p1 = scmp.ne.s32.totalorder %s1533_s13, %s1529_s12  ;;  %s1545_s16 = sphi %s1578_s16, %s13_s16   ;;  %s1541_s15 = sphi %s1576_s15, %s1809_s15   ;;  %s1537_s14 = sphi %s1574_s14, %s1808_s14   ;;  %s1533_s13 = sphi %s1572_s13, %s1807_s13   ;;  %s1529_s12 = sphi %s1570_s12, %s1806_s12  }
   0x4   : > { %p26_p0 = scmp.ge.s32.totalorder %s25_s17, 3  ;;  %p49_p2 = scmp.eq.s32.totalorder %s1545_s16, 0 }
   0x5   : > { %s41_s19 = sadd.s32 1, %s1533_s13  ;;  %p1150_p5 = scmp.ge.s32.totalorder %s1545_s16, 3 }
   0x6   : > { %s1811_s17 = smov (%p26_p0, %s25_s17), 0  ;;  %p50_p3 = por %p49_p2, %p48_p1 }
   0x7   : > { %s37_s18 = ssub.s32 %s1541_s15, %s1811_s17  ;;  %162 = sbr.rel (%p1150_p5) target bundleno = 34 (0x22), region = 20 }
   0x8   : > { %p39_p4 = scmp.eq.s32.totalorder %s37_s18, 0 }
   0xa   : > { %s1605_s20 = scalar_select %p39_p4, %s1533_s13, %s41_s19  }
   0xe   : > { %165 = sbr.rel (!%p50_p3) target bundleno = 34 (0x22), region = 24  ;;  %s167_s21 = sand.u32 (%p50_p3), 1, %s1533_s13  }
   0xf   : > { %s1245_s22 = smul.u32 (%p50_p3), 12, %s1541_s15 }
  0x10   : > { %s1411_s23 = smul.u32 (%p50_p3), 156, %s167_s21 }
  0x11   : > { %s1613_s26 = scalar_lea.vmem (%p50_p3), %s1802_s0, %s1245_s22 }
  0x12   : > { %v190_v0 = vld [vmem:[%s1613_s26] sm:$0xff] (%p50_p3)  ;;  %v194_v2 = vld [vmem:[%s1613_s26 + $0x48] sm:$0xff] (%p50_p3)  ;;  %s1618_s27 = scalar_lea.vmem (%p50_p3), [#allocation3], %s1411_s23  ;;  %v198_v4 = vld [vmem:[%s1613_s26 + $0x90] sm:$0xff] (%p50_p3) }
  0x13   : > { %v192_v1 = vld [vmem:[%s1613_s26 + $0x24] sm:$0xff] (%p50_p3)  ;;  %191 = vst [vmem:[%s1618_s27] sm:$0xff] (%p50_p3), %v190_v0  ;;  %195 = vst [vmem:[%s1618_s27 + $0x18] sm:$0xff] (%p50_p3), %v194_v2  ;;  %v196_v3 = vld [vmem:[%s1613_s26 + $0x6c] sm:$0xff] (%p50_p3) }
  0x14   : > { %193 = vst [vmem:[%s1618_s27 + $0xc] sm:$0xff] (%p50_p3), %v192_v1  ;;  %v200_v5 = vld [vmem:[%s1613_s26 + $0xb4] sm:$0xff] (%p50_p3)  ;;  %197 = vst [vmem:[%s1618_s27 + $0x24] sm:$0xff] (%p50_p3), %v196_v3  ;;  %v204_v7 = vld [vmem:[%s1613_s26 + $0xfc] sm:$0xff] (%p50_p3) }
  0x15   : > { %199 = vst [vmem:[%s1618_s27 + $0x30] sm:$0xff] %v198_v4  ;;  %201 = vst [vmem:[%s1618_s27 + $0x3c] sm:$0xff] %v200_v5  ;;  %v202_v6 = vld [vmem:[%s1613_s26 + $0xd8] sm:$0xff]  ;;  %v206_v8 = vld [vmem:[%s1613_s26 + $0x120] sm:$0xff] }
  0x16   : > { %203 = vst [vmem:[%s1618_s27 + $0x48] sm:$0xff] %v202_v6  ;;  %205 = vst [vmem:[%s1618_s27 + $0x54] sm:$0xff] %v204_v7  ;;  %v208_v9 = vld [vmem:[%s1613_s26 + $0x144] sm:$0xff]  ;;  %v212_v11 = vld [vmem:[%s1613_s26 + $0x18c] sm:$0xff] }
  0x17   : > { %207 = vst [vmem:[%s1618_s27 + $0x60] sm:$0xff] %v206_v8  ;;  %v210_v10 = vld [vmem:[%s1613_s26 + $0x168] sm:$0xff]  ;;  %209 = vst [vmem:[%s1618_s27 + $0x6c] sm:$0xff] %v208_v9  ;;  %v214_v12 = vld [vmem:[%s1613_s26 + $0x1b0] sm:$0xff] }
  0x18   : > { %211 = vst [vmem:[%s1618_s27 + $0x78] sm:$0xff] %v210_v10  ;;  %213 = vst [vmem:[%s1618_s27 + $0x84] sm:$0xff] %v212_v11  ;;  %v1152_v13 = vld [vmem:[%s1613_s26 + $0x8] sm:$0xf]  ;;  %v1154_v14 = vld [vmem:[%s1613_s26 + $0x2c] sm:$0xf] }
  0x19   : > { %215 = vst [vmem:[%s1618_s27 + $0x90] sm:$0xff] %v214_v12  ;;  %1153 = vst [vmem:[%s1618_s27 + $0x8] sm:$0xf] %v1152_v13  ;;  %v1156_v15 = vld [vmem:[%s1613_s26 + $0x50] sm:$0xf] }
  0x1a   : > { %1155 = vst [vmem:[%s1618_s27 + $0x14] sm:$0xf] %v1154_v14  ;;  %v1158_v16 = vld [vmem:[%s1613_s26 + $0x74] sm:$0xf]  ;;  %v1160_v17 = vld [vmem:[%s1613_s26 + $0x98] sm:$0xf] }
  0x1b   : > { %1157 = vst [vmem:[%s1618_s27 + $0x20] sm:$0xf] %v1156_v15  ;;  %1159 = vst [vmem:[%s1618_s27 + $0x2c] sm:$0xf] %v1158_v16  ;;  %v1162_v18 = vld [vmem:[%s1613_s26 + $0xbc] sm:$0xf] }
  0x1c   : > { %1161 = vst [vmem:[%s1618_s27 + $0x38] sm:$0xf] %v1160_v17  ;;  %v1164_v19 = vld [vmem:[%s1613_s26 + $0xe0] sm:$0xf]  ;;  %v1166_v20 = vld [vmem:[%s1613_s26 + $0x104] sm:$0xf] }
  0x1d   : > { %1163 = vst [vmem:[%s1618_s27 + $0x44] sm:$0xf] %v1162_v18  ;;  %1165 = vst [vmem:[%s1618_s27 + $0x50] sm:$0xf] %v1164_v19  ;;  %v1168_v21 = vld [vmem:[%s1613_s26 + $0x128] sm:$0xf] }
  0x1e   : > { %1167 = vst [vmem:[%s1618_s27 + $0x5c] sm:$0xf] %v1166_v20  ;;  %v1170_v22 = vld [vmem:[%s1613_s26 + $0x14c] sm:$0xf]  ;;  %v1172_v23 = vld [vmem:[%s1613_s26 + $0x170] sm:$0xf] }
  0x1f   : > { %1169 = vst [vmem:[%s1618_s27 + $0x68] sm:$0xf] %v1168_v21  ;;  %1171 = vst [vmem:[%s1618_s27 + $0x74] sm:$0xf] %v1170_v22  ;;  %v1174_v24 = vld [vmem:[%s1613_s26 + $0x194] sm:$0xf] }
  0x20   : > { %1173 = vst [vmem:[%s1618_s27 + $0x80] sm:$0xf] %v1172_v23  ;;  %v1176_v25 = vld [vmem:[%s1613_s26 + $0x1b8] sm:$0xf]  ;;  %1175 = vst [vmem:[%s1618_s27 + $0x8c] sm:$0xf] %v1174_v24 }
  0x21   : > { %1177 = vst [vmem:[%s1618_s27 + $0x98] sm:$0xf] %v1176_v25 }
  0x22 PF: > { %p1178_p6 = scmp.ge.s32.totalorder %s1545_s16, 1  ;;  %p265_p7 = scmp.lt.s32.totalorder %s1545_s16, 4 }
  0x24   : > { %p266_p8 = pnand %p1178_p6, %p265_p7 }
  0x25   : > { %s272_s28 = sand.u32 (!%p266_p8), 1, %s1529_s12   ;;  %s311_s29 = smul.u32 (!%p266_p8), 48, %s1537_s14 }
  0x26   : > { %269 = sbr.rel (%p266_p8) target bundleno = 370 (0x172), region = 54  ;;  %p1180_p10 = scmp.ne.s32.totalorder (!%p266_p8), %s1537_s14, 0 }
  0x27   : > { %s1412_s30 = smul.u32 (!%p266_p8), 156, %s272_s28  ;;  %p312_p9 = scmp.lt.s32.totalorder (!%p266_p8), %s311_s29, 143 }
  0x29   : > { %s1678_s8 = scalar_lea.vmem (!%p266_p8), [#allocation3], %s1412_s30 }
  0x2d   : > { %s1813_s29 = smov (!%p312_p9, %s311_s29), 143  ;;  %336 = sbr.rel (%p1180_p10) target bundleno = 54 (0x36), region = 62 }
  0x2e   : > { %s1179_s4 = sshll.u32 %s1813_s29, 2  ;;  %v1547_v26 = vmov (!%p1180_p10), 0.0  }
  0x2f   : > { %s1676_s7 = scalar_lea.vmem %s1803_s1, %s1179_s4  ;;  %337 = vst [vmem:[#allocation2] sm:$0xff] (!%p1180_p10), %v1547_v26  ;;  %338 = vst [vmem:[#allocation2 + $0x8] sm:$0xff] (!%p1180_p10), %v1547_v26 }
  0x30   : > { %339 = vst [vmem:[#allocation2 + $0x10] sm:$0xff] (!%p1180_p10), %v1547_v26  ;;  %340 = vst [vmem:[#allocation2 + $0x18] sm:$0xff] (!%p1180_p10), %v1547_v26 }
  0x31   : > { %341 = vst [vmem:[#allocation2 + $0x20] sm:$0xff] (!%p1180_p10), %v1547_v26  ;;  %342 = vst [vmem:[#allocation2 + $0x28] sm:$0xff] (!%p1180_p10), %v1547_v26 }
  0x32   : > { %343 = vst [vmem:[#allocation2 + $0x30] sm:$0xff] (!%p1180_p10), %v1547_v26  ;;  %344 = vst [vmem:[#allocation2 + $0x38] sm:$0xff] (!%p1180_p10), %v1547_v26 }
  0x33   : > { %345 = vst [vmem:[#allocation2 + $0x40] sm:$0xff] (!%p1180_p10), %v1547_v26  ;;  %346 = vst [vmem:[#allocation2 + $0x48] sm:$0xff] (!%p1180_p10), %v1547_v26 }
  0x34   : > { %347 = vst [vmem:[#allocation2 + $0x50] sm:$0xff] %v1547_v26  ;;  %348 = vst [vmem:[#allocation2 + $0x58] sm:$0xff] %v1547_v26 }
  0x35   : > { %349 = vst [vmem:[#allocation2 + $0x60] sm:$0xff] %v1547_v26 }
  0x36 PF: > { %v1456_v27 = vld [vmem:[%s1676_s7 + $0x40] sm:$0xff]   ;;  %v1548_v28 = vmov 0.0   ;;  %vm1549_vm0 = vmmov 0   ;;  %v1459_v31 = vld [vmem:[%s1676_s7 + $0x48] sm:$0xff]   ;;  %v1462_v34 = vld [vmem:[%s1676_s7 + $0x50] sm:$0xff]   ;;  %p1226_p11 = scmp.ne.s32.totalorder %s1537_s14, 2 }
  0x37   : > { %1367 = vmatprep.subr.bf16.mxu1 %v1548_v28  ;;  %v1457_v29 = vld [vmem:[%s1676_s7] sm:$0xff]   ;;  %1294 = vmatprep.subr.bf16.mxu0 %v1456_v27  ;;  %v1460_v32 = vld [vmem:[%s1676_s7 + $0x8] sm:$0xff]   ;;  %v1463_v35 = vld [vmem:[%s1676_s7 + $0x10] sm:$0xff]  }
  0x38   : > { %v1458_v30 = vld [vmem:[%s1676_s7 + $0x80] sm:$0xff]   ;;  %1383 = vmatprep.mubr.msk.bf16.mxu1 %vm1549_vm0, %v1548_v28  ;;  %1295 = vmatpush3.bf16.msra.mxu0 %v1457_v29  ;;  %v1461_v33 = vld [vmem:[%s1676_s7 + $0x88] sm:$0xff]   ;;  %v1464_v36 = vld [vmem:[%s1676_s7 + $0x90] sm:$0xff]  }
  0x39   : > { %1368 = vmatpush3.bf16.msra.mxu1 %v1458_v30  ;;  %1296 = vmatprep.subr.bf16.mxu0 %v1459_v31  ;;  %v1465_v37 = vld [vmem:[%s1676_s7 + $0x58] sm:$0xff]   ;;  %v1468_v40 = vld [vmem:[%s1676_s7 + $0x60] sm:$0xff]   ;;  %v1471_v43 = vld [vmem:[%s1676_s7 + $0x68] sm:$0xff]  }
  0x3a   : > { %1369 = vmatprep.subr.bf16.mxu1 %v1548_v28  ;;  %v1466_v38 = vld [vmem:[%s1676_s7 + $0x18] sm:$0xff]   ;;  %v1469_v41 = vld [vmem:[%s1676_s7 + $0x20] sm:$0xff]   ;;  %v1472_v44 = vld [vmem:[%s1676_s7 + $0x28] sm:$0xff]  }
  0x3b   : > { %v1467_v39 = vld [vmem:[%s1676_s7 + $0x98] sm:$0xff]   ;;  %v1470_v42 = vld [vmem:[%s1676_s7 + $0xa0] sm:$0xff]   ;;  %v1473_v45 = vld [vmem:[%s1676_s7 + $0xa8] sm:$0xff]  }
  0x3c   : > { %1297 = vmatpush3.bf16.msra.mxu0 %v1460_v32  ;;  %v1474_v46 = vld [vmem:[%s1676_s7 + $0x70] sm:$0xff]   ;;  %v1477_v49 = vld [vmem:[%s1676_s7 + $0x78] sm:$0xff]   ;;  %v350_v16 = vld [vmem:[#allocation2] sm:$0xff] }
  0x3d   : > { %1370 = vmatpush3.bf16.msra.mxu1 %v1461_v33  ;;  %1298 = vmatprep.subr.bf16.mxu0 %v1462_v34  ;;  %v1475_v47 = vld [vmem:[%s1676_s7 + $0x30] sm:$0xff]   ;;  %v1478_v51 = vld [vmem:[%s1676_s7 + $0x38] sm:$0xff]   ;;  %v351_v22 = vld [vmem:[#allocation2 + $0x8] sm:$0xff] }
  0x3e   : > { %1371 = vmatprep.subr.bf16.mxu1 %v1548_v28  ;;  %v1476_v48 = vld [vmem:[%s1676_s7 + $0xb0] sm:$0xff]   ;;  %v1479_v52 = vld [vmem:[%s1676_s7 + $0xb8] sm:$0xff]  }
  0x3f   : > { %v1482_v50 = vld [vmem:[%s1678_s8 + $0x4] ss:$12 sps:$4 sm:$0xff]   ;;  %v1480_v53 = vld [vmem:[%s1678_s8] ss:$12 sps:$4 sm:$0xff]   ;;  %v1483_v54 = vld [vmem:[%s1678_s8 + $0x8] ss:$12 sps:$4 sm:$0xff]  }
  0x40   : > { %1299 = vmatpush3.bf16.msra.mxu0 %v1463_v35  ;;  %720 = vmatprep.mubr.bf16.mxu0 %v1482_v50  ;;  %v1484_v55 = vld [vmem:[%s1678_s8 + $0x1c] ss:$12 sps:$4 sm:$0xff]   ;;  %v1486_v56 = vld [vmem:[%s1678_s8 + $0x18] ss:$12 sps:$4 sm:$0xff]   ;;  %v1487_v57 = vld [vmem:[%s1678_s8 + $0x20] ss:$12 sps:$4 sm:$0xff]  }
  0x41   : > { %1372 = vmatpush3.bf16.msra.mxu1 %v1464_v36  ;;  %1300 = vmatprep.subr.bf16.mxu0 %v1465_v37  ;;  %v1488_v58 = vld [vmem:[%s1678_s8 + $0x34] ss:$12 sps:$4 sm:$0xff]   ;;  %v1490_v59 = vld [vmem:[%s1678_s8 + $0x30] ss:$12 sps:$4 sm:$0xff]   ;;  %v1491_v60 = vld [vmem:[%s1678_s8 + $0x38] ss:$12 sps:$4 sm:$0xff]  }
  0x42   : > { %1373 = vmatprep.subr.bf16.mxu1 %v1548_v28  ;;  %v1492_v61 = vld [vmem:[%s1678_s8 + $0x4c] ss:$12 sps:$4 sm:$0xff]   ;;  %v1494_v62 = vld [vmem:[%s1678_s8 + $0x48] ss:$12 sps:$4 sm:$0xff]   ;;  %v1495_v63 = vld [vmem:[%s1678_s8 + $0x50] ss:$12 sps:$4 sm:$0xff]  }
  0x43   : > { %v1496_v0 = vld [vmem:[%s1678_s8 + $0x64] ss:$12 sps:$4 sm:$0xff]   ;;  %v1498_v1 = vld [vmem:[%s1678_s8 + $0x60] ss:$12 sps:$4 sm:$0xff]   ;;  %v1499_v2 = vld [vmem:[%s1678_s8 + $0x68] ss:$12 sps:$4 sm:$0xff]  }
  0x44   : > { %1301 = vmatpush3.bf16.msra.mxu0 %v1466_v38  ;;  %v1500_v3 = vld [vmem:[%s1678_s8 + $0x7c] ss:$12 sps:$4 sm:$0xff]   ;;  %v387_v4 = vld [vmem:[%s1678_s8 + $0x90] sm:$0xff]  ;;  %v1502_v5 = vld [vmem:[%s1678_s8 + $0x78] ss:$12 sps:$4 sm:$0xff]  }
  0x45   : > { %1374 = vmatpush3.bf16.msra.mxu1 %v1467_v39  ;;  %1302 = vmatprep.subr.bf16.mxu0 %v1468_v40  ;;  %v1503_v6 = vld [vmem:[%s1678_s8 + $0x80] ss:$12 sps:$4 sm:$0xff]   ;;  %v1200_v7 = vcombine.high %v387_v4, %v387_v4  ;;  %v1199_v8 = vcombine.low %v387_v4, %v387_v4  ;;  %v1506_v9 = vld [vmem:[%s1678_s8 + $0x98] ss:$0 sps:$4 sm:$0xff]  }
  0x46   : > { %1375 = vmatprep.subr.bf16.mxu1 %v1548_v28  ;;  %v352_v32 = vld [vmem:[#allocation2 + $0x10] sm:$0xff]  ;;  %v353_v38 = vld [vmem:[#allocation2 + $0x18] sm:$0xff] }
  0x48   : > { %1303 = vmatpush3.bf16.msra.mxu0 %v1469_v41 }
  0x49   : > { %1376 = vmatpush3.bf16.msra.mxu1 %v1470_v42  ;;  %1304 = vmatprep.subr.bf16.mxu0 %v1471_v43 }
  0x4a   : > { %1377 = vmatprep.subr.bf16.mxu1 %v1548_v28 }
  0x4c   : > { %1305 = vmatpush3.bf16.msra.mxu0 %v1472_v44 }
  0x4d   : > { %1378 = vmatpush3.bf16.msra.mxu1 %v1473_v45  ;;  %1306 = vmatprep.subr.bf16.mxu0 %v1474_v46 }
  0x4e   : > { %1379 = vmatprep.subr.bf16.mxu1 %v1548_v28 }
  0x50   : > { %1307 = vmatpush3.bf16.msra.mxu0 %v1475_v47 }
  0x51   : > { %1380 = vmatpush3.bf16.msra.mxu1 %v1476_v48  ;;  %1308 = vmatprep.subr.bf16.mxu0 %v1477_v49  ;;  %v354_v48 = vld [vmem:[#allocation2 + $0x20] sm:$0xff] }
  0x52   : > { %1381 = vmatprep.subr.bf16.mxu1 %v1548_v28 }
  0x54   : > { %1309 = vmatpush3.bf16.msra.mxu0 %v1478_v51 }
  0x55   : > { %1382 = vmatpush3.bf16.msra.mxu1 %v1479_v52 }
  0x57   : > { %721 = vmatmul.mubr.bf16.vlgmr.msra.gmra.mrb[0].mxu0 %v1480_v53 }
  0x58   : > { %1384 = vmatmul.mubr.bf16.vlgmr.msra.gmra.mrb[0].mxu1 %v1483_v54  ;;  %728 = vmatprep.mubr.bf16.mxu0 %v1484_v55  ;;  %v355_v54 = vld [vmem:[#allocation2 + $0x28] sm:$0xff] }
  0x59   : > { %1387 = vmatprep.mubr.msk.bf16.mxu1 %vm1549_vm0, %v1548_v28 }
  0x5f   : > { %729 = vmatmul.mubr.bf16.gmra.mrb[4].mxu0 %v1486_v56 }
  0x60   : > { %1388 = vmatmul.mubr.bf16.gmra.mrb[4].mxu1 %v1487_v57  ;;  %736 = vmatprep.mubr.bf16.mxu0 %v1488_v58 }
  0x61   : > { %1391 = vmatprep.mubr.msk.bf16.mxu1 %vm1549_vm0, %v1548_v28 }
  0x67   : > { %737 = vmatmul.mubr.bf16.gmra.mrb[8].mxu0 %v1490_v59 }
  0x68   : > { %1392 = vmatmul.mubr.bf16.gmra.mrb[8].mxu1 %v1491_v60  ;;  %744 = vmatprep.mubr.bf16.mxu0 %v1492_v61 }
  0x69   : > { %1395 = vmatprep.mubr.msk.bf16.mxu1 %vm1549_vm0, %v1548_v28 }
  0x6f   : > { %745 = vmatmul.mubr.bf16.gmra.mrb[12].mxu0 %v1494_v62 }
  0x70   : > { %1396 = vmatmul.mubr.bf16.gmra.mrb[12].mxu1 %v1495_v63  ;;  %752 = vmatprep.mubr.bf16.mxu0 %v1496_v0  ;;  %v356_v0 = vld [vmem:[#allocation2 + $0x30] sm:$0xff] }
  0x71   : > { %1399 = vmatprep.mubr.msk.bf16.mxu1 %vm1549_vm0, %v1548_v28 }
  0x77   : > { %753 = vmatmul.mubr.bf16.gmra.mrb[16].mxu0 %v1498_v1 }
  0x78   : > { %1400 = vmatmul.mubr.bf16.gmra.mrb[16].mxu1 %v1499_v2  ;;  %760 = vmatprep.mubr.bf16.mxu0 %v1500_v3 }
  0x79   : > { %1403 = vmatprep.mubr.msk.bf16.mxu1 %vm1549_vm0, %v1548_v28 }
  0x7f   : > { %761 = vmatmul.mubr.bf16.gmra.mrb[20].mxu0 %v1502_v5 }
  0x80   : > { %1404 = vmatmul.mubr.bf16.gmra.mrb[20].mxu1 %v1503_v6  ;;  %768 = vmatprep.mubr.bf16.mxu0 %v1200_v7  ;;  %v357_v6 = vld [vmem:[#allocation2 + $0x38] sm:$0xff] }
  0x81   : > { %1407 = vmatprep.mubr.msk.bf16.mxu1 %vm1549_vm0, %v1548_v28 }
  0x87   : > { %769 = vmatmul.mubr.bf16.gmra.mrb[24].mxu0 %v1199_v8 }
  0x88   : > { %1408 = vmatmul.mubr.bf16.gmra.mrb[24].mxu1 %v1506_v9 }
 0x12a   : > { %v1310_v10 = vpop.f32.mrb[0].mxu0 }
 0x12b   : > { %v810_v11 = vpop.f32.mrb[0].mxu1  ;;  %v1311_v12 = vpop.f32.mrb[1].mxu0 }
 0x12c   : > { %v1312_v13 = vadd.f32 %v1311_v12, %v1310_v10  ;;  %v1385_v14 = vpop.f32.mrb[1].mxu1  ;;  %v1313_v15 = vpop.f32.mrb[2].mxu0 }
 0x12d   : > { %v813_v17 = vpop.f32.mrb[2].mxu1  ;;  %v1314_v18 = vpop.f32.mrb[3].mxu0 }
 0x12e   : > { %v811_v19 = vadd.f32 %v1312_v13, %v810_v11  ;;  %v1315_v20 = vadd.f32 %v1314_v18, %v1313_v15  ;;  %v1386_v21 = vpop.f32.mrb[3].mxu1 }
 0x130   : > { %v864_v23 = vadd.f32 %v811_v19, %v350_v16  ;;  %v814_v24 = vadd.f32 %v1315_v20, %v813_v17  ;;  %v358_v16 = vld [vmem:[#allocation2 + $0x40] sm:$0xff] }
 0x132   : > { %877 = vst [vmem:[#allocation2] sm:$0xff] %v864_v23  ;;  %v865_v25 = vadd.f32 %v814_v24, %v351_v22  ;;  %v1316_v26 = vpop.f32.mrb[4].mxu0  ;;  %v359_v22 = vld [vmem:[#allocation2 + $0x48] sm:$0xff] }
 0x133   : > { %v818_v27 = vpop.f32.mrb[4].mxu1  ;;  %v1317_v28 = vpop.f32.mrb[5].mxu0 }
 0x134   : > { %878 = vst [vmem:[#allocation2 + $0x8] sm:$0xff] %v865_v25  ;;  %v1318_v29 = vadd.f32 %v1317_v28, %v1316_v26  ;;  %v1389_v30 = vpop.f32.mrb[5].mxu1  ;;  %v1319_v31 = vpop.f32.mrb[6].mxu0 }
 0x135   : > { %v821_v33 = vpop.f32.mrb[6].mxu1  ;;  %v1320_v34 = vpop.f32.mrb[7].mxu0 }
 0x136   : > { %v819_v35 = vadd.f32 %v1318_v29, %v818_v27  ;;  %v1321_v36 = vadd.f32 %v1320_v34, %v1319_v31  ;;  %v1390_v37 = vpop.f32.mrb[7].mxu1 }
 0x138   : > { %v866_v39 = vadd.f32 %v819_v35, %v352_v32  ;;  %v822_v40 = vadd.f32 %v1321_v36, %v821_v33  ;;  %v360_v32 = vld [vmem:[#allocation2 + $0x50] sm:$0xff] }
 0x13a   : > { %879 = vst [vmem:[#allocation2 + $0x10] sm:$0xff] %v866_v39  ;;  %v867_v41 = vadd.f32 %v822_v40, %v353_v38  ;;  %v1322_v42 = vpop.f32.mrb[8].mxu0  ;;  %v361_v38 = vld [vmem:[#allocation2 + $0x58] sm:$0xff] }
 0x13b   : > { %v826_v43 = vpop.f32.mrb[8].mxu1  ;;  %v1323_v44 = vpop.f32.mrb[9].mxu0 }
 0x13c   : > { %880 = vst [vmem:[#allocation2 + $0x18] sm:$0xff] %v867_v41  ;;  %v1324_v45 = vadd.f32 %v1323_v44, %v1322_v42  ;;  %v1393_v46 = vpop.f32.mrb[9].mxu1  ;;  %v1325_v47 = vpop.f32.mrb[10].mxu0 }
 0x13d   : > { %v829_v49 = vpop.f32.mrb[10].mxu1  ;;  %v1326_v50 = vpop.f32.mrb[11].mxu0 }
 0x13e   : > { %v827_v51 = vadd.f32 %v1324_v45, %v826_v43  ;;  %v1327_v52 = vadd.f32 %v1326_v50, %v1325_v47  ;;  %v1394_v53 = vpop.f32.mrb[11].mxu1 }
 0x140   : > { %v868_v55 = vadd.f32 %v827_v51, %v354_v48  ;;  %v830_v56 = vadd.f32 %v1327_v52, %v829_v49  ;;  %v362_v48 = vld [vmem:[#allocation2 + $0x60] sm:$0xff] }
 0x142   : > { %881 = vst [vmem:[#allocation2 + $0x20] sm:$0xff] %v868_v55  ;;  %v869_v57 = vadd.f32 %v830_v56, %v355_v54  ;;  %v1328_v58 = vpop.f32.mrb[12].mxu0  ;;  %v894_v54 = vld [vmem:[#allocation2] sm:$0xff] (!%p1226_p11)  ;;  %v895_v55 = vld [vmem:[#allocation2 + $0x8] sm:$0xff] (!%p1226_p11) }
 0x143   : > { %v834_v59 = vpop.f32.mrb[12].mxu1  ;;  %v1329_v60 = vpop.f32.mrb[13].mxu0  ;;  %v1751_v56 = vld [vmem:[%s1804_s2] ss:$0 sm:$0xff] (!%p1226_p11) }
 0x144   : > { %882 = vst [vmem:[#allocation2 + $0x28] sm:$0xff] %v869_v57  ;;  %v1330_v61 = vadd.f32 %v1329_v60, %v1328_v58  ;;  %v1397_v62 = vpop.f32.mrb[13].mxu1  ;;  %v1331_v63 = vpop.f32.mrb[14].mxu0  ;;  %v914_v57 = vadd.f32 (!%p1226_p11), %v1751_v56, %v894_v54  ;;  %v915_v58 = vadd.f32 (!%p1226_p11), %v1751_v56, %v895_v55  ;;  %v897_v60 = vld [vmem:[#allocation2 + $0x18] sm:$0xff] (!%p1226_p11) }
 0x145   : > { %v837_v1 = vpop.f32.mrb[14].mxu1  ;;  %v1332_v2 = vpop.f32.mrb[15].mxu0 }
 0x146   : > { %v835_v3 = vadd.f32 %v1330_v61, %v834_v59  ;;  %v1333_v4 = vadd.f32 %v1332_v2, %v1331_v63  ;;  %v1398_v5 = vpop.f32.mrb[15].mxu1  ;;  %v896_v59 = vld [vmem:[#allocation2 + $0x10] sm:$0xff] (!%p1226_p11)  ;;  %v917_v63 = vadd.f32 (!%p1226_p11), %v1751_v56, %v897_v60  ;;  %vm927_vm1 = vcmp.gt.f32.partialorder (!%p1226_p11), %v914_v57, 0.0 }
 0x147   : > { %v916_v62 = vadd.f32 (!%p1226_p11), %v1751_v56, %v896_v59  ;;  %vm928_vm2 = vcmp.gt.f32.partialorder (!%p1226_p11), %v915_v58, 0.0 }
 0x148   : > { %v870_v7 = vadd.f32 %v835_v3, %v356_v0  ;;  %v838_v8 = vadd.f32 %v1333_v4, %v837_v1  ;;  %v940_v3 = vmul.f32 (!%p1226_p11), 0.01, %v914_v57  ;;  %v941_v4 = vmul.f32 (!%p1226_p11), 0.01, %v915_v58 }
 0x149   : > { %v898_v61 = vld [vmem:[#allocation2 + $0x20] sm:$0xff] (!%p1226_p11)  ;;  %vm929_vm3 = vcmp.gt.f32.partialorder (!%p1226_p11), %v916_v62, 0.0  ;;  %vm930_vm4 = vcmp.gt.f32.partialorder (!%p1226_p11), %v917_v63, 0.0  ;;  %v942_v5 = vmul.f32 (!%p1226_p11), 0.01, %v916_v62 }
 0x14a   : > { %883 = vst [vmem:[#allocation2 + $0x30] sm:$0xff] %v870_v7  ;;  %v871_v9 = vadd.f32 %v838_v8, %v357_v6  ;;  %v1334_v10 = vpop.f32.mrb[16].mxu0  ;;  %v918_v1 = vadd.f32 (!%p1226_p11), %v1751_v56, %v898_v61  ;;  %v943_v6 = vmul.f32 (!%p1226_p11), 0.01, %v917_v63  ;;  %v953_v7 = vsel (!%p1226_p11), %vm927_vm1, %v914_v57, %v940_v3 }
 0x14b   : > { %v842_v11 = vpop.f32.mrb[16].mxu1  ;;  %v1335_v12 = vpop.f32.mrb[17].mxu0  ;;  %v899_v0 = vld [vmem:[#allocation2 + $0x28] sm:$0xff] (!%p1226_p11)  ;;  %v954_v8 = vsel (!%p1226_p11), %vm928_vm2, %v915_v58, %v941_v4 }
 0x14c   : > { %884 = vst [vmem:[#allocation2 + $0x38] sm:$0xff] %v871_v9  ;;  %v1336_v13 = vadd.f32 %v1335_v12, %v1334_v10  ;;  %v1401_v14 = vpop.f32.mrb[17].mxu1  ;;  %v1337_v15 = vpop.f32.mrb[18].mxu0  ;;  %v919_v9 = vadd.f32 (!%p1226_p11), %v1751_v56, %v899_v0  ;;  %vm931_vm5 = vcmp.gt.f32.partialorder (!%p1226_p11), %v918_v1, 0.0 }
 0x14d   : > { %v845_v17 = vpop.f32.mrb[18].mxu1  ;;  %v1338_v18 = vpop.f32.mrb[19].mxu0  ;;  %v955_v14 = vsel (!%p1226_p11), %vm929_vm3, %v916_v62, %v942_v5 }
 0x14e   : > { %v843_v19 = vadd.f32 %v1336_v13, %v842_v11  ;;  %v1339_v20 = vadd.f32 %v1338_v18, %v1337_v15  ;;  %v1402_v21 = vpop.f32.mrb[19].mxu1  ;;  %v1262_v13 = vpack.c.bf16 (!%p1226_p11), %v954_v8, %v953_v7  ;;  %v956_v15 = vsel (!%p1226_p11), %vm930_vm4, %v917_v63, %v943_v6 }
 0x14f   : > { %v1267_v18 = vpack.c.bf16 (!%p1226_p11), %v956_v15, %v955_v14  ;;  %vm932_vm6 = vcmp.gt.f32.partialorder (!%p1226_p11), %v919_v9, 0.0 }
 0x150   : > { %v872_v23 = vadd.f32 %v843_v19, %v358_v16  ;;  %v846_v24 = vadd.f32 %v1339_v20, %v845_v17  ;;  %v944_v16 = vmul.f32 (!%p1226_p11), 0.01, %v918_v1  ;;  %v945_v19 = vmul.f32 (!%p1226_p11), 0.01, %v919_v9  ;;  %1263 = vst [vmem:[%s1805_s3] sm:$0xff] (!%p1226_p11), %v1262_v13  }
 0x151   : > { %v900_v2 = vld [vmem:[#allocation2 + $0x30] sm:$0xff] (!%p1226_p11)  ;;  %1289 = vst [vmem:[%s1805_s3 + $0x8] sm:$0xff] (!%p1226_p11), %v1267_v18  }
 0x152   : > { %885 = vst [vmem:[#allocation2 + $0x40] sm:$0xff] %v872_v23  ;;  %v873_v25 = vadd.f32 %v846_v24, %v359_v22  ;;  %v1340_v26 = vpop.f32.mrb[20].mxu0  ;;  %v920_v20 = vadd.f32 (!%p1226_p11), %v1751_v56, %v900_v2  ;;  %v957_v21 = vsel (!%p1226_p11), %vm931_vm5, %v918_v1, %v944_v16 }
 0x153   : > { %v850_v27 = vpop.f32.mrb[20].mxu1  ;;  %v1341_v28 = vpop.f32.mrb[21].mxu0  ;;  %v901_v10 = vld [vmem:[#allocation2 + $0x38] sm:$0xff] (!%p1226_p11) }
 0x154   : > { %886 = vst [vmem:[#allocation2 + $0x48] sm:$0xff] %v873_v25  ;;  %v1342_v29 = vadd.f32 %v1341_v28, %v1340_v26  ;;  %v1405_v30 = vpop.f32.mrb[21].mxu1  ;;  %v1343_v31 = vpop.f32.mrb[22].mxu0  ;;  %v921_v22 = vadd.f32 (!%p1226_p11), %v1751_v56, %v901_v10  ;;  %v958_v25 = vsel (!%p1226_p11), %vm932_vm6, %v919_v9, %v945_v19  ;;  %vm933_vm7 = vcmp.gt.f32.partialorder (!%p1226_p11), %v920_v20, 0.0 }
 0x155   : > { %v853_v33 = vpop.f32.mrb[22].mxu1  ;;  %v1344_v34 = vpop.f32.mrb[23].mxu0  ;;  %v946_v26 = vmul.f32 (!%p1226_p11), 0.01, %v920_v20 }
 0x156   : > { %v851_v35 = vadd.f32 %v1342_v29, %v850_v27  ;;  %v1345_v36 = vadd.f32 %v1344_v34, %v1343_v31  ;;  %v1406_v37 = vpop.f32.mrb[23].mxu1  ;;  %v1272_v29 = vpack.c.bf16 (!%p1226_p11), %v958_v25, %v957_v21  ;;  %vm934_vm8 = vcmp.gt.f32.partialorder (!%p1226_p11), %v921_v22, 0.0 }
 0x157   : > { %v947_v30 = vmul.f32 (!%p1226_p11), 0.01, %v921_v22 }
 0x158   : > { %v874_v39 = vadd.f32 %v851_v35, %v360_v32  ;;  %v854_v40 = vadd.f32 %v1345_v36, %v853_v33  ;;  %v959_v32 = vsel (!%p1226_p11), %vm933_vm7, %v920_v20, %v946_v26  ;;  %1290 = vst [vmem:[%s1805_s3 + $0x10] sm:$0xff] (!%p1226_p11), %v1272_v29  }
 0x159   : > { %v902_v11 = vld [vmem:[#allocation2 + $0x40] sm:$0xff] (!%p1226_p11)  ;;  %v960_v35 = vsel (!%p1226_p11), %vm934_vm8, %v921_v22, %v947_v30 }
 0x15a   : > { %887 = vst [vmem:[#allocation2 + $0x50] sm:$0xff] %v874_v39  ;;  %v875_v41 = vadd.f32 %v854_v40, %v361_v38  ;;  %v1346_v42 = vpop.f32.mrb[24].mxu0  ;;  %v922_v23 = vadd.f32 (!%p1226_p11), %v1751_v56, %v902_v11  ;;  %v1277_v38 = vpack.c.bf16 (!%p1226_p11), %v960_v35, %v959_v32 }
 0x15b   : > { %v858_v43 = vpop.f32.mrb[24].mxu1  ;;  %v1347_v44 = vpop.f32.mrb[25].mxu0  ;;  %v903_v12 = vld [vmem:[#allocation2 + $0x48] sm:$0xff] (!%p1226_p11) }
 0x15c   : > { %888 = vst [vmem:[#allocation2 + $0x58] sm:$0xff] %v875_v41  ;;  %v1348_v45 = vadd.f32 %v1347_v44, %v1346_v42  ;;  %v1409_v46 = vpop.f32.mrb[25].mxu1  ;;  %v1349_v47 = vpop.f32.mrb[26].mxu0  ;;  %893 = sbr.rel (%p1226_p11) target bundleno = 370 (0x172), region = 66  ;;  %v923_v24 = vadd.f32 (!%p1226_p11), %v1751_v56, %v903_v12  ;;  %vm935_vm9 = vcmp.gt.f32.partialorder (!%p1226_p11), %v922_v23, 0.0  ;;  %1291 = vst [vmem:[%s1805_s3 + $0x18] sm:$0xff] (!%p1226_p11), %v1277_v38  }
 0x15d   : > { %v861_v49 = vpop.f32.mrb[26].mxu1  ;;  %v1350_v50 = vpop.f32.mrb[27].mxu0  ;;  %v948_v33 = vmul.f32 (!%p1226_p11), 0.01, %v922_v23 }
 0x15e   : > { %v859_v51 = vadd.f32 %v1348_v45, %v858_v43  ;;  %v1410_v52 = vpop.f32.mrb[27].mxu1  ;;  %vm936_vm10 = vcmp.gt.f32.partialorder (!%p1226_p11), %v923_v24, 0.0  ;;  %v949_v34 = vmul.f32 (!%p1226_p11), 0.01, %v923_v24 }
 0x15f   : > { %v961_v39 = vsel (!%p1226_p11), %vm935_vm9, %v922_v23, %v948_v33 }
 0x160   : > { %v876_v53 = vadd.f32 %v859_v51, %v362_v48  ;;  %v962_v40 = vsel (!%p1226_p11), %vm936_vm10, %v923_v24, %v949_v34 }
 0x161   : > { %v904_v17 = vld [vmem:[#allocation2 + $0x50] sm:$0xff] (!%p1226_p11)  ;;  %v1282_v42 = vpack.c.bf16 (!%p1226_p11), %v962_v40, %v961_v39 }
 0x162   : > { %889 = vst [vmem:[#allocation2 + $0x60] sm:$0xff] %v876_v53  ;;  %v924_v28 = vadd.f32 (!%p1226_p11), %v1751_v56, %v904_v17 }
 0x163   : > { %v905_v27 = vld [vmem:[#allocation2 + $0x58] sm:$0xff]  ;;  %1292 = vst [vmem:[%s1805_s3 + $0x20] sm:$0xff] %v1282_v42  }
 0x164   : > { %v925_v36 = vadd.f32 %v1751_v56, %v905_v27  ;;  %vm937_vm11 = vcmp.gt.f32.partialorder %v924_v28, 0.0  ;;  %v950_v37 = vmul.f32 0.01, %v924_v28 }
 0x166   : > { %vm938_vm12 = vcmp.gt.f32.partialorder %v925_v36, 0.0  ;;  %v951_v43 = vmul.f32 0.01, %v925_v36  ;;  %v963_v44 = vsel %vm937_vm11, %v924_v28, %v950_v37 }
 0x168   : > { %v964_v46 = vsel %vm938_vm12, %v925_v36, %v951_v43 }
 0x169   : > { %v906_v31 = vld [vmem:[#allocation2 + $0x60] sm:$0xff]  ;;  %v1287_v47 = vpack.c.bf16 %v964_v46, %v963_v44 }
 0x16a   : > { %v926_v41 = vadd.f32 %v1751_v56, %v906_v31 }
 0x16b   : > { %1293 = vst [vmem:[%s1805_s3 + $0x28] sm:$0xff] %v1287_v47  }
 0x16c   : > { %vm939_vm13 = vcmp.gt.f32.partialorder %v926_v41, 0.0  ;;  %v952_v45 = vmul.f32 0.01, %v926_v41 }
 0x16e   : > { %v965_v48 = vsel %vm939_vm13, %v926_v41, %v952_v45 }
 0x16f   : > { %v1258_v49 = vpack.c.bf16 %v965_v48, %v965_v48 }
 0x171   : > { %1031 = vst [vmem:[%s1805_s3 + $0x30] sm:$0xf] %v1258_v49 }
 0x172 PF: > { %s13_s16 = sadd.s32 1, %s1545_s16   ;;  %s1806_s12 = smov %s1533_s13 }
 0x173   : > { %p10_p12 = scmp.ge.s32.totalorder %s13_s16, 5   ;;  %s1807_s13 = smov %s1605_s20 }
 0x174   : > { %s1808_s14 = smov %s1541_s15  ;;  %s1809_s15 = smov %s1811_s17 }
 0x175   :  { %12 = sbr.rel (!%p10_p12) target bundleno = 3 (0x3), region = 113 }

// kernel: rnd_model_forward.8
= control target key start
LH: loop header
LB: loop body
LE: loop exit
PB: predicated region body
PF: predicated region fallthrough
CT: control target
= control target key end

     0   :  { %s1512_s12 = smov 0   ;;  %s1514_s13 = smov 0   ;;  %s1824_s0 = inlined_call_operand.vmem [shape: bf16[8,3584], index: 0, kind: input, shape index: {}]   ;;  %s1825_s1 = inlined_call_operand.vmem [shape: bf16[3584,512], index: 1, kind: input, shape index: {}]   ;;  %s1826_s2 = inlined_call_operand.vmem [shape: f32[1,512], index: 2, kind: input, shape index: {}]   ;;  %s1827_s3 = inlined_call_operand.vmem [shape: f32[8,512], index: 3, kind: output, shape index: {}]  }
   0x1   :  { %s1516_s14 = smov 0   ;;  %s1518_s15 = smov 0  }
   0x2   :  { %s1520_s16 = smov 0   ;;  %s1522_s17 = smov 0  }
   0x3   :  { %s1524_s18 = smov 0  }
   0x4 LB: > { %s25_s19 = sadd.s32 1, %s1481_s16  ;;  %s28_s20 = sadd.s32 1, %s1485_s17  ;;  %s1489_s18 = sphi %s1524_s18, %s13_s18   ;;  %s1485_s17 = sphi %s1522_s17, %s1833_s17   ;;  %s1481_s16 = sphi %s1520_s16, %s1832_s16   ;;  %s1477_s15 = sphi %s1518_s15, %s1831_s15   ;;  %s1473_s14 = sphi %s1516_s14, %s1830_s14   ;;  %s1469_s13 = sphi %s1514_s13, %s1829_s13   ;;  %s1465_s12 = sphi %s1512_s12, %s1828_s12  }
   0x5   : > { %p26_p0 = scmp.ge.s32.totalorder %s25_s19, 7  ;;  %p76_p1 = scmp.ne.s32.totalorder %s1469_s13, %s1465_s12 }
   0x6   : > { %p77_p2 = scmp.eq.s32.totalorder %s1489_s18, 0  ;;  %s69_s24 = sadd.s32 1, %s1469_s13 }
   0x7   : > { %s1835_s19 = smov (%p26_p0, %s25_s19), 0  ;;  %s1837_s20 = smov (!%p26_p0, %s28_s20), %s1485_s17 }
   0x8   : > { %p78_p3 = por %p77_p2, %p76_p1  ;;  %p30_p4 = scmp.ge.s32.totalorder %s1837_s20, 2 }
   0x9   : > { %s64_s21 = ssub.s32 %s1481_s16, %s1835_s19  ;;  %p1192_p6 = scmp.ge.s32.totalorder %s1489_s18, 14 }
   0xa   : > { %s1839_s20 = smov (%p30_p4, %s1837_s20), 0 }
   0xb   : > { %s65_s22 = ssub.s32 %s1485_s17, %s1839_s20  ;;  %156 = sbr.rel (%p1192_p6) target bundleno = 57 (0x39), region = 16 }
   0xc   : > { %s66_s23 = sor.u32 %s65_s22, %s64_s21 }
   0xd   : > { %p67_p5 = scmp.eq.s32.totalorder %s66_s23, 0 }
   0xf   : > { %s1563_s25 = scalar_select %p67_p5, %s1469_s13, %s69_s24  }
  0x12   : > { %172 = sbr.rel (!%p78_p3) target bundleno = 57 (0x39), region = 24  ;;  %s174_s26 = sand.u32 (%p78_p3), 1, %s1469_s13  }
  0x13   : > { %s1195_s27 = sshll.u32 (%p78_p3), %s1485_s17, 1  ;;  %s1193_s28 = sshll.u32 (%p78_p3), %s174_s26, 9 }
  0x14   : > { %s1277_s29 = sshll.u32 (%p78_p3), %s1481_s16, 8  ;;  %s1577_s8 = scalar_lea.vmem (%p78_p3), [#allocation3], %s1193_s28 }
  0x15   : > { %s180_s30 = sadd.s32 (%p78_p3), %s1277_s29, %s1195_s27 }
  0x16   : > { %s1197_s4 = sshll.u32 (%p78_p3), %s180_s30, 2 }
  0x17   : > { %s1572_s7 = scalar_lea.vmem (%p78_p3), %s1825_s1, %s1197_s4 }
  0x18   : > { %v336_v0 = vld [vmem:[%s1572_s7] sm:$0xff] (%p78_p3)  ;;  %v338_v1 = vld [vmem:[%s1572_s7 + $0x10] sm:$0xff] (%p78_p3) }
  0x19   : > { %v340_v2 = vld [vmem:[%s1572_s7 + $0x20] sm:$0xff]  ;;  %337 = vst [vmem:[%s1577_s8] sm:$0xff] %v336_v0  ;;  %339 = vst [vmem:[%s1577_s8 + $0x8] sm:$0xff] %v338_v1  ;;  %v342_v3 = vld [vmem:[%s1572_s7 + $0x30] sm:$0xff] }
  0x1a   : > { %341 = vst [vmem:[%s1577_s8 + $0x10] sm:$0xff] %v340_v2  ;;  %v344_v4 = vld [vmem:[%s1572_s7 + $0x40] sm:$0xff]  ;;  %v346_v5 = vld [vmem:[%s1572_s7 + $0x50] sm:$0xff]  ;;  %343 = vst [vmem:[%s1577_s8 + $0x18] sm:$0xff] %v342_v3 }
  0x1b   : > { %345 = vst [vmem:[%s1577_s8 + $0x20] sm:$0xff] %v344_v4  ;;  %347 = vst [vmem:[%s1577_s8 + $0x28] sm:$0xff] %v346_v5  ;;  %v348_v6 = vld [vmem:[%s1572_s7 + $0x60] sm:$0xff]  ;;  %v350_v7 = vld [vmem:[%s1572_s7 + $0x70] sm:$0xff] }
  0x1c   : > { %v352_v8 = vld [vmem:[%s1572_s7 + $0x80] sm:$0xff]  ;;  %349 = vst [vmem:[%s1577_s8 + $0x30] sm:$0xff] %v348_v6  ;;  %351 = vst [vmem:[%s1577_s8 + $0x38] sm:$0xff] %v350_v7  ;;  %v354_v9 = vld [vmem:[%s1572_s7 + $0x90] sm:$0xff] }
  0x1d   : > { %353 = vst [vmem:[%s1577_s8 + $0x40] sm:$0xff] %v352_v8  ;;  %v356_v10 = vld [vmem:[%s1572_s7 + $0xa0] sm:$0xff]  ;;  %v358_v11 = vld [vmem:[%s1572_s7 + $0xb0] sm:$0xff]  ;;  %355 = vst [vmem:[%s1577_s8 + $0x48] sm:$0xff] %v354_v9 }
  0x1e   : > { %357 = vst [vmem:[%s1577_s8 + $0x50] sm:$0xff] %v356_v10  ;;  %359 = vst [vmem:[%s1577_s8 + $0x58] sm:$0xff] %v358_v11  ;;  %v360_v12 = vld [vmem:[%s1572_s7 + $0xc0] sm:$0xff]  ;;  %v362_v13 = vld [vmem:[%s1572_s7 + $0xd0] sm:$0xff] }
  0x1f   : > { %v364_v14 = vld [vmem:[%s1572_s7 + $0xe0] sm:$0xff]  ;;  %361 = vst [vmem:[%s1577_s8 + $0x60] sm:$0xff] %v360_v12  ;;  %363 = vst [vmem:[%s1577_s8 + $0x68] sm:$0xff] %v362_v13  ;;  %v366_v15 = vld [vmem:[%s1572_s7 + $0xf0] sm:$0xff] }
  0x20   : > { %365 = vst [vmem:[%s1577_s8 + $0x70] sm:$0xff] %v364_v14  ;;  %v368_v16 = vld [vmem:[%s1572_s7 + $0x100] sm:$0xff]  ;;  %v370_v17 = vld [vmem:[%s1572_s7 + $0x110] sm:$0xff]  ;;  %367 = vst [vmem:[%s1577_s8 + $0x78] sm:$0xff] %v366_v15 }
  0x21   : > { %369 = vst [vmem:[%s1577_s8 + $0x80] sm:$0xff] %v368_v16  ;;  %371 = vst [vmem:[%s1577_s8 + $0x88] sm:$0xff] %v370_v17  ;;  %v372_v18 = vld [vmem:[%s1572_s7 + $0x120] sm:$0xff]  ;;  %v374_v19 = vld [vmem:[%s1572_s7 + $0x130] sm:$0xff] }
  0x22   : > { %v376_v20 = vld [vmem:[%s1572_s7 + $0x140] sm:$0xff]  ;;  %373 = vst [vmem:[%s1577_s8 + $0x90] sm:$0xff] %v372_v18  ;;  %375 = vst [vmem:[%s1577_s8 + $0x98] sm:$0xff] %v374_v19  ;;  %v378_v21 = vld [vmem:[%s1572_s7 + $0x150] sm:$0xff] }
  0x23   : > { %377 = vst [vmem:[%s1577_s8 + $0xa0] sm:$0xff] %v376_v20  ;;  %v380_v22 = vld [vmem:[%s1572_s7 + $0x160] sm:$0xff]  ;;  %v382_v23 = vld [vmem:[%s1572_s7 + $0x170] sm:$0xff]  ;;  %379 = vst [vmem:[%s1577_s8 + $0xa8] sm:$0xff] %v378_v21 }
  0x24   : > { %381 = vst [vmem:[%s1577_s8 + $0xb0] sm:$0xff] %v380_v22  ;;  %383 = vst [vmem:[%s1577_s8 + $0xb8] sm:$0xff] %v382_v23  ;;  %v384_v24 = vld [vmem:[%s1572_s7 + $0x180] sm:$0xff]  ;;  %v386_v25 = vld [vmem:[%s1572_s7 + $0x190] sm:$0xff] }
  0x25   : > { %v388_v26 = vld [vmem:[%s1572_s7 + $0x1a0] sm:$0xff]  ;;  %385 = vst [vmem:[%s1577_s8 + $0xc0] sm:$0xff] %v384_v24  ;;  %387 = vst [vmem:[%s1577_s8 + $0xc8] sm:$0xff] %v386_v25  ;;  %v390_v27 = vld [vmem:[%s1572_s7 + $0x1b0] sm:$0xff] }
  0x26   : > { %389 = vst [vmem:[%s1577_s8 + $0xd0] sm:$0xff] %v388_v26  ;;  %v392_v28 = vld [vmem:[%s1572_s7 + $0x1c0] sm:$0xff]  ;;  %v394_v29 = vld [vmem:[%s1572_s7 + $0x1d0] sm:$0xff]  ;;  %391 = vst [vmem:[%s1577_s8 + $0xd8] sm:$0xff] %v390_v27 }
  0x27   : > { %393 = vst [vmem:[%s1577_s8 + $0xe0] sm:$0xff] %v392_v28  ;;  %395 = vst [vmem:[%s1577_s8 + $0xe8] sm:$0xff] %v394_v29  ;;  %v396_v30 = vld [vmem:[%s1572_s7 + $0x1e0] sm:$0xff]  ;;  %v398_v31 = vld [vmem:[%s1572_s7 + $0x1f0] sm:$0xff] }
  0x28   : > { %v400_v32 = vld [vmem:[%s1572_s7 + $0x200] sm:$0xff]  ;;  %397 = vst [vmem:[%s1577_s8 + $0xf0] sm:$0xff] %v396_v30  ;;  %399 = vst [vmem:[%s1577_s8 + $0xf8] sm:$0xff] %v398_v31  ;;  %v402_v33 = vld [vmem:[%s1572_s7 + $0x210] sm:$0xff] }
  0x29   : > { %401 = vst [vmem:[%s1577_s8 + $0x100] sm:$0xff] %v400_v32  ;;  %v404_v34 = vld [vmem:[%s1572_s7 + $0x220] sm:$0xff]  ;;  %v406_v35 = vld [vmem:[%s1572_s7 + $0x230] sm:$0xff]  ;;  %403 = vst [vmem:[%s1577_s8 + $0x108] sm:$0xff] %v402_v33 }
  0x2a   : > { %405 = vst [vmem:[%s1577_s8 + $0x110] sm:$0xff] %v404_v34  ;;  %407 = vst [vmem:[%s1577_s8 + $0x118] sm:$0xff] %v406_v35  ;;  %v408_v36 = vld [vmem:[%s1572_s7 + $0x240] sm:$0xff]  ;;  %v410_v37 = vld [vmem:[%s1572_s7 + $0x250] sm:$0xff] }
  0x2b   : > { %v412_v38 = vld [vmem:[%s1572_s7 + $0x260] sm:$0xff]  ;;  %409 = vst [vmem:[%s1577_s8 + $0x120] sm:$0xff] %v408_v36  ;;  %411 = vst [vmem:[%s1577_s8 + $0x128] sm:$0xff] %v410_v37  ;;  %v414_v39 = vld [vmem:[%s1572_s7 + $0x270] sm:$0xff] }
  0x2c   : > { %413 = vst [vmem:[%s1577_s8 + $0x130] sm:$0xff] %v412_v38  ;;  %v416_v40 = vld [vmem:[%s1572_s7 + $0x280] sm:$0xff]  ;;  %v418_v41 = vld [vmem:[%s1572_s7 + $0x290] sm:$0xff]  ;;  %415 = vst [vmem:[%s1577_s8 + $0x138] sm:$0xff] %v414_v39 }
  0x2d   : > { %417 = vst [vmem:[%s1577_s8 + $0x140] sm:$0xff] %v416_v40  ;;  %419 = vst [vmem:[%s1577_s8 + $0x148] sm:$0xff] %v418_v41  ;;  %v420_v42 = vld [vmem:[%s1572_s7 + $0x2a0] sm:$0xff]  ;;  %v422_v43 = vld [vmem:[%s1572_s7 + $0x2b0] sm:$0xff] }
  0x2e   : > { %v424_v44 = vld [vmem:[%s1572_s7 + $0x2c0] sm:$0xff]  ;;  %421 = vst [vmem:[%s1577_s8 + $0x150] sm:$0xff] %v420_v42  ;;  %423 = vst [vmem:[%s1577_s8 + $0x158] sm:$0xff] %v422_v43  ;;  %v426_v45 = vld [vmem:[%s1572_s7 + $0x2d0] sm:$0xff] }
  0x2f   : > { %425 = vst [vmem:[%s1577_s8 + $0x160] sm:$0xff] %v424_v44  ;;  %v428_v46 = vld [vmem:[%s1572_s7 + $0x2e0] sm:$0xff]  ;;  %v430_v47 = vld [vmem:[%s1572_s7 + $0x2f0] sm:$0xff]  ;;  %427 = vst [vmem:[%s1577_s8 + $0x168] sm:$0xff] %v426_v45 }
  0x30   : > { %429 = vst [vmem:[%s1577_s8 + $0x170] sm:$0xff] %v428_v46  ;;  %431 = vst [vmem:[%s1577_s8 + $0x178] sm:$0xff] %v430_v47  ;;  %v432_v48 = vld [vmem:[%s1572_s7 + $0x300] sm:$0xff]  ;;  %v434_v49 = vld [vmem:[%s1572_s7 + $0x310] sm:$0xff] }
  0x31   : > { %v436_v50 = vld [vmem:[%s1572_s7 + $0x320] sm:$0xff]  ;;  %433 = vst [vmem:[%s1577_s8 + $0x180] sm:$0xff] %v432_v48  ;;  %435 = vst [vmem:[%s1577_s8 + $0x188] sm:$0xff] %v434_v49  ;;  %v438_v51 = vld [vmem:[%s1572_s7 + $0x330] sm:$0xff] }
  0x32   : > { %437 = vst [vmem:[%s1577_s8 + $0x190] sm:$0xff] %v436_v50  ;;  %v440_v52 = vld [vmem:[%s1572_s7 + $0x340] sm:$0xff]  ;;  %v442_v53 = vld [vmem:[%s1572_s7 + $0x350] sm:$0xff]  ;;  %439 = vst [vmem:[%s1577_s8 + $0x198] sm:$0xff] %v438_v51 }
  0x33   : > { %441 = vst [vmem:[%s1577_s8 + $0x1a0] sm:$0xff] %v440_v52  ;;  %443 = vst [vmem:[%s1577_s8 + $0x1a8] sm:$0xff] %v442_v53  ;;  %v444_v54 = vld [vmem:[%s1572_s7 + $0x360] sm:$0xff]  ;;  %v446_v55 = vld [vmem:[%s1572_s7 + $0x370] sm:$0xff] }
  0x34   : > { %v448_v56 = vld [vmem:[%s1572_s7 + $0x380] sm:$0xff]  ;;  %445 = vst [vmem:[%s1577_s8 + $0x1b0] sm:$0xff] %v444_v54  ;;  %447 = vst [vmem:[%s1577_s8 + $0x1b8] sm:$0xff] %v446_v55  ;;  %v450_v57 = vld [vmem:[%s1572_s7 + $0x390] sm:$0xff] }
  0x35   : > { %449 = vst [vmem:[%s1577_s8 + $0x1c0] sm:$0xff] %v448_v56  ;;  %v452_v58 = vld [vmem:[%s1572_s7 + $0x3a0] sm:$0xff]  ;;  %v454_v59 = vld [vmem:[%s1572_s7 + $0x3b0] sm:$0xff]  ;;  %451 = vst [vmem:[%s1577_s8 + $0x1c8] sm:$0xff] %v450_v57 }
  0x36   : > { %453 = vst [vmem:[%s1577_s8 + $0x1d0] sm:$0xff] %v452_v58  ;;  %455 = vst [vmem:[%s1577_s8 + $0x1d8] sm:$0xff] %v454_v59  ;;  %v456_v60 = vld [vmem:[%s1572_s7 + $0x3c0] sm:$0xff]  ;;  %v458_v61 = vld [vmem:[%s1572_s7 + $0x3d0] sm:$0xff] }
  0x37   : > { %v460_v62 = vld [vmem:[%s1572_s7 + $0x3e0] sm:$0xff]  ;;  %457 = vst [vmem:[%s1577_s8 + $0x1e0] sm:$0xff] %v456_v60  ;;  %459 = vst [vmem:[%s1577_s8 + $0x1e8] sm:$0xff] %v458_v61  ;;  %v462_v63 = vld [vmem:[%s1572_s7 + $0x3f0] sm:$0xff] }
  0x38   : > { %461 = vst [vmem:[%s1577_s8 + $0x1f0] sm:$0xff] %v460_v62  ;;  %463 = vst [vmem:[%s1577_s8 + $0x1f8] sm:$0xff] %v462_v63 }
  0x39 PF: > { %p1198_p7 = scmp.ge.s32.totalorder %s1489_s18, 1  ;;  %p476_p8 = scmp.lt.s32.totalorder %s1489_s18, 15 }
  0x3b   : > { %p477_p9 = pnand %p1198_p7, %p476_p8 }
  0x3c   : > { %s483_s9 = sand.u32 (!%p477_p9), 1, %s1465_s12   ;;  %s1200_s10 = sshll.u32 (!%p477_p9), %s1473_s14, 2 }
  0x3d   : > { %480 = sbr.rel (%p477_p9) target bundleno = 372 (0x174), region = 66  ;;  %s1199_s11 = sshll.u32 (!%p477_p9), %s483_s9, 9 }
  0x3e   : > { %p526_p10 = scmp.lt.s32.totalorder (!%p477_p9), %s1200_s10, 27  ;;  %s1202_s21 = sshll.u32 (!%p477_p9), %s1477_s15, 1 }
  0x3f   : > { %p536_p11 = scmp.lt.s32.totalorder (!%p477_p9), %s1202_s21, 3  ;;  %s1726_s5 = scalar_lea.vmem (!%p477_p9), [#allocation3], %s1199_s11 }
  0x40   : > { %p1205_p12 = scmp.ne.s32.totalorder (!%p477_p9), %s1473_s14, 0 }
  0x44   : > { %s1841_s10 = smov (!%p526_p10, %s1200_s10), 27  ;;  %s1843_s21 = smov (!%p536_p11, %s1202_s21), 3 }
  0x45   : > { %s1201_s22 = sshll.u32 %s1841_s10, 2  ;;  %s538_s12 = scalar_lea.vmem %s1826_s2, %s1843_s21  ;;  %v1491_v0 = vmov (!%p1205_p12), 0.0  }
  0x46   : > { %s1712_s26 = scalar_lea.vmem %s1824_s0, %s1201_s22  ;;  %s1204_s29 = sshll.u32 %s1843_s21, 3  ;;  %554 = vst [vmem:[#allocation2] sm:$0xff] (!%p1205_p12), %v1491_v0  ;;  %555 = vst [vmem:[#allocation2 + $0x8] sm:$0xff] (!%p1205_p12), %v1491_v0 }
  0x47   : > { %s1724_s15 = scalar_lea.vmem %s1827_s3, %s1204_s29  ;;  %553 = sbr.rel (%p1205_p12) target bundleno = 78 (0x4e), region = 74 }
  0x4e PF: > { %v1335_v1 = vld [vmem:[%s1726_s5 + $0x4] ss:$8 sps:$4 sm:$0xff]   ;;  %v1339_v3 = vld [vmem:[%s1726_s5] ss:$8 sps:$4 sm:$0xff]   ;;  %v1341_v5 = vld [vmem:[%s1726_s5 + $0x14] ss:$8 sps:$4 sm:$0xff]  }
  0x4f   : > { %v1337_v2 = vld [vmem:[%s1726_s5 + $0x104] ss:$8 sps:$4 sm:$0xff]   ;;  %958 = vmatprep.subr.bf16.mxu0 %v1335_v1  ;;  %v1340_v4 = vld [vmem:[%s1726_s5 + $0x100] ss:$8 sps:$4 sm:$0xff]   ;;  %v1343_v6 = vld [vmem:[%s1726_s5 + $0x114] ss:$8 sps:$4 sm:$0xff]  }
  0x50   : > { %999 = vmatprep.subr.bf16.mxu1 %v1337_v2  ;;  %959 = vmatpush1.bf16.msra.mxu0 %v1339_v3  ;;  %v1345_v7 = vld [vmem:[%s1726_s5 + $0x10] ss:$8 sps:$4 sm:$0xff]   ;;  %v1347_v9 = vld [vmem:[%s1726_s5 + $0x24] ss:$8 sps:$4 sm:$0xff]   ;;  %v1351_v11 = vld [vmem:[%s1726_s5 + $0x20] ss:$8 sps:$4 sm:$0xff]  }
  0x51   : > { %1000 = vmatpush1.bf16.msra.mxu1 %v1340_v4  ;;  %960 = vmatprep.subr.bf16.mxu0 %v1341_v5  ;;  %v1346_v8 = vld [vmem:[%s1726_s5 + $0x110] ss:$8 sps:$4 sm:$0xff]   ;;  %v1349_v10 = vld [vmem:[%s1726_s5 + $0x124] ss:$8 sps:$4 sm:$0xff]   ;;  %v1352_v12 = vld [vmem:[%s1726_s5 + $0x120] ss:$8 sps:$4 sm:$0xff]  }
  0x52   : > { %1001 = vmatprep.subr.bf16.mxu1 %v1343_v6  ;;  %v1353_v13 = vld [vmem:[%s1726_s5 + $0x34] ss:$8 sps:$4 sm:$0xff]   ;;  %v1357_v15 = vld [vmem:[%s1726_s5 + $0x30] ss:$8 sps:$4 sm:$0xff]   ;;  %v1359_v17 = vld [vmem:[%s1726_s5 + $0x44] ss:$8 sps:$4 sm:$0xff]  }
  0x53   : > { %v1355_v14 = vld [vmem:[%s1726_s5 + $0x134] ss:$8 sps:$4 sm:$0xff]   ;;  %v1358_v16 = vld [vmem:[%s1726_s5 + $0x130] ss:$8 sps:$4 sm:$0xff]   ;;  %v1361_v18 = vld [vmem:[%s1726_s5 + $0x144] ss:$8 sps:$4 sm:$0xff]  }
  0x54   : > { %961 = vmatpush1.bf16.msra.mxu0 %v1345_v7  ;;  %v1363_v19 = vld [vmem:[%s1726_s5 + $0x40] ss:$8 sps:$4 sm:$0xff]   ;;  %v1365_v21 = vld [vmem:[%s1726_s5 + $0x54] ss:$8 sps:$4 sm:$0xff]   ;;  %v1369_v23 = vld [vmem:[%s1726_s5 + $0x50] ss:$8 sps:$4 sm:$0xff]  }
  0x55   : > { %1002 = vmatpush1.bf16.msra.mxu1 %v1346_v8  ;;  %962 = vmatprep.subr.bf16.mxu0 %v1347_v9  ;;  %v1364_v20 = vld [vmem:[%s1726_s5 + $0x140] ss:$8 sps:$4 sm:$0xff]   ;;  %v1367_v22 = vld [vmem:[%s1726_s5 + $0x154] ss:$8 sps:$4 sm:$0xff]   ;;  %v1370_v24 = vld [vmem:[%s1726_s5 + $0x150] ss:$8 sps:$4 sm:$0xff]  }
  0x56   : > { %1003 = vmatprep.subr.bf16.mxu1 %v1349_v10  ;;  %v1371_v25 = vld [vmem:[%s1726_s5 + $0x64] ss:$8 sps:$4 sm:$0xff]   ;;  %v1375_v27 = vld [vmem:[%s1726_s5 + $0x60] ss:$8 sps:$4 sm:$0xff]   ;;  %v1377_v29 = vld [vmem:[%s1726_s5 + $0x74] ss:$8 sps:$4 sm:$0xff]  }
  0x57   : > { %v1373_v26 = vld [vmem:[%s1726_s5 + $0x164] ss:$8 sps:$4 sm:$0xff]   ;;  %v1376_v28 = vld [vmem:[%s1726_s5 + $0x160] ss:$8 sps:$4 sm:$0xff]   ;;  %v1379_v30 = vld [vmem:[%s1726_s5 + $0x174] ss:$8 sps:$4 sm:$0xff]  }
  0x58   : > { %963 = vmatpush1.bf16.msra.mxu0 %v1351_v11  ;;  %v1381_v31 = vld [vmem:[%s1726_s5 + $0x70] ss:$8 sps:$4 sm:$0xff]   ;;  %v1383_v33 = vld [vmem:[%s1726_s5 + $0x84] ss:$8 sps:$4 sm:$0xff]   ;;  %v1387_v35 = vld [vmem:[%s1726_s5 + $0x80] ss:$8 sps:$4 sm:$0xff]  }
  0x59   : > { %1004 = vmatpush1.bf16.msra.mxu1 %v1352_v12  ;;  %964 = vmatprep.subr.bf16.mxu0 %v1353_v13  ;;  %v1382_v32 = vld [vmem:[%s1726_s5 + $0x170] ss:$8 sps:$4 sm:$0xff]   ;;  %v1385_v34 = vld [vmem:[%s1726_s5 + $0x184] ss:$8 sps:$4 sm:$0xff]   ;;  %v1388_v36 = vld [vmem:[%s1726_s5 + $0x180] ss:$8 sps:$4 sm:$0xff]  }
  0x5a   : > { %1005 = vmatprep.subr.bf16.mxu1 %v1355_v14  ;;  %v1389_v37 = vld [vmem:[%s1726_s5 + $0x94] ss:$8 sps:$4 sm:$0xff]   ;;  %v1393_v39 = vld [vmem:[%s1726_s5 + $0x90] ss:$8 sps:$4 sm:$0xff]   ;;  %v1395_v41 = vld [vmem:[%s1726_s5 + $0xa4] ss:$8 sps:$4 sm:$0xff]  }
  0x5b   : > { %v1391_v38 = vld [vmem:[%s1726_s5 + $0x194] ss:$8 sps:$4 sm:$0xff]   ;;  %v1394_v40 = vld [vmem:[%s1726_s5 + $0x190] ss:$8 sps:$4 sm:$0xff]   ;;  %v1397_v42 = vld [vmem:[%s1726_s5 + $0x1a4] ss:$8 sps:$4 sm:$0xff]  }
  0x5c   : > { %965 = vmatpush1.bf16.msra.mxu0 %v1357_v15  ;;  %v1399_v43 = vld [vmem:[%s1726_s5 + $0xa0] ss:$8 sps:$4 sm:$0xff]   ;;  %v1401_v45 = vld [vmem:[%s1726_s5 + $0xb4] ss:$8 sps:$4 sm:$0xff]   ;;  %v1405_v50 = vld [vmem:[%s1726_s5 + $0xb0] ss:$8 sps:$4 sm:$0xff]  }
  0x5d   : > { %1006 = vmatpush1.bf16.msra.mxu1 %v1358_v16  ;;  %966 = vmatprep.subr.bf16.mxu0 %v1359_v17  ;;  %v1400_v44 = vld [vmem:[%s1726_s5 + $0x1a0] ss:$8 sps:$4 sm:$0xff]   ;;  %v1403_v46 = vld [vmem:[%s1726_s5 + $0x1b4] ss:$8 sps:$4 sm:$0xff]   ;;  %v1406_v51 = vld [vmem:[%s1726_s5 + $0x1b0] ss:$8 sps:$4 sm:$0xff]  }
  0x5e   : > { %1007 = vmatprep.subr.bf16.mxu1 %v1361_v18  ;;  %v558_v47 = vld [vmem:[%s1712_s26] sm:$0xff]  ;;  %v559_v49 = vld [vmem:[%s1712_s26 + $0x8] sm:$0xff]  ;;  %v1407_v53 = vld [vmem:[%s1726_s5 + $0xc4] ss:$8 sps:$4 sm:$0xff]   ;;  %p1274_p13 = scmp.ne.s32.totalorder %s1473_s14, 6 }
  0x5f   : > { %v1207_v48 = vcombine.high %v558_v47, %v558_v47  ;;  %v1209_v52 = vcombine.high %v559_v49, %v559_v49  ;;  %v1409_v54 = vld [vmem:[%s1726_s5 + $0x1c4] ss:$8 sps:$4 sm:$0xff]   ;;  %v1411_v55 = vld [vmem:[%s1726_s5 + $0xc0] ss:$8 sps:$4 sm:$0xff]   ;;  %v1413_v57 = vld [vmem:[%s1726_s5 + $0xd4] ss:$8 sps:$4 sm:$0xff]   ;;  %v1206_v5 = vcombine.low %v558_v47, %v558_v47  ;;  %v1208_v6 = vcombine.low %v559_v49, %v559_v49 }
  0x60   : > { %967 = vmatpush1.bf16.msra.mxu0 %v1363_v19  ;;  %v1412_v56 = vld [vmem:[%s1726_s5 + $0x1c0] ss:$8 sps:$4 sm:$0xff]   ;;  %v1415_v58 = vld [vmem:[%s1726_s5 + $0x1d4] ss:$8 sps:$4 sm:$0xff]   ;;  %v1417_v59 = vld [vmem:[%s1726_s5 + $0xd0] ss:$8 sps:$4 sm:$0xff]  }
  0x61   : > { %1008 = vmatpush1.bf16.msra.mxu1 %v1364_v20  ;;  %968 = vmatprep.subr.bf16.mxu0 %v1365_v21  ;;  %v1418_v60 = vld [vmem:[%s1726_s5 + $0x1d0] ss:$8 sps:$4 sm:$0xff]   ;;  %v1419_v61 = vld [vmem:[%s1726_s5 + $0xe4] ss:$8 sps:$4 sm:$0xff]   ;;  %v1423_v63 = vld [vmem:[%s1726_s5 + $0xe0] ss:$8 sps:$4 sm:$0xff]   ;;  %v1052_v21 = vlaneseq (!%p1274_p13) }
  0x62   : > { %1009 = vmatprep.subr.bf16.mxu1 %v1367_v22  ;;  %990 = vmatprep.mubr.bf16.mxu0 %v1207_v48  ;;  %v1421_v62 = vld [vmem:[%s1726_s5 + $0x1e4] ss:$8 sps:$4 sm:$0xff]   ;;  %v1424_v0 = vld [vmem:[%s1726_s5 + $0x1e0] ss:$8 sps:$4 sm:$0xff]   ;;  %v1425_v1 = vld [vmem:[%s1726_s5 + $0xf4] ss:$8 sps:$4 sm:$0xff]  }
  0x63   : > { %1031 = vmatprep.mubr.bf16.mxu1 %v1209_v52  ;;  %v1427_v2 = vld [vmem:[%s1726_s5 + $0x1f4] ss:$8 sps:$4 sm:$0xff]   ;;  %v1429_v3 = vld [vmem:[%s1726_s5 + $0xf0] ss:$8 sps:$4 sm:$0xff]   ;;  %v1053_v22 = vshrl.u32 (!%p1274_p13), %v1052_v21, 7 }
  0x64   : > { %969 = vmatpush1.bf16.msra.mxu0 %v1369_v23  ;;  %v1430_v4 = vld [vmem:[%s1726_s5 + $0x1f0] ss:$8 sps:$4 sm:$0xff]  }
  0x65   : > { %1010 = vmatpush1.bf16.msra.mxu1 %v1370_v24  ;;  %970 = vmatprep.subr.bf16.mxu0 %v1371_v25  ;;  %v556_v8 = vld [vmem:[#allocation2] sm:$0xff]  ;;  %v557_v12 = vld [vmem:[#allocation2 + $0x8] sm:$0xff]  ;;  %v1054_v24 = vsub.s32 (!%p1274_p13), 0, %v1053_v22  ;;  %v1058_v25 = vsub.s32 (!%p1274_p13), 1, %v1053_v22 }
  0x66   : > { %1011 = vmatprep.subr.bf16.mxu1 %v1373_v26  ;;  %v1050_v23 = vld [vmem:[%s538_s12] sm:$0x3] (!%p1274_p13) }
  0x68   : > { %971 = vmatpush1.bf16.msra.mxu0 %v1375_v27 }
  0x69   : > { %1012 = vmatpush1.bf16.msra.mxu1 %v1376_v28  ;;  %972 = vmatprep.subr.bf16.mxu0 %v1377_v29  ;;  %v1055_v28 = vrot.slane (!%p1274_p13), %v1050_v23, %v1054_v24  ;;  %v1059_v29 = vrot.slane (!%p1274_p13), %v1050_v23, %v1058_v25 }
  0x6a   : > { %1013 = vmatprep.subr.bf16.mxu1 %v1379_v30 }
  0x6c   : > { %973 = vmatpush1.bf16.msra.mxu0 %v1381_v31 }
  0x6d   : > { %1014 = vmatpush1.bf16.msra.mxu1 %v1382_v32  ;;  %974 = vmatprep.subr.bf16.mxu0 %v1383_v33 }
  0x6e   : > { %1015 = vmatprep.subr.bf16.mxu1 %v1385_v34 }
  0x70   : > { %975 = vmatpush1.bf16.msra.mxu0 %v1387_v35 }
  0x71   : > { %1016 = vmatpush1.bf16.msra.mxu1 %v1388_v36  ;;  %976 = vmatprep.subr.bf16.mxu0 %v1389_v37 }
  0x72   : > { %1017 = vmatprep.subr.bf16.mxu1 %v1391_v38 }
  0x74   : > { %977 = vmatpush1.bf16.msra.mxu0 %v1393_v39 }
  0x75   : > { %1018 = vmatpush1.bf16.msra.mxu1 %v1394_v40  ;;  %978 = vmatprep.subr.bf16.mxu0 %v1395_v41 }
  0x76   : > { %1019 = vmatprep.subr.bf16.mxu1 %v1397_v42 }
  0x78   : > { %979 = vmatpush1.bf16.msra.mxu0 %v1399_v43 }
  0x79   : > { %1020 = vmatpush1.bf16.msra.mxu1 %v1400_v44  ;;  %980 = vmatprep.subr.bf16.mxu0 %v1401_v45 }
  0x7a   : > { %1021 = vmatprep.subr.bf16.mxu1 %v1403_v46 }
  0x7c   : > { %981 = vmatpush1.bf16.msra.mxu0 %v1405_v50 }
  0x7d   : > { %1022 = vmatpush1.bf16.msra.mxu1 %v1406_v51  ;;  %982 = vmatprep.subr.bf16.mxu0 %v1407_v53 }
  0x7e   : > { %1023 = vmatprep.subr.bf16.mxu1 %v1409_v54 }
  0x80   : > { %983 = vmatpush1.bf16.msra.mxu0 %v1411_v55 }
  0x81   : > { %1024 = vmatpush1.bf16.msra.mxu1 %v1412_v56  ;;  %984 = vmatprep.subr.bf16.mxu0 %v1413_v57 }
  0x82   : > { %1025 = vmatprep.subr.bf16.mxu1 %v1415_v58 }
  0x84   : > { %985 = vmatpush1.bf16.msra.mxu0 %v1417_v59 }
  0x85   : > { %1026 = vmatpush1.bf16.msra.mxu1 %v1418_v60  ;;  %986 = vmatprep.subr.bf16.mxu0 %v1419_v61 }
  0x86   : > { %1027 = vmatprep.subr.bf16.mxu1 %v1421_v62 }
  0x88   : > { %987 = vmatpush1.bf16.msra.mxu0 %v1423_v63 }
  0x89   : > { %1028 = vmatpush1.bf16.msra.mxu1 %v1424_v0  ;;  %988 = vmatprep.subr.bf16.mxu0 %v1425_v1 }
  0x8a   : > { %1029 = vmatprep.subr.bf16.mxu1 %v1427_v2 }
  0x8c   : > { %989 = vmatpush1.bf16.msra.mxu0 %v1429_v3 }
  0x8d   : > { %1030 = vmatpush1.bf16.msra.mxu1 %v1430_v4 }
  0x8f   : > { %991 = vmatmul.mubr.bf16.vlgmr.msra.gmra.mrb[0].mxu0 %v1206_v5 }
  0x90   : > { %1032 = vmatmul.mubr.bf16.vlgmr.msra.gmra.mrb[0].mxu1 %v1208_v6 }
 0x162   : > { %v992_v7 = vpop.f32.mrb[0].mxu0 }
 0x163   : > { %v1033_v9 = vpop.f32.mrb[0].mxu1  ;;  %v994_v11 = vpop.f32.mrb[1].mxu0  ;;  %1047 = sbr.rel (%p1274_p13) target bundleno = 372 (0x174), region = 78 }
 0x164   : > { %v1034_v10 = vadd.f32 %v1033_v9, %v992_v7  ;;  %v1035_v13 = vpop.f32.mrb[1].mxu1  ;;  %v996_v15 = vpop.f32.mrb[2].mxu0 }
 0x165   : > { %v1036_v14 = vadd.f32 %v1035_v13, %v994_v11  ;;  %v1037_v16 = vpop.f32.mrb[2].mxu1  ;;  %v997_v18 = vpop.f32.mrb[3].mxu0 }
 0x166   : > { %v1040_v17 = vadd.f32 %v1034_v10, %v556_v8  ;;  %v1038_v19 = vpop.f32.mrb[3].mxu1 }
 0x167   : > { %v1041_v20 = vadd.f32 %v1036_v14, %v557_v12 }
 0x168   : > { %1042 = vst [vmem:[#allocation2] sm:$0xff] %v1040_v17 }
 0x169   : > { %1043 = vst [vmem:[#allocation2 + $0x8] sm:$0xff] %v1041_v20 }
 0x16f   : > { %v1048_v26 = vld [vmem:[#allocation2] sm:$0xff] }
 0x170   : > { %v1049_v27 = vld [vmem:[#allocation2 + $0x8] sm:$0xff]  ;;  %v1062_v30 = vadd.f32 %v1055_v28, %v1048_v26 }
 0x171   : > { %v1063_v31 = vadd.f32 %v1059_v29, %v1049_v27 }
 0x172   : > { %1064 = vst [vmem:[%s1724_s15] sm:$0xff] %v1062_v30 }
 0x173   : > { %1065 = vst [vmem:[%s1724_s15 + $0x8] sm:$0xff] %v1063_v31 }
 0x174 PF: > { %s13_s18 = sadd.s32 1, %s1489_s18   ;;  %s1828_s12 = smov %s1469_s13 }
 0x175   : > { %p10_p0 = scmp.ge.s32.totalorder %s13_s18, 16   ;;  %s1829_s13 = smov %s1563_s25 }
 0x176   : > { %s1830_s14 = smov %s1481_s16  ;;  %s1831_s15 = smov %s1485_s17 }
 0x177   : > { %s1832_s16 = smov %s1835_s19  ;;  %s1833_s17 = smov %s1839_s20 }
 0x178   :  { %12 = sbr.rel (!%p10_p0) target bundleno = 4 (0x4), region = 119 }

// kernel: rnd_model_forward.9
= control target key start
LH: loop header
LB: loop body
LE: loop exit
PB: predicated region body
PF: predicated region fallthrough
CT: control target
= control target key end

     0   :  { %s4438_s24 = smov 0   ;;  %s4440_s25 = smov 0   ;;  %s5453_s0 = inlined_call_operand.vmem [shape: bf16[8,3584], index: 0, kind: input, shape index: {}]   ;;  %s5454_s1 = inlined_call_operand.vmem [shape: bf16[3584,512], index: 1, kind: input, shape index: {}]   ;;  %s5455_s2 = inlined_call_operand.vmem [shape: f32[1,512], index: 2, kind: input, shape index: {}]   ;;  %s5456_s3 = inlined_call_operand.vmem [shape: bf16[512,512], index: 3, kind: input, shape index: {}]   ;;  %s5457_s4 = inlined_call_operand.vmem [shape: f32[1,512], index: 4, kind: input, shape index: {}]   ;;  %s5458_s5 = inlined_call_operand.vmem [shape: bf16[512,512], index: 5, kind: input, shape index: {}]   ;;  %s5459_s6 = inlined_call_operand.vmem [shape: f32[1,512], index: 6, kind: input, shape index: {}]   ;;  %s5460_s7 = inlined_call_operand.vmem [shape: f32[8,512], index: 7, kind: output, shape index: {}]  }
   0x1   :  { %s4442_s26 = smov 0  }
   0x2 LB: > { %s26_s27 = sadd.s32 1, %s4391_s25  ;;  %p3344_p0 = scmp.ge.s32.totalorder %s4395_s26, 1  ;;  %s4395_s26 = sphi %s4442_s26, %s17_s26   ;;  %s4391_s25 = sphi %s4440_s25, %s5462_s25   ;;  %s4387_s24 = sphi %s4438_s24, %s5461_s24  }
   0x3   : > { %p27_p1 = scmp.ge.s32.totalorder %s26_s27, 7  ;;  %p268_p2 = scmp.lt.s32.totalorder %s4395_s26, 8 }
   0x5   : > { %s5464_s27 = smov (%p27_p1, %s26_s27), 0  ;;  %p269_p3 = pnand %p3344_p0, %p268_p2 }
   0x6   : > { %s3345_s28 = sshll.u32 (!%p269_p3), %s4387_s24, 2  ;;  %s3347_s29 = sshll.u32 (!%p269_p3), %s4387_s24, 6 }
   0x7   : > { %272 = sbr.rel (%p269_p3) target bundleno = 952 (0x3b8), region = 48  ;;  %p313_p4 = scmp.lt.s32.totalorder (!%p269_p3), %s3345_s28, 27 }
   0x8   : > { %p321_p5 = scmp.lt.s32.totalorder (!%p269_p3), %s3347_s29, 447  ;;  %p3350_p6 = scmp.ne.s32.totalorder (!%p269_p3), %s4387_s24, 0 }
   0xe   : > { %s5466_s28 = smov (!%p313_p4, %s3345_s28), 27  ;;  %s5468_s29 = smov (!%p321_p5, %s3347_s29), 447 }
   0xf   : > { %s3346_s30 = sshll.u32 %s5466_s28, 2  ;;  %s3743_s11 = sshll.u32 %s5468_s29, 4  ;;  %v4397_v0 = vmov (!%p3350_p6), 0.0  }
  0x10   : > { %s4463_s10 = scalar_lea.vmem %s5453_s0, %s3346_s30  ;;  %s4468_s14 = scalar_lea.vmem %s5454_s1, %s3743_s11  ;;  %336 = vst [vmem:[#allocation2] sm:$0xff] (!%p3350_p6), %v4397_v0  ;;  %337 = vst [vmem:[#allocation2 + $0x8] sm:$0xff] (!%p3350_p6), %v4397_v0 }
  0x11   : > { %335 = sbr.rel (%p3350_p6) target bundleno = 24 (0x18), region = 52  ;;  %338 = vst [vmem:[#allocation2 + $0x10] sm:$0xff] (!%p3350_p6), %v4397_v0  ;;  %339 = vst [vmem:[#allocation2 + $0x18] sm:$0xff] (!%p3350_p6), %v4397_v0 }
  0x18 PF: > { %v3793_v1 = vld [vmem:[%s4468_s14 + $0x4] ss:$16 sps:$4 sm:$0xff]   ;;  %v3797_v3 = vld [vmem:[%s4468_s14] ss:$16 sps:$4 sm:$0xff]   ;;  %v345_v49 = vld [vmem:[%s4463_s10 + $0x8] sm:$0xff]  ;;  %p3483_p7 = scmp.ne.s32.totalorder %s4387_s24, 6 }
  0x19   : > { %v3795_v2 = vld [vmem:[%s4468_s14 + $0x204] ss:$16 sps:$4 sm:$0xff]   ;;  %1128 = vmatprep.subr.bf16.mxu0 %v3793_v1  ;;  %v3798_v4 = vld [vmem:[%s4468_s14 + $0x200] ss:$16 sps:$4 sm:$0xff]   ;;  %v3354_v52 = vcombine.high %v345_v49, %v345_v49 }
  0x1a   : > { %1169 = vmatprep.subr.bf16.mxu1 %v3795_v2  ;;  %v3799_v5 = vld [vmem:[%s4468_s14 + $0x24] ss:$16 sps:$4 sm:$0xff]   ;;  %1129 = vmatpush1.bf16.msra.mxu0 %v3797_v3  ;;  %v3803_v7 = vld [vmem:[%s4468_s14 + $0x20] ss:$16 sps:$4 sm:$0xff]  }
  0x1b   : > { %1170 = vmatpush1.bf16.msra.mxu1 %v3798_v4  ;;  %v3801_v6 = vld [vmem:[%s4468_s14 + $0x224] ss:$16 sps:$4 sm:$0xff]   ;;  %1130 = vmatprep.subr.bf16.mxu0 %v3799_v5  ;;  %v3804_v8 = vld [vmem:[%s4468_s14 + $0x220] ss:$16 sps:$4 sm:$0xff]   ;;  %v3895_v5 = vld [vmem:[%s4468_s14 + $0xc] ss:$16 sps:$4 sm:$0xff]  }
  0x1c   : > { %1171 = vmatprep.subr.bf16.mxu1 %v3801_v6  ;;  %v3805_v9 = vld [vmem:[%s4468_s14 + $0x44] ss:$16 sps:$4 sm:$0xff]   ;;  %v3809_v11 = vld [vmem:[%s4468_s14 + $0x40] ss:$16 sps:$4 sm:$0xff]   ;;  %1201 = vmatprep.mubr.bf16.mxu1 %v3354_v52  ;;  %v3898_v6 = vld [vmem:[%s4468_s14 + $0x20c] ss:$16 sps:$4 sm:$0xff]  }
  0x1d   : > { %v3807_v10 = vld [vmem:[%s4468_s14 + $0x244] ss:$16 sps:$4 sm:$0xff]   ;;  %v3810_v12 = vld [vmem:[%s4468_s14 + $0x240] ss:$16 sps:$4 sm:$0xff]  }
  0x1e   : > { %1131 = vmatpush1.bf16.msra.mxu0 %v3803_v7  ;;  %v3811_v13 = vld [vmem:[%s4468_s14 + $0x64] ss:$16 sps:$4 sm:$0xff]   ;;  %v3815_v15 = vld [vmem:[%s4468_s14 + $0x60] ss:$16 sps:$4 sm:$0xff]  }
  0x1f   : > { %1172 = vmatpush1.bf16.msra.mxu1 %v3804_v8  ;;  %1132 = vmatprep.subr.bf16.mxu0 %v3805_v9  ;;  %v3813_v14 = vld [vmem:[%s4468_s14 + $0x264] ss:$16 sps:$4 sm:$0xff]   ;;  %v3816_v16 = vld [vmem:[%s4468_s14 + $0x260] ss:$16 sps:$4 sm:$0xff]   ;;  %v4544_v8 = vcombine.low %v345_v49, %v345_v49  ;;  %v3893_v9 = vld [vmem:[%s4468_s14 + $0x8] ss:$16 sps:$4 sm:$0xff]  }
  0x20   : > { %1173 = vmatprep.subr.bf16.mxu1 %v3807_v10  ;;  %v3817_v17 = vld [vmem:[%s4468_s14 + $0x84] ss:$16 sps:$4 sm:$0xff]   ;;  %v3821_v19 = vld [vmem:[%s4468_s14 + $0x80] ss:$16 sps:$4 sm:$0xff]   ;;  %v3896_v10 = vld [vmem:[%s4468_s14 + $0x208] ss:$16 sps:$4 sm:$0xff]  }
  0x21   : > { %v3819_v18 = vld [vmem:[%s4468_s14 + $0x284] ss:$16 sps:$4 sm:$0xff]   ;;  %v3822_v20 = vld [vmem:[%s4468_s14 + $0x280] ss:$16 sps:$4 sm:$0xff]   ;;  %v3953_v49 = vld [vmem:[%s4468_s14 + $0x148] ss:$16 sps:$4 sm:$0xff]  }
  0x22   : > { %1133 = vmatpush1.bf16.msra.mxu0 %v3809_v11  ;;  %v3823_v21 = vld [vmem:[%s4468_s14 + $0xa4] ss:$16 sps:$4 sm:$0xff]   ;;  %v3827_v23 = vld [vmem:[%s4468_s14 + $0xa0] ss:$16 sps:$4 sm:$0xff]   ;;  %v3901_v11 = vld [vmem:[%s4468_s14 + $0x2c] ss:$16 sps:$4 sm:$0xff]  }
  0x23   : > { %1174 = vmatpush1.bf16.msra.mxu1 %v3810_v12  ;;  %1134 = vmatprep.subr.bf16.mxu0 %v3811_v13  ;;  %v3825_v22 = vld [vmem:[%s4468_s14 + $0x2a4] ss:$16 sps:$4 sm:$0xff]   ;;  %v3828_v24 = vld [vmem:[%s4468_s14 + $0x2a0] ss:$16 sps:$4 sm:$0xff]   ;;  %v3904_v12 = vld [vmem:[%s4468_s14 + $0x22c] ss:$16 sps:$4 sm:$0xff]  }
  0x24   : > { %1175 = vmatprep.subr.bf16.mxu1 %v3813_v14  ;;  %v3829_v25 = vld [vmem:[%s4468_s14 + $0xc4] ss:$16 sps:$4 sm:$0xff]   ;;  %v3833_v27 = vld [vmem:[%s4468_s14 + $0xc0] ss:$16 sps:$4 sm:$0xff]   ;;  %v3899_v13 = vld [vmem:[%s4468_s14 + $0x28] ss:$16 sps:$4 sm:$0xff]  }
  0x25   : > { %v3831_v26 = vld [vmem:[%s4468_s14 + $0x2c4] ss:$16 sps:$4 sm:$0xff]   ;;  %v3834_v28 = vld [vmem:[%s4468_s14 + $0x2c0] ss:$16 sps:$4 sm:$0xff]   ;;  %v3902_v14 = vld [vmem:[%s4468_s14 + $0x228] ss:$16 sps:$4 sm:$0xff]  }
  0x26   : > { %1135 = vmatpush1.bf16.msra.mxu0 %v3815_v15  ;;  %v3835_v29 = vld [vmem:[%s4468_s14 + $0xe4] ss:$16 sps:$4 sm:$0xff]   ;;  %v3839_v31 = vld [vmem:[%s4468_s14 + $0xe0] ss:$16 sps:$4 sm:$0xff]   ;;  %v3907_v15 = vld [vmem:[%s4468_s14 + $0x4c] ss:$16 sps:$4 sm:$0xff]  }
  0x27   : > { %1176 = vmatpush1.bf16.msra.mxu1 %v3816_v16  ;;  %1136 = vmatprep.subr.bf16.mxu0 %v3817_v17  ;;  %v3837_v30 = vld [vmem:[%s4468_s14 + $0x2e4] ss:$16 sps:$4 sm:$0xff]   ;;  %v3840_v32 = vld [vmem:[%s4468_s14 + $0x2e0] ss:$16 sps:$4 sm:$0xff]   ;;  %v3910_v16 = vld [vmem:[%s4468_s14 + $0x24c] ss:$16 sps:$4 sm:$0xff]  }
  0x28   : > { %1177 = vmatprep.subr.bf16.mxu1 %v3819_v18  ;;  %v3841_v33 = vld [vmem:[%s4468_s14 + $0x104] ss:$16 sps:$4 sm:$0xff]   ;;  %v3845_v35 = vld [vmem:[%s4468_s14 + $0x100] ss:$16 sps:$4 sm:$0xff]   ;;  %v3905_v17 = vld [vmem:[%s4468_s14 + $0x48] ss:$16 sps:$4 sm:$0xff]  }
  0x29   : > { %v3843_v34 = vld [vmem:[%s4468_s14 + $0x304] ss:$16 sps:$4 sm:$0xff]   ;;  %v3846_v36 = vld [vmem:[%s4468_s14 + $0x300] ss:$16 sps:$4 sm:$0xff]   ;;  %v3908_v18 = vld [vmem:[%s4468_s14 + $0x248] ss:$16 sps:$4 sm:$0xff]  }
  0x2a   : > { %1137 = vmatpush1.bf16.msra.mxu0 %v3821_v19  ;;  %v3847_v37 = vld [vmem:[%s4468_s14 + $0x124] ss:$16 sps:$4 sm:$0xff]   ;;  %v3851_v39 = vld [vmem:[%s4468_s14 + $0x120] ss:$16 sps:$4 sm:$0xff]   ;;  %v3913_v19 = vld [vmem:[%s4468_s14 + $0x6c] ss:$16 sps:$4 sm:$0xff]  }
  0x2b   : > { %1178 = vmatpush1.bf16.msra.mxu1 %v3822_v20  ;;  %1138 = vmatprep.subr.bf16.mxu0 %v3823_v21  ;;  %v3849_v38 = vld [vmem:[%s4468_s14 + $0x324] ss:$16 sps:$4 sm:$0xff]   ;;  %v3852_v40 = vld [vmem:[%s4468_s14 + $0x320] ss:$16 sps:$4 sm:$0xff]   ;;  %v3916_v20 = vld [vmem:[%s4468_s14 + $0x26c] ss:$16 sps:$4 sm:$0xff]  }
  0x2c   : > { %1179 = vmatprep.subr.bf16.mxu1 %v3825_v22  ;;  %v3853_v41 = vld [vmem:[%s4468_s14 + $0x144] ss:$16 sps:$4 sm:$0xff]   ;;  %v3857_v43 = vld [vmem:[%s4468_s14 + $0x140] ss:$16 sps:$4 sm:$0xff]   ;;  %v3911_v21 = vld [vmem:[%s4468_s14 + $0x68] ss:$16 sps:$4 sm:$0xff]  }
  0x2d   : > { %v3855_v42 = vld [vmem:[%s4468_s14 + $0x344] ss:$16 sps:$4 sm:$0xff]   ;;  %v3858_v44 = vld [vmem:[%s4468_s14 + $0x340] ss:$16 sps:$4 sm:$0xff]   ;;  %v3914_v22 = vld [vmem:[%s4468_s14 + $0x268] ss:$16 sps:$4 sm:$0xff]  }
  0x2e   : > { %1139 = vmatpush1.bf16.msra.mxu0 %v3827_v23  ;;  %v3859_v45 = vld [vmem:[%s4468_s14 + $0x164] ss:$16 sps:$4 sm:$0xff]   ;;  %v3863_v50 = vld [vmem:[%s4468_s14 + $0x160] ss:$16 sps:$4 sm:$0xff]   ;;  %v3919_v23 = vld [vmem:[%s4468_s14 + $0x8c] ss:$16 sps:$4 sm:$0xff]  }
  0x2f   : > { %1180 = vmatpush1.bf16.msra.mxu1 %v3828_v24  ;;  %1140 = vmatprep.subr.bf16.mxu0 %v3829_v25  ;;  %v3861_v46 = vld [vmem:[%s4468_s14 + $0x364] ss:$16 sps:$4 sm:$0xff]   ;;  %v3864_v51 = vld [vmem:[%s4468_s14 + $0x360] ss:$16 sps:$4 sm:$0xff]   ;;  %v3922_v24 = vld [vmem:[%s4468_s14 + $0x28c] ss:$16 sps:$4 sm:$0xff]  }
  0x30   : > { %1181 = vmatprep.subr.bf16.mxu1 %v3831_v26  ;;  %v344_v47 = vld [vmem:[%s4463_s10] sm:$0xff]  ;;  %v3917_v25 = vld [vmem:[%s4468_s14 + $0x88] ss:$16 sps:$4 sm:$0xff]  }
  0x31   : > { %v4518_v48 = vcombine.high %v344_v47, %v344_v47  ;;  %v3865_v53 = vld [vmem:[%s4468_s14 + $0x184] ss:$16 sps:$4 sm:$0xff]   ;;  %v3869_v55 = vld [vmem:[%s4468_s14 + $0x180] ss:$16 sps:$4 sm:$0xff]   ;;  %v4542_v7 = vcombine.low %v344_v47, %v344_v47  ;;  %v3920_v26 = vld [vmem:[%s4468_s14 + $0x288] ss:$16 sps:$4 sm:$0xff]  }
  0x32   : > { %1141 = vmatpush1.bf16.msra.mxu0 %v3833_v27  ;;  %v3867_v54 = vld [vmem:[%s4468_s14 + $0x384] ss:$16 sps:$4 sm:$0xff]   ;;  %v3870_v56 = vld [vmem:[%s4468_s14 + $0x380] ss:$16 sps:$4 sm:$0xff]   ;;  %v3925_v27 = vld [vmem:[%s4468_s14 + $0xac] ss:$16 sps:$4 sm:$0xff]  }
  0x33   : > { %1182 = vmatpush1.bf16.msra.mxu1 %v3834_v28  ;;  %1142 = vmatprep.subr.bf16.mxu0 %v3835_v29  ;;  %v3871_v57 = vld [vmem:[%s4468_s14 + $0x1a4] ss:$16 sps:$4 sm:$0xff]   ;;  %v3875_v59 = vld [vmem:[%s4468_s14 + $0x1a0] ss:$16 sps:$4 sm:$0xff]   ;;  %v3928_v28 = vld [vmem:[%s4468_s14 + $0x2ac] ss:$16 sps:$4 sm:$0xff]  }
  0x34   : > { %1183 = vmatprep.subr.bf16.mxu1 %v3837_v30  ;;  %1160 = vmatprep.mubr.bf16.mxu0 %v4518_v48  ;;  %v3873_v58 = vld [vmem:[%s4468_s14 + $0x3a4] ss:$16 sps:$4 sm:$0xff]   ;;  %v3876_v60 = vld [vmem:[%s4468_s14 + $0x3a0] ss:$16 sps:$4 sm:$0xff]   ;;  %v3923_v29 = vld [vmem:[%s4468_s14 + $0xa8] ss:$16 sps:$4 sm:$0xff]  }
  0x35   : > { %v3877_v61 = vld [vmem:[%s4468_s14 + $0x1c4] ss:$16 sps:$4 sm:$0xff]   ;;  %v3881_v63 = vld [vmem:[%s4468_s14 + $0x1c0] ss:$16 sps:$4 sm:$0xff]   ;;  %v3926_v30 = vld [vmem:[%s4468_s14 + $0x2a8] ss:$16 sps:$4 sm:$0xff]  }
  0x36   : > { %1143 = vmatpush1.bf16.msra.mxu0 %v3839_v31  ;;  %v3879_v62 = vld [vmem:[%s4468_s14 + $0x3c4] ss:$16 sps:$4 sm:$0xff]   ;;  %v3882_v0 = vld [vmem:[%s4468_s14 + $0x3c0] ss:$16 sps:$4 sm:$0xff]   ;;  %v3931_v31 = vld [vmem:[%s4468_s14 + $0xcc] ss:$16 sps:$4 sm:$0xff]  }
  0x37   : > { %1184 = vmatpush1.bf16.msra.mxu1 %v3840_v32  ;;  %1144 = vmatprep.subr.bf16.mxu0 %v3841_v33  ;;  %v3883_v1 = vld [vmem:[%s4468_s14 + $0x1e4] ss:$16 sps:$4 sm:$0xff]   ;;  %v3887_v3 = vld [vmem:[%s4468_s14 + $0x1e0] ss:$16 sps:$4 sm:$0xff]   ;;  %v3934_v32 = vld [vmem:[%s4468_s14 + $0x2cc] ss:$16 sps:$4 sm:$0xff]  }
  0x38   : > { %1185 = vmatprep.subr.bf16.mxu1 %v3843_v34  ;;  %v3885_v2 = vld [vmem:[%s4468_s14 + $0x3e4] ss:$16 sps:$4 sm:$0xff]   ;;  %v3888_v4 = vld [vmem:[%s4468_s14 + $0x3e0] ss:$16 sps:$4 sm:$0xff]   ;;  %v3929_v33 = vld [vmem:[%s4468_s14 + $0xc8] ss:$16 sps:$4 sm:$0xff]  }
  0x39   : > { %v3932_v34 = vld [vmem:[%s4468_s14 + $0x2c8] ss:$16 sps:$4 sm:$0xff]   ;;  %v3955_v47 = vld [vmem:[%s4468_s14 + $0x14c] ss:$16 sps:$4 sm:$0xff]  }
  0x3a   : > { %1145 = vmatpush1.bf16.msra.mxu0 %v3845_v35  ;;  %v3937_v35 = vld [vmem:[%s4468_s14 + $0xec] ss:$16 sps:$4 sm:$0xff]  }
  0x3b   : > { %1186 = vmatpush1.bf16.msra.mxu1 %v3846_v36  ;;  %1146 = vmatprep.subr.bf16.mxu0 %v3847_v37  ;;  %v3940_v36 = vld [vmem:[%s4468_s14 + $0x2ec] ss:$16 sps:$4 sm:$0xff]   ;;  %v3935_v37 = vld [vmem:[%s4468_s14 + $0xe8] ss:$16 sps:$4 sm:$0xff]  }
  0x3c   : > { %1187 = vmatprep.subr.bf16.mxu1 %v3849_v38  ;;  %v3938_v38 = vld [vmem:[%s4468_s14 + $0x2e8] ss:$16 sps:$4 sm:$0xff]  }
  0x3e   : > { %1147 = vmatpush1.bf16.msra.mxu0 %v3851_v39  ;;  %v3943_v39 = vld [vmem:[%s4468_s14 + $0x10c] ss:$16 sps:$4 sm:$0xff]  }
  0x3f   : > { %1188 = vmatpush1.bf16.msra.mxu1 %v3852_v40  ;;  %1148 = vmatprep.subr.bf16.mxu0 %v3853_v41  ;;  %v3946_v40 = vld [vmem:[%s4468_s14 + $0x30c] ss:$16 sps:$4 sm:$0xff]   ;;  %v3941_v41 = vld [vmem:[%s4468_s14 + $0x108] ss:$16 sps:$4 sm:$0xff]  }
  0x40   : > { %1189 = vmatprep.subr.bf16.mxu1 %v3855_v42  ;;  %v3944_v42 = vld [vmem:[%s4468_s14 + $0x308] ss:$16 sps:$4 sm:$0xff]  }
  0x42   : > { %1149 = vmatpush1.bf16.msra.mxu0 %v3857_v43  ;;  %v3949_v43 = vld [vmem:[%s4468_s14 + $0x12c] ss:$16 sps:$4 sm:$0xff]  }
  0x43   : > { %1190 = vmatpush1.bf16.msra.mxu1 %v3858_v44  ;;  %1150 = vmatprep.subr.bf16.mxu0 %v3859_v45  ;;  %v3952_v44 = vld [vmem:[%s4468_s14 + $0x32c] ss:$16 sps:$4 sm:$0xff]   ;;  %v3947_v45 = vld [vmem:[%s4468_s14 + $0x128] ss:$16 sps:$4 sm:$0xff]  }
  0x44   : > { %1191 = vmatprep.subr.bf16.mxu1 %v3861_v46  ;;  %v3950_v46 = vld [vmem:[%s4468_s14 + $0x328] ss:$16 sps:$4 sm:$0xff]  }
  0x46   : > { %1151 = vmatpush1.bf16.msra.mxu0 %v3863_v50  ;;  %v3956_v50 = vld [vmem:[%s4468_s14 + $0x348] ss:$16 sps:$4 sm:$0xff]  }
  0x47   : > { %1192 = vmatpush1.bf16.msra.mxu1 %v3864_v51  ;;  %1152 = vmatprep.subr.bf16.mxu0 %v3865_v53  ;;  %v3961_v51 = vld [vmem:[%s4468_s14 + $0x16c] ss:$16 sps:$4 sm:$0xff]   ;;  %v3959_v53 = vld [vmem:[%s4468_s14 + $0x168] ss:$16 sps:$4 sm:$0xff]  }
  0x48   : > { %1193 = vmatprep.subr.bf16.mxu1 %v3867_v54  ;;  %v3962_v54 = vld [vmem:[%s4468_s14 + $0x368] ss:$16 sps:$4 sm:$0xff]  }
  0x4a   : > { %1153 = vmatpush1.bf16.msra.mxu0 %v3869_v55  ;;  %v3967_v55 = vld [vmem:[%s4468_s14 + $0x18c] ss:$16 sps:$4 sm:$0xff]  }
  0x4b   : > { %1194 = vmatpush1.bf16.msra.mxu1 %v3870_v56  ;;  %1154 = vmatprep.subr.bf16.mxu0 %v3871_v57  ;;  %v3970_v56 = vld [vmem:[%s4468_s14 + $0x38c] ss:$16 sps:$4 sm:$0xff]   ;;  %v3965_v57 = vld [vmem:[%s4468_s14 + $0x188] ss:$16 sps:$4 sm:$0xff]  }
  0x4c   : > { %1195 = vmatprep.subr.bf16.mxu1 %v3873_v58  ;;  %v3968_v58 = vld [vmem:[%s4468_s14 + $0x388] ss:$16 sps:$4 sm:$0xff]  }
  0x4e   : > { %1155 = vmatpush1.bf16.msra.mxu0 %v3875_v59  ;;  %v3973_v59 = vld [vmem:[%s4468_s14 + $0x1ac] ss:$16 sps:$4 sm:$0xff]  }
  0x4f   : > { %1196 = vmatpush1.bf16.msra.mxu1 %v3876_v60  ;;  %1156 = vmatprep.subr.bf16.mxu0 %v3877_v61  ;;  %v3976_v60 = vld [vmem:[%s4468_s14 + $0x3ac] ss:$16 sps:$4 sm:$0xff]   ;;  %v3971_v61 = vld [vmem:[%s4468_s14 + $0x1a8] ss:$16 sps:$4 sm:$0xff]  }
  0x50   : > { %1197 = vmatprep.subr.bf16.mxu1 %v3879_v62  ;;  %v3974_v62 = vld [vmem:[%s4468_s14 + $0x3a8] ss:$16 sps:$4 sm:$0xff]  }
  0x52   : > { %1157 = vmatpush1.bf16.msra.mxu0 %v3881_v63  ;;  %v3979_v63 = vld [vmem:[%s4468_s14 + $0x1cc] ss:$16 sps:$4 sm:$0xff]  }
  0x53   : > { %1198 = vmatpush1.bf16.msra.mxu1 %v3882_v0  ;;  %1158 = vmatprep.subr.bf16.mxu0 %v3883_v1  ;;  %v3982_v0 = vld [vmem:[%s4468_s14 + $0x3cc] ss:$16 sps:$4 sm:$0xff]   ;;  %v3977_v1 = vld [vmem:[%s4468_s14 + $0x1c8] ss:$16 sps:$4 sm:$0xff]  }
  0x54   : > { %1199 = vmatprep.subr.bf16.mxu1 %v3885_v2  ;;  %v3980_v2 = vld [vmem:[%s4468_s14 + $0x3c8] ss:$16 sps:$4 sm:$0xff]  }
  0x56   : > { %1159 = vmatpush1.bf16.msra.mxu0 %v3887_v3  ;;  %v3985_v3 = vld [vmem:[%s4468_s14 + $0x1ec] ss:$16 sps:$4 sm:$0xff]  }
  0x57   : > { %1200 = vmatpush1.bf16.msra.mxu1 %v3888_v4  ;;  %1210 = vmatprep.subr.bf16.mxu0 %v3895_v5  ;;  %v3988_v4 = vld [vmem:[%s4468_s14 + $0x3ec] ss:$16 sps:$4 sm:$0xff]   ;;  %v3983_v5 = vld [vmem:[%s4468_s14 + $0x1e8] ss:$16 sps:$4 sm:$0xff]  }
  0x58   : > { %1251 = vmatprep.subr.bf16.mxu1 %v3898_v6  ;;  %v3986_v6 = vld [vmem:[%s4468_s14 + $0x3e8] ss:$16 sps:$4 sm:$0xff]  }
  0x59   : > { %1161 = vmatmul.mubr.bf16.vlgmr.msra.gmra.mrb[0].mxu0 %v4542_v7 }
  0x5a   : > { %1202 = vmatmul.mubr.bf16.vlgmr.msra.gmra.mrb[0].mxu1 %v4544_v8  ;;  %1211 = vmatpush1.bf16.msra.mxu0 %v3893_v9 }
  0x5b   : > { %1252 = vmatpush1.bf16.msra.mxu1 %v3896_v10  ;;  %1212 = vmatprep.subr.bf16.mxu0 %v3901_v11  ;;  %v340_v10 = vld [vmem:[#allocation2] sm:$0xff] }
  0x5c   : > { %1253 = vmatprep.subr.bf16.mxu1 %v3904_v12  ;;  %1242 = vmatprep.mubr.bf16.mxu0 %v4518_v48  ;;  %v3958_v48 = vld [vmem:[%s4468_s14 + $0x34c] ss:$16 sps:$4 sm:$0xff]  }
  0x5d   : > { %1283 = vmatprep.mubr.bf16.mxu1 %v3354_v52  ;;  %v3964_v52 = vld [vmem:[%s4468_s14 + $0x36c] ss:$16 sps:$4 sm:$0xff]  }
  0x5e   : > { %1213 = vmatpush1.bf16.msra.mxu0 %v3899_v13 }
  0x5f   : > { %1254 = vmatpush1.bf16.msra.mxu1 %v3902_v14  ;;  %1214 = vmatprep.subr.bf16.mxu0 %v3907_v15  ;;  %v341_v14 = vld [vmem:[#allocation2 + $0x8] sm:$0xff] }
  0x60   : > { %1255 = vmatprep.subr.bf16.mxu1 %v3910_v16 }
  0x62   : > { %1215 = vmatpush1.bf16.msra.mxu0 %v3905_v17 }
  0x63   : > { %1256 = vmatpush1.bf16.msra.mxu1 %v3908_v18  ;;  %1216 = vmatprep.subr.bf16.mxu0 %v3913_v19 }
  0x64   : > { %1257 = vmatprep.subr.bf16.mxu1 %v3916_v20 }
  0x66   : > { %1217 = vmatpush1.bf16.msra.mxu0 %v3911_v21 }
  0x67   : > { %1258 = vmatpush1.bf16.msra.mxu1 %v3914_v22  ;;  %1218 = vmatprep.subr.bf16.mxu0 %v3919_v23 }
  0x68   : > { %1259 = vmatprep.subr.bf16.mxu1 %v3922_v24 }
  0x6a   : > { %1219 = vmatpush1.bf16.msra.mxu0 %v3917_v25 }
  0x6b   : > { %1260 = vmatpush1.bf16.msra.mxu1 %v3920_v26  ;;  %1220 = vmatprep.subr.bf16.mxu0 %v3925_v27  ;;  %v343_v26 = vld [vmem:[#allocation2 + $0x18] sm:$0xff] }
  0x6c   : > { %1261 = vmatprep.subr.bf16.mxu1 %v3928_v28 }
  0x6e   : > { %1221 = vmatpush1.bf16.msra.mxu0 %v3923_v29 }
  0x6f   : > { %1262 = vmatpush1.bf16.msra.mxu1 %v3926_v30  ;;  %1222 = vmatprep.subr.bf16.mxu0 %v3931_v31 }
  0x70   : > { %1263 = vmatprep.subr.bf16.mxu1 %v3934_v32 }
  0x72   : > { %1223 = vmatpush1.bf16.msra.mxu0 %v3929_v33 }
  0x73   : > { %1264 = vmatpush1.bf16.msra.mxu1 %v3932_v34  ;;  %1224 = vmatprep.subr.bf16.mxu0 %v3937_v35  ;;  %v3989_v35 = vld [vmem:[%s5456_s3 + $0x4] ss:$16 sps:$4 sm:$0xff] (!%p3483_p7)  }
  0x74   : > { %1265 = vmatprep.subr.bf16.mxu1 %v3940_v36  ;;  %v3991_v36 = vld [vmem:[%s5456_s3 + $0xc] ss:$16 sps:$4 sm:$0xff] (!%p3483_p7)  }
  0x76   : > { %1225 = vmatpush1.bf16.msra.mxu0 %v3935_v37  ;;  %v3993_v37 = vld [vmem:[%s5456_s3] ss:$16 sps:$4 sm:$0xff] (!%p3483_p7)  }
  0x77   : > { %1266 = vmatpush1.bf16.msra.mxu1 %v3938_v38  ;;  %1226 = vmatprep.subr.bf16.mxu0 %v3943_v39  ;;  %v3994_v38 = vld [vmem:[%s5456_s3 + $0x8] ss:$16 sps:$4 sm:$0xff] (!%p3483_p7)   ;;  %v3995_v39 = vld [vmem:[%s5456_s3 + $0x24] ss:$16 sps:$4 sm:$0xff] (!%p3483_p7)  }
  0x78   : > { %1267 = vmatprep.subr.bf16.mxu1 %v3946_v40  ;;  %v3997_v40 = vld [vmem:[%s5456_s3 + $0x2c] ss:$16 sps:$4 sm:$0xff] (!%p3483_p7)  }
  0x7a   : > { %1227 = vmatpush1.bf16.msra.mxu0 %v3941_v41  ;;  %v3999_v41 = vld [vmem:[%s5456_s3 + $0x20] ss:$16 sps:$4 sm:$0xff] (!%p3483_p7)  }
  0x7b   : > { %1268 = vmatpush1.bf16.msra.mxu1 %v3944_v42  ;;  %1228 = vmatprep.subr.bf16.mxu0 %v3949_v43  ;;  %v4000_v42 = vld [vmem:[%s5456_s3 + $0x28] ss:$16 sps:$4 sm:$0xff] (!%p3483_p7)   ;;  %v4001_v43 = vld [vmem:[%s5456_s3 + $0x44] ss:$16 sps:$4 sm:$0xff] (!%p3483_p7)  }
  0x7c   : > { %1269 = vmatprep.subr.bf16.mxu1 %v3952_v44  ;;  %v4003_v44 = vld [vmem:[%s5456_s3 + $0x4c] ss:$16 sps:$4 sm:$0xff] (!%p3483_p7)  }
  0x7e   : > { %1229 = vmatpush1.bf16.msra.mxu0 %v3947_v45  ;;  %v4005_v45 = vld [vmem:[%s5456_s3 + $0x40] ss:$16 sps:$4 sm:$0xff] (!%p3483_p7)  }
  0x7f   : > { %1270 = vmatpush1.bf16.msra.mxu1 %v3950_v46  ;;  %1230 = vmatprep.subr.bf16.mxu0 %v3955_v47  ;;  %v4006_v46 = vld [vmem:[%s5456_s3 + $0x48] ss:$16 sps:$4 sm:$0xff] (!%p3483_p7)   ;;  %v4007_v47 = vld [vmem:[%s5456_s3 + $0x64] ss:$16 sps:$4 sm:$0xff] (!%p3483_p7)  }
  0x80   : > { %1271 = vmatprep.subr.bf16.mxu1 %v3958_v48  ;;  %v4009_v48 = vld [vmem:[%s5456_s3 + $0x6c] ss:$16 sps:$4 sm:$0xff] (!%p3483_p7)  }
  0x82   : > { %1231 = vmatpush1.bf16.msra.mxu0 %v3953_v49  ;;  %v4011_v49 = vld [vmem:[%s5456_s3 + $0x60] ss:$16 sps:$4 sm:$0xff] (!%p3483_p7)  }
  0x83   : > { %1272 = vmatpush1.bf16.msra.mxu1 %v3956_v50  ;;  %1232 = vmatprep.subr.bf16.mxu0 %v3961_v51  ;;  %v4012_v50 = vld [vmem:[%s5456_s3 + $0x68] ss:$16 sps:$4 sm:$0xff] (!%p3483_p7)   ;;  %v4013_v51 = vld [vmem:[%s5456_s3 + $0x84] ss:$16 sps:$4 sm:$0xff] (!%p3483_p7)  }
  0x84   : > { %1273 = vmatprep.subr.bf16.mxu1 %v3964_v52  ;;  %v4015_v52 = vld [vmem:[%s5456_s3 + $0x8c] ss:$16 sps:$4 sm:$0xff] (!%p3483_p7)  }
  0x86   : > { %1233 = vmatpush1.bf16.msra.mxu0 %v3959_v53  ;;  %v4017_v53 = vld [vmem:[%s5456_s3 + $0x80] ss:$16 sps:$4 sm:$0xff] (!%p3483_p7)  }
  0x87   : > { %1274 = vmatpush1.bf16.msra.mxu1 %v3962_v54  ;;  %1234 = vmatprep.subr.bf16.mxu0 %v3967_v55  ;;  %v4018_v54 = vld [vmem:[%s5456_s3 + $0x88] ss:$16 sps:$4 sm:$0xff] (!%p3483_p7)   ;;  %v4019_v55 = vld [vmem:[%s5456_s3 + $0xa4] ss:$16 sps:$4 sm:$0xff] (!%p3483_p7)  }
  0x88   : > { %1275 = vmatprep.subr.bf16.mxu1 %v3970_v56  ;;  %v4021_v56 = vld [vmem:[%s5456_s3 + $0xac] ss:$16 sps:$4 sm:$0xff] (!%p3483_p7)  }
  0x8a   : > { %1235 = vmatpush1.bf16.msra.mxu0 %v3965_v57  ;;  %v4023_v57 = vld [vmem:[%s5456_s3 + $0xa0] ss:$16 sps:$4 sm:$0xff] (!%p3483_p7)  }
  0x8b   : > { %1276 = vmatpush1.bf16.msra.mxu1 %v3968_v58  ;;  %1236 = vmatprep.subr.bf16.mxu0 %v3973_v59  ;;  %v4024_v58 = vld [vmem:[%s5456_s3 + $0xa8] ss:$16 sps:$4 sm:$0xff] (!%p3483_p7)   ;;  %v4025_v59 = vld [vmem:[%s5456_s3 + $0xc4] ss:$16 sps:$4 sm:$0xff] (!%p3483_p7)  }
  0x8c   : > { %1277 = vmatprep.subr.bf16.mxu1 %v3976_v60  ;;  %v4027_v60 = vld [vmem:[%s5456_s3 + $0xcc] ss:$16 sps:$4 sm:$0xff] (!%p3483_p7)  }
  0x8e   : > { %1237 = vmatpush1.bf16.msra.mxu0 %v3971_v61  ;;  %v4029_v61 = vld [vmem:[%s5456_s3 + $0xc0] ss:$16 sps:$4 sm:$0xff] (!%p3483_p7)  }
  0x8f   : > { %1278 = vmatpush1.bf16.msra.mxu1 %v3974_v62  ;;  %1238 = vmatprep.subr.bf16.mxu0 %v3979_v63  ;;  %v4030_v62 = vld [vmem:[%s5456_s3 + $0xc8] ss:$16 sps:$4 sm:$0xff] (!%p3483_p7)   ;;  %v4031_v63 = vld [vmem:[%s5456_s3 + $0xe4] ss:$16 sps:$4 sm:$0xff] (!%p3483_p7)  }
  0x90   : > { %1279 = vmatprep.subr.bf16.mxu1 %v3982_v0  ;;  %v4033_v0 = vld [vmem:[%s5456_s3 + $0xec] ss:$16 sps:$4 sm:$0xff] (!%p3483_p7)  }
  0x92   : > { %1239 = vmatpush1.bf16.msra.mxu0 %v3977_v1  ;;  %v4035_v1 = vld [vmem:[%s5456_s3 + $0xe0] ss:$16 sps:$4 sm:$0xff] (!%p3483_p7)  }
  0x93   : > { %1280 = vmatpush1.bf16.msra.mxu1 %v3980_v2  ;;  %1240 = vmatprep.subr.bf16.mxu0 %v3985_v3  ;;  %v4036_v2 = vld [vmem:[%s5456_s3 + $0xe8] ss:$16 sps:$4 sm:$0xff] (!%p3483_p7)   ;;  %v4037_v3 = vld [vmem:[%s5456_s3 + $0x104] ss:$16 sps:$4 sm:$0xff] (!%p3483_p7)  }
  0x94   : > { %1281 = vmatprep.subr.bf16.mxu1 %v3988_v4  ;;  %v4039_v4 = vld [vmem:[%s5456_s3 + $0x10c] ss:$16 sps:$4 sm:$0xff] (!%p3483_p7)  }
  0x96   : > { %1241 = vmatpush1.bf16.msra.mxu0 %v3983_v5  ;;  %v4041_v5 = vld [vmem:[%s5456_s3 + $0x100] ss:$16 sps:$4 sm:$0xff] (!%p3483_p7)  }
  0x97   : > { %1282 = vmatpush1.bf16.msra.mxu1 %v3986_v6  ;;  %2132 = vmatprep.subr.bf16.mxu0 (!%p3483_p7), %v3989_v35  ;;  %v4042_v6 = vld [vmem:[%s5456_s3 + $0x108] ss:$16 sps:$4 sm:$0xff] (!%p3483_p7)   ;;  %v4071_v35 = vld [vmem:[%s5456_s3 + $0x1a0] ss:$16 sps:$4 sm:$0xff] (!%p3483_p7)  }
  0x98   : > { %2214 = vmatprep.subr.bf16.mxu1 (!%p3483_p7), %v3991_v36  ;;  %v4072_v36 = vld [vmem:[%s5456_s3 + $0x1a8] ss:$16 sps:$4 sm:$0xff] (!%p3483_p7)  }
  0x99   : > { %1243 = vmatmul.mubr.bf16.vlgmr.msra.gmra.mrb[4].mxu0 %v4542_v7  ;;  %v342_v7 = vld [vmem:[#allocation2 + $0x10] sm:$0xff] }
  0x9a   : > { %1284 = vmatmul.mubr.bf16.vlgmr.msra.gmra.mrb[4].mxu1 %v4544_v8  ;;  %2133 = vmatpush1.bf16.msra.mxu0 (!%p3483_p7), %v3993_v37 }
  0x9b   : > { %2215 = vmatpush1.bf16.msra.mxu1 (!%p3483_p7), %v3994_v38  ;;  %2134 = vmatprep.subr.bf16.mxu0 (!%p3483_p7), %v3995_v39  ;;  %v4073_v38 = vld [vmem:[%s5456_s3 + $0x1c4] ss:$16 sps:$4 sm:$0xff] (!%p3483_p7)  }
  0x9c   : > { %2216 = vmatprep.subr.bf16.mxu1 (!%p3483_p7), %v3997_v40  ;;  %v4075_v40 = vld [vmem:[%s5456_s3 + $0x1cc] ss:$16 sps:$4 sm:$0xff] (!%p3483_p7)  }
  0x9e   : > { %2135 = vmatpush1.bf16.msra.mxu0 (!%p3483_p7), %v3999_v41  ;;  %v4077_v41 = vld [vmem:[%s5456_s3 + $0x1c0] ss:$16 sps:$4 sm:$0xff] (!%p3483_p7)  }
  0x9f   : > { %2217 = vmatpush1.bf16.msra.mxu1 (!%p3483_p7), %v4000_v42  ;;  %2136 = vmatprep.subr.bf16.mxu0 (!%p3483_p7), %v4001_v43  ;;  %v4078_v43 = vld [vmem:[%s5456_s3 + $0x1c8] ss:$16 sps:$4 sm:$0xff] (!%p3483_p7)  }
  0xa0   : > { %2218 = vmatprep.subr.bf16.mxu1 (!%p3483_p7), %v4003_v44  ;;  %v4079_v44 = vld [vmem:[%s5456_s3 + $0x1e4] ss:$16 sps:$4 sm:$0xff] (!%p3483_p7)  }
  0xa2   : > { %2137 = vmatpush1.bf16.msra.mxu0 (!%p3483_p7), %v4005_v45  ;;  %v4081_v45 = vld [vmem:[%s5456_s3 + $0x1ec] ss:$16 sps:$4 sm:$0xff] (!%p3483_p7)  }
  0xa3   : > { %2219 = vmatpush1.bf16.msra.mxu1 (!%p3483_p7), %v4006_v46  ;;  %2138 = vmatprep.subr.bf16.mxu0 (!%p3483_p7), %v4007_v47  ;;  %v4083_v46 = vld [vmem:[%s5456_s3 + $0x1e0] ss:$16 sps:$4 sm:$0xff] (!%p3483_p7)  }
  0xa4   : > { %2220 = vmatprep.subr.bf16.mxu1 (!%p3483_p7), %v4009_v48  ;;  %v4084_v48 = vld [vmem:[%s5456_s3 + $0x1e8] ss:$16 sps:$4 sm:$0xff] (!%p3483_p7)  }
  0xa6   : > { %2139 = vmatpush1.bf16.msra.mxu0 (!%p3483_p7), %v4011_v49  ;;  %v4087_v49 = vld [vmem:[%s5456_s3 + $0x204] ss:$16 sps:$4 sm:$0xff] (!%p3483_p7)  }
  0xa7   : > { %2221 = vmatpush1.bf16.msra.mxu1 (!%p3483_p7), %v4012_v50  ;;  %2140 = vmatprep.subr.bf16.mxu0 (!%p3483_p7), %v4013_v51  ;;  %v4090_v50 = vld [vmem:[%s5456_s3 + $0x20c] ss:$16 sps:$4 sm:$0xff] (!%p3483_p7)   ;;  %v4085_v51 = vld [vmem:[%s5456_s3 + $0x200] ss:$16 sps:$4 sm:$0xff] (!%p3483_p7)  }
  0xa8   : > { %2222 = vmatprep.subr.bf16.mxu1 (!%p3483_p7), %v4015_v52 }
  0xaa   : > { %2141 = vmatpush1.bf16.msra.mxu0 (!%p3483_p7), %v4017_v53  ;;  %v4088_v53 = vld [vmem:[%s5456_s3 + $0x208] ss:$16 sps:$4 sm:$0xff] (!%p3483_p7)  }
  0xab   : > { %2223 = vmatpush1.bf16.msra.mxu1 (!%p3483_p7), %v4018_v54  ;;  %2142 = vmatprep.subr.bf16.mxu0 (!%p3483_p7), %v4019_v55  ;;  %v4093_v54 = vld [vmem:[%s5456_s3 + $0x224] ss:$16 sps:$4 sm:$0xff] (!%p3483_p7)   ;;  %v4096_v55 = vld [vmem:[%s5456_s3 + $0x22c] ss:$16 sps:$4 sm:$0xff] (!%p3483_p7)  }
  0xac   : > { %2224 = vmatprep.subr.bf16.mxu1 (!%p3483_p7), %v4021_v56  ;;  %v4091_v56 = vld [vmem:[%s5456_s3 + $0x220] ss:$16 sps:$4 sm:$0xff] (!%p3483_p7)  }
  0xae   : > { %2143 = vmatpush1.bf16.msra.mxu0 (!%p3483_p7), %v4023_v57  ;;  %v4094_v57 = vld [vmem:[%s5456_s3 + $0x228] ss:$16 sps:$4 sm:$0xff] (!%p3483_p7)  }
  0xaf   : > { %2225 = vmatpush1.bf16.msra.mxu1 (!%p3483_p7), %v4024_v58  ;;  %2144 = vmatprep.subr.bf16.mxu0 (!%p3483_p7), %v4025_v59  ;;  %v4099_v58 = vld [vmem:[%s5456_s3 + $0x244] ss:$16 sps:$4 sm:$0xff] (!%p3483_p7)   ;;  %v4102_v59 = vld [vmem:[%s5456_s3 + $0x24c] ss:$16 sps:$4 sm:$0xff] (!%p3483_p7)  }
  0xb0   : > { %2226 = vmatprep.subr.bf16.mxu1 (!%p3483_p7), %v4027_v60  ;;  %v4097_v60 = vld [vmem:[%s5456_s3 + $0x240] ss:$16 sps:$4 sm:$0xff] (!%p3483_p7)  }
  0xb2   : > { %2145 = vmatpush1.bf16.msra.mxu0 (!%p3483_p7), %v4029_v61  ;;  %v4100_v61 = vld [vmem:[%s5456_s3 + $0x248] ss:$16 sps:$4 sm:$0xff] (!%p3483_p7)  }
  0xb3   : > { %2227 = vmatpush1.bf16.msra.mxu1 (!%p3483_p7), %v4030_v62  ;;  %2146 = vmatprep.subr.bf16.mxu0 (!%p3483_p7), %v4031_v63  ;;  %v4105_v62 = vld [vmem:[%s5456_s3 + $0x264] ss:$16 sps:$4 sm:$0xff] (!%p3483_p7)   ;;  %v4108_v63 = vld [vmem:[%s5456_s3 + $0x26c] ss:$16 sps:$4 sm:$0xff] (!%p3483_p7)  }
  0xb4   : > { %2228 = vmatprep.subr.bf16.mxu1 (!%p3483_p7), %v4033_v0  ;;  %v4103_v0 = vld [vmem:[%s5456_s3 + $0x260] ss:$16 sps:$4 sm:$0xff] (!%p3483_p7)  }
  0xb6   : > { %2147 = vmatpush1.bf16.msra.mxu0 (!%p3483_p7), %v4035_v1  ;;  %v4106_v1 = vld [vmem:[%s5456_s3 + $0x268] ss:$16 sps:$4 sm:$0xff] (!%p3483_p7)  }
  0xb7   : > { %2229 = vmatpush1.bf16.msra.mxu1 (!%p3483_p7), %v4036_v2  ;;  %2148 = vmatprep.subr.bf16.mxu0 (!%p3483_p7), %v4037_v3  ;;  %v4111_v2 = vld [vmem:[%s5456_s3 + $0x284] ss:$16 sps:$4 sm:$0xff] (!%p3483_p7)   ;;  %v4114_v3 = vld [vmem:[%s5456_s3 + $0x28c] ss:$16 sps:$4 sm:$0xff] (!%p3483_p7)  }
  0xb8   : > { %2230 = vmatprep.subr.bf16.mxu1 (!%p3483_p7), %v4039_v4  ;;  %v4109_v4 = vld [vmem:[%s5456_s3 + $0x280] ss:$16 sps:$4 sm:$0xff] (!%p3483_p7)  }
  0xba   : > { %2149 = vmatpush1.bf16.msra.mxu0 (!%p3483_p7), %v4041_v5 }
  0xbb   : > { %2231 = vmatpush1.bf16.msra.mxu1 (!%p3483_p7), %v4042_v6  ;;  %v4112_v6 = vld [vmem:[%s5456_s3 + $0x288] ss:$16 sps:$4 sm:$0xff] (!%p3483_p7)  }
 0x12c   : > { %v1162_v9 = vpop.f32.mrb[0].mxu0 }
 0x12d   : > { %v1203_v11 = vpop.f32.mrb[0].mxu1  ;;  %v1164_v13 = vpop.f32.mrb[1].mxu0 }
 0x12e   : > { %v1204_v12 = vadd.f32 %v1203_v11, %v1162_v9  ;;  %v1205_v15 = vpop.f32.mrb[1].mxu1  ;;  %v1166_v17 = vpop.f32.mrb[2].mxu0  ;;  %v4043_v9 = vld [vmem:[%s5456_s3 + $0x124] ss:$16 sps:$4 sm:$0xff] (!%p3483_p7)   ;;  %v4045_v11 = vld [vmem:[%s5456_s3 + $0x12c] ss:$16 sps:$4 sm:$0xff] (!%p3483_p7)  }
 0x12f   : > { %v1206_v16 = vadd.f32 %v1205_v15, %v1164_v13  ;;  %v1207_v18 = vpop.f32.mrb[2].mxu1  ;;  %v1167_v20 = vpop.f32.mrb[3].mxu0  ;;  %v4048_v13 = vld [vmem:[%s5456_s3 + $0x128] ss:$16 sps:$4 sm:$0xff] (!%p3483_p7)   ;;  %2150 = vmatprep.subr.bf16.mxu0 (!%p3483_p7), %v4043_v9  ;;  %2232 = vmatprep.subr.bf16.mxu1 (!%p3483_p7), %v4045_v11  ;;  %v4053_v17 = vld [vmem:[%s5456_s3 + $0x140] ss:$16 sps:$4 sm:$0xff] (!%p3483_p7)  }
 0x130   : > { %v1292_v19 = vadd.f32 %v1204_v12, %v340_v10  ;;  %v1208_v21 = vpop.f32.mrb[3].mxu1  ;;  %v1310_v10 = vlaneseq (!%p3483_p7)  ;;  %v4047_v12 = vld [vmem:[%s5456_s3 + $0x120] ss:$16 sps:$4 sm:$0xff] (!%p3483_p7)   ;;  %v4054_v18 = vld [vmem:[%s5456_s3 + $0x148] ss:$16 sps:$4 sm:$0xff] (!%p3483_p7)   ;;  %2233 = vmatpush1.bf16.msra.mxu1 (!%p3483_p7), %v4048_v13 }
 0x131   : > { %v1293_v22 = vadd.f32 %v1206_v16, %v341_v14  ;;  %v4049_v14 = vld [vmem:[%s5456_s3 + $0x144] ss:$16 sps:$4 sm:$0xff] (!%p3483_p7)   ;;  %v4051_v16 = vld [vmem:[%s5456_s3 + $0x14c] ss:$16 sps:$4 sm:$0xff] (!%p3483_p7)   ;;  %2151 = vmatpush1.bf16.msra.mxu0 (!%p3483_p7), %v4047_v12  ;;  %v4115_v11 = vld [vmem:[%s5456_s3 + $0x2a0] ss:$16 sps:$4 sm:$0xff] (!%p3483_p7)  }
 0x132   : > { %1296 = vst [vmem:[#allocation2] sm:$0xff] %v1292_v19  ;;  %v4737_v15 = vshrl.u32 (!%p3483_p7), %v1310_v10, 7  ;;  %v4055_v19 = vld [vmem:[%s5456_s3 + $0x164] ss:$16 sps:$4 sm:$0xff] (!%p3483_p7)   ;;  %2152 = vmatprep.subr.bf16.mxu0 (!%p3483_p7), %v4049_v14  ;;  %2234 = vmatprep.subr.bf16.mxu1 (!%p3483_p7), %v4051_v16  ;;  %v4057_v21 = vld [vmem:[%s5456_s3 + $0x16c] ss:$16 sps:$4 sm:$0xff] (!%p3483_p7)  }
 0x133   : > { %1297 = vst [vmem:[#allocation2 + $0x8] sm:$0xff] %v1293_v22  ;;  %v4117_v9 = vld [vmem:[%s5456_s3 + $0x2a4] ss:$16 sps:$4 sm:$0xff] (!%p3483_p7)   ;;  %v4120_v10 = vld [vmem:[%s5456_s3 + $0x2ac] ss:$16 sps:$4 sm:$0xff] (!%p3483_p7)  }
 0x134   : > { %v4752_v20 = vsub.s32 (!%p3483_p7), 1, %v4737_v15  ;;  %2235 = vmatpush1.bf16.msra.mxu1 (!%p3483_p7), %v4054_v18  ;;  %v4881_v5 = vsub.s32 (!%p3483_p7), 3, %v4737_v15  ;;  %v4118_v13 = vld [vmem:[%s5456_s3 + $0x2a8] ss:$16 sps:$4 sm:$0xff] (!%p3483_p7)   ;;  %v4123_v14 = vld [vmem:[%s5456_s3 + $0x2c4] ss:$16 sps:$4 sm:$0xff] (!%p3483_p7)  }
 0x135   : > { %2153 = vmatpush1.bf16.msra.mxu0 (!%p3483_p7), %v4053_v17  ;;  %2236 = vmatprep.subr.bf16.mxu1 (!%p3483_p7), %v4057_v21  ;;  %v4126_v16 = vld [vmem:[%s5456_s3 + $0x2cc] ss:$16 sps:$4 sm:$0xff] (!%p3483_p7)   ;;  %v4121_v18 = vld [vmem:[%s5456_s3 + $0x2c0] ss:$16 sps:$4 sm:$0xff] (!%p3483_p7)   ;;  %v4124_v21 = vld [vmem:[%s5456_s3 + $0x2c8] ss:$16 sps:$4 sm:$0xff] (!%p3483_p7)  }
 0x136   : > { %2154 = vmatprep.subr.bf16.mxu0 (!%p3483_p7), %v4055_v19 }
 0x139   : > { %v1304_v39 = vld [vmem:[#allocation2] sm:$0xff] (!%p3483_p7) }
 0x13a   : > { %v1305_v22 = vld [vmem:[#allocation2 + $0x8] sm:$0xff] (!%p3483_p7) }
 0x16c   : > { %v1244_v23 = vpop.f32.mrb[4].mxu0 }
 0x16d   : > { %v1285_v24 = vpop.f32.mrb[4].mxu1  ;;  %v1246_v25 = vpop.f32.mrb[5].mxu0  ;;  %1303 = sbr.rel (%p3483_p7) target bundleno = 952 (0x3b8), region = 56 }
 0x16e   : > { %v1286_v8 = vadd.f32 %v1285_v24, %v1244_v23  ;;  %v1287_v27 = vpop.f32.mrb[5].mxu1  ;;  %v1248_v29 = vpop.f32.mrb[6].mxu0  ;;  %v4760_v23 = vld [vmem:[%s5455_s2] sm:$0xf] (!%p3483_p7)  ;;  %v4060_v24 = vld [vmem:[%s5456_s3 + $0x168] ss:$16 sps:$4 sm:$0xff] (!%p3483_p7)  }
 0x16f   : > { %v1288_v28 = vadd.f32 %v1287_v27, %v1246_v25  ;;  %v1289_v30 = vpop.f32.mrb[6].mxu1  ;;  %v1249_v32 = vpop.f32.mrb[7].mxu0  ;;  %v4061_v25 = vld [vmem:[%s5456_s3 + $0x184] ss:$16 sps:$4 sm:$0xff] (!%p3483_p7)   ;;  %v4780_v29 = vsub.s32 (!%p3483_p7), 0, %v4737_v15  ;;  %2237 = vmatpush1.bf16.msra.mxu1 (!%p3483_p7), %v4060_v24  ;;  %v1325_v12 = vrot.slane (!%p3483_p7), %v4760_v23, %v4881_v5 }
 0x170   : > { %v1294_v31 = vadd.f32 %v1286_v8, %v342_v7  ;;  %v1290_v33 = vpop.f32.mrb[7].mxu1  ;;  %v4059_v7 = vld [vmem:[%s5456_s3 + $0x160] ss:$16 sps:$4 sm:$0xff] (!%p3483_p7)   ;;  %v1317_v8 = vrot.slane (!%p3483_p7), %v4760_v23, %v4752_v20  ;;  %v4066_v30 = vld [vmem:[%s5456_s3 + $0x188] ss:$16 sps:$4 sm:$0xff] (!%p3483_p7)  }
 0x171   : > { %v1295_v34 = vadd.f32 %v1288_v28, %v343_v26  ;;  %v4063_v26 = vld [vmem:[%s5456_s3 + $0x18c] ss:$16 sps:$4 sm:$0xff] (!%p3483_p7)   ;;  %v4065_v28 = vld [vmem:[%s5456_s3 + $0x180] ss:$16 sps:$4 sm:$0xff] (!%p3483_p7)   ;;  %2155 = vmatpush1.bf16.msra.mxu0 (!%p3483_p7), %v4059_v7  ;;  %v1313_v37 = vrot.slane (!%p3483_p7), %v4760_v23, %v4780_v29 }
 0x172   : > { %1298 = vst [vmem:[#allocation2 + $0x10] sm:$0xff] %v1294_v31  ;;  %v1331_v27 = vadd.f32 (!%p3483_p7), %v1317_v8, %v1305_v22  ;;  %v4067_v31 = vld [vmem:[%s5456_s3 + $0x1a4] ss:$16 sps:$4 sm:$0xff] (!%p3483_p7)   ;;  %2156 = vmatprep.subr.bf16.mxu0 (!%p3483_p7), %v4061_v25  ;;  %2238 = vmatprep.subr.bf16.mxu1 (!%p3483_p7), %v4063_v26  ;;  %v4069_v33 = vld [vmem:[%s5456_s3 + $0x1ac] ss:$16 sps:$4 sm:$0xff] (!%p3483_p7)  }
 0x173   : > { %1299 = vst [vmem:[#allocation2 + $0x18] sm:$0xff] %v1295_v34  ;;  %2239 = vmatpush1.bf16.msra.mxu1 (!%p3483_p7), %v4066_v30  ;;  %v1330_v42 = vadd.f32 (!%p3483_p7), %v1313_v37, %v1304_v39  ;;  %v4129_v22 = vld [vmem:[%s5456_s3 + $0x2e4] ss:$16 sps:$4 sm:$0xff] (!%p3483_p7)   ;;  %v4132_v7 = vld [vmem:[%s5456_s3 + $0x2ec] ss:$16 sps:$4 sm:$0xff] (!%p3483_p7)  }
 0x174   : > { %v1335_v32 = vmax.f32 %v1331_v27, 0.0  ;;  %2240 = vmatprep.subr.bf16.mxu1 %v4069_v33  ;;  %v4127_v25 = vld [vmem:[%s5456_s3 + $0x2e0] ss:$16 sps:$4 sm:$0xff]   ;;  %v4130_v26 = vld [vmem:[%s5456_s3 + $0x2e8] ss:$16 sps:$4 sm:$0xff]  }
 0x175   : > { %2157 = vmatpush1.bf16.msra.mxu0 %v4065_v28  ;;  %v1334_v47 = vmax.f32 %v1330_v42, 0.0  ;;  %v4135_v27 = vld [vmem:[%s5456_s3 + $0x304] ss:$16 sps:$4 sm:$0xff]   ;;  %v4138_v28 = vld [vmem:[%s5456_s3 + $0x30c] ss:$16 sps:$4 sm:$0xff]  }
 0x176   : > { %v1339_v34 = vpack.c.bf16 %v1335_v32, %v1335_v32  ;;  %2158 = vmatprep.subr.bf16.mxu0 %v4067_v31  ;;  %v4133_v30 = vld [vmem:[%s5456_s3 + $0x300] ss:$16 sps:$4 sm:$0xff]   ;;  %v4136_v31 = vld [vmem:[%s5456_s3 + $0x308] ss:$16 sps:$4 sm:$0xff]   ;;  %v4141_v32 = vld [vmem:[%s5456_s3 + $0x324] ss:$16 sps:$4 sm:$0xff]  }
 0x177   : > { %2241 = vmatpush1.bf16.msra.mxu1 %v4072_v36  ;;  %v1338_v52 = vpack.c.bf16 %v1334_v47, %v1334_v47  ;;  %v4144_v33 = vld [vmem:[%s5456_s3 + $0x32c] ss:$16 sps:$4 sm:$0xff]   ;;  %v4147_v36 = vld [vmem:[%s5456_s3 + $0x344] ss:$16 sps:$4 sm:$0xff]   ;;  %v4148_v39 = vld [vmem:[%s5456_s3 + $0x348] ss:$16 sps:$4 sm:$0xff]  }
 0x178   : > { %2164 = vmatprep.mubr.bf16.mxu0 %v1339_v34  ;;  %2246 = vmatprep.mubr.bf16.mxu1 %v1339_v34  ;;  %v4139_v34 = vld [vmem:[%s5456_s3 + $0x320] ss:$16 sps:$4 sm:$0xff]   ;;  %v4150_v37 = vld [vmem:[%s5456_s3 + $0x34c] ss:$16 sps:$4 sm:$0xff]  }
 0x179   : > { %2159 = vmatpush1.bf16.msra.mxu0 %v4071_v35  ;;  %2242 = vmatprep.subr.bf16.mxu1 %v4075_v40  ;;  %v4142_v35 = vld [vmem:[%s5456_s3 + $0x328] ss:$16 sps:$4 sm:$0xff]   ;;  %v4153_v40 = vld [vmem:[%s5456_s3 + $0x364] ss:$16 sps:$4 sm:$0xff]   ;;  %v4151_v42 = vld [vmem:[%s5456_s3 + $0x360] ss:$16 sps:$4 sm:$0xff]  }
 0x17a   : > { %2160 = vmatprep.subr.bf16.mxu0 %v4073_v38  ;;  %v1307_v17 = vld [vmem:[#allocation2 + $0x18] sm:$0xff]  ;;  %v4145_v38 = vld [vmem:[%s5456_s3 + $0x340] ss:$16 sps:$4 sm:$0xff]  }
 0x17b   : > { %2243 = vmatpush1.bf16.msra.mxu1 %v4078_v43  ;;  %v1333_v19 = vadd.f32 %v1325_v12, %v1307_v17  ;;  %v4154_v43 = vld [vmem:[%s5456_s3 + $0x368] ss:$16 sps:$4 sm:$0xff]   ;;  %v4157_v47 = vld [vmem:[%s5456_s3 + $0x380] ss:$16 sps:$4 sm:$0xff]   ;;  %v4198_v12 = vld [vmem:[%s5458_s5 + $0x4c] ss:$16 sps:$4 sm:$0xff]  }
 0x17c   : > { %2244 = vmatprep.subr.bf16.mxu1 %v4081_v45  ;;  %v4162_v45 = vld [vmem:[%s5456_s3 + $0x38c] ss:$16 sps:$4 sm:$0xff]  }
 0x17d   : > { %2161 = vmatpush1.bf16.msra.mxu0 %v4077_v41  ;;  %v1337_v24 = vmax.f32 %v1333_v19, 0.0  ;;  %v4156_v41 = vld [vmem:[%s5456_s3 + $0x36c] ss:$16 sps:$4 sm:$0xff]   ;;  %v4202_v19 = vld [vmem:[%s5458_s5 + $0x68] ss:$16 sps:$4 sm:$0xff]  }
 0x17e   : > { %2162 = vmatprep.subr.bf16.mxu0 %v4079_v44  ;;  %v4159_v44 = vld [vmem:[%s5456_s3 + $0x384] ss:$16 sps:$4 sm:$0xff]   ;;  %v4204_v17 = vld [vmem:[%s5458_s5 + $0x6c] ss:$16 sps:$4 sm:$0xff]  }
 0x17f   : > { %2245 = vmatpush1.bf16.msra.mxu1 %v4084_v48  ;;  %v1341_v8 = vpack.c.bf16 %v1337_v24, %v1337_v24  ;;  %v4160_v48 = vld [vmem:[%s5456_s3 + $0x388] ss:$16 sps:$4 sm:$0xff]  }
 0x180   : > { %2255 = vmatprep.subr.bf16.mxu1 %v4090_v50  ;;  %v4163_v50 = vld [vmem:[%s5456_s3 + $0x3a0] ss:$16 sps:$4 sm:$0xff]   ;;  %v4208_v24 = vld [vmem:[%s5458_s5 + $0x88] ss:$16 sps:$4 sm:$0xff]  }
 0x181   : > { %2163 = vmatpush1.bf16.msra.mxu0 %v4083_v46  ;;  %v4979_v46 = vsub.s32 2, %v4737_v15  ;;  %v4168_v15 = vld [vmem:[%s5456_s3 + $0x3ac] ss:$16 sps:$4 sm:$0xff]  }
 0x182   : > { %2173 = vmatprep.subr.bf16.mxu0 %v4087_v49  ;;  %2247 = vmatmul.mubr.bf16.vlgmr.msra.gmra.mrb[0].mxu1 %v1338_v52  ;;  %v4165_v49 = vld [vmem:[%s5456_s3 + $0x3a4] ss:$16 sps:$4 sm:$0xff]  }
 0x183   : > { %2256 = vmatpush1.bf16.msra.mxu1 %v4088_v53  ;;  %2287 = vmatprep.mubr.bf16.mxu1 %v1341_v8  ;;  %v1306_v53 = vld [vmem:[#allocation2 + $0x10] sm:$0xff] }
 0x184   : > { %2165 = vmatmul.mubr.bf16.vlgmr.msra.gmra.mrb[0].mxu0 %v1338_v52  ;;  %2257 = vmatprep.subr.bf16.mxu1 %v4096_v55  ;;  %v4166_v52 = vld [vmem:[%s5456_s3 + $0x3a8] ss:$16 sps:$4 sm:$0xff]   ;;  %v4174_v55 = vld [vmem:[%s5456_s3 + $0x3cc] ss:$16 sps:$4 sm:$0xff]  }
 0x185   : > { %2174 = vmatpush1.bf16.msra.mxu0 %v4085_v51  ;;  %2205 = vmatprep.mubr.bf16.mxu0 %v1341_v8  ;;  %v1321_v51 = vrot.slane %v4760_v23, %v4979_v46  ;;  %v4169_v23 = vld [vmem:[%s5456_s3 + $0x3c0] ss:$16 sps:$4 sm:$0xff]   ;;  %v4213_v8 = vld [vmem:[%s5458_s5 + $0xa4] ss:$16 sps:$4 sm:$0xff]  }
 0x186   : > { %2175 = vmatprep.subr.bf16.mxu0 %v4093_v54  ;;  %v4171_v54 = vld [vmem:[%s5456_s3 + $0x3c4] ss:$16 sps:$4 sm:$0xff]  }
 0x187   : > { %2258 = vmatpush1.bf16.msra.mxu1 %v4094_v57  ;;  %v4172_v57 = vld [vmem:[%s5456_s3 + $0x3c8] ss:$16 sps:$4 sm:$0xff]  }
 0x188   : > { %2259 = vmatprep.subr.bf16.mxu1 %v4102_v59  ;;  %v4180_v59 = vld [vmem:[%s5456_s3 + $0x3ec] ss:$16 sps:$4 sm:$0xff]  }
 0x189   : > { %2176 = vmatpush1.bf16.msra.mxu0 %v4091_v56  ;;  %v1332_v56 = vadd.f32 %v1321_v51, %v1306_v53  ;;  %v4247_v51 = vld [vmem:[%s5458_s5 + $0x160] ss:$16 sps:$4 sm:$0xff]   ;;  %v4255_v53 = vld [vmem:[%s5458_s5 + $0x184] ss:$16 sps:$4 sm:$0xff]  }
 0x18a   : > { %2177 = vmatprep.subr.bf16.mxu0 %v4099_v58  ;;  %v4177_v58 = vld [vmem:[%s5456_s3 + $0x3e4] ss:$16 sps:$4 sm:$0xff]  }
 0x18b   : > { %2260 = vmatpush1.bf16.msra.mxu1 %v4100_v61  ;;  %v1336_v61 = vmax.f32 %v1332_v56, 0.0  ;;  %v4256_v56 = vld [vmem:[%s5458_s5 + $0x188] ss:$16 sps:$4 sm:$0xff]  }
 0x18c   : > { %2261 = vmatprep.subr.bf16.mxu1 %v4108_v63  ;;  %v4183_v63 = vld [vmem:[%s5458_s5 + $0x4] ss:$16 sps:$4 sm:$0xff]  }
 0x18d   : > { %2178 = vmatpush1.bf16.msra.mxu0 %v4097_v60  ;;  %v4175_v60 = vld [vmem:[%s5456_s3 + $0x3e0] ss:$16 sps:$4 sm:$0xff]  }
 0x18e   : > { %2179 = vmatprep.subr.bf16.mxu0 %v4105_v62  ;;  %v4178_v62 = vld [vmem:[%s5456_s3 + $0x3e8] ss:$16 sps:$4 sm:$0xff]  }
 0x18f   : > { %2262 = vmatpush1.bf16.msra.mxu1 %v4106_v1  ;;  %v4181_v1 = vld [vmem:[%s5458_s5] ss:$16 sps:$4 sm:$0xff]  }
 0x190   : > { %2263 = vmatprep.subr.bf16.mxu1 %v4114_v3  ;;  %v1340_v3 = vpack.c.bf16 %v1336_v61, %v1336_v61  ;;  %v4270_v61 = vld [vmem:[%s5458_s5 + $0x1cc] ss:$16 sps:$4 sm:$0xff]  }
 0x191   : > { %2180 = vmatpush1.bf16.msra.mxu0 %v4103_v0  ;;  %v4186_v0 = vld [vmem:[%s5458_s5 + $0xc] ss:$16 sps:$4 sm:$0xff]  }
 0x192   : > { %2181 = vmatprep.subr.bf16.mxu0 %v4111_v2  ;;  %v4184_v2 = vld [vmem:[%s5458_s5 + $0x8] ss:$16 sps:$4 sm:$0xff]  }
 0x193   : > { %2264 = vmatpush1.bf16.msra.mxu1 %v4112_v6  ;;  %v4192_v6 = vld [vmem:[%s5458_s5 + $0x2c] ss:$16 sps:$4 sm:$0xff]  }
 0x194   : > { %2265 = vmatprep.subr.bf16.mxu1 %v4120_v10  ;;  %v4190_v10 = vld [vmem:[%s5458_s5 + $0x28] ss:$16 sps:$4 sm:$0xff]  }
 0x195   : > { %2182 = vmatpush1.bf16.msra.mxu0 %v4109_v4  ;;  %v4189_v4 = vld [vmem:[%s5458_s5 + $0x24] ss:$16 sps:$4 sm:$0xff]  }
 0x196   : > { %2183 = vmatprep.subr.bf16.mxu0 %v4117_v9  ;;  %v4187_v9 = vld [vmem:[%s5458_s5 + $0x20] ss:$16 sps:$4 sm:$0xff]  }
 0x197   : > { %2266 = vmatpush1.bf16.msra.mxu1 %v4118_v13  ;;  %v4193_v13 = vld [vmem:[%s5458_s5 + $0x40] ss:$16 sps:$4 sm:$0xff]  }
 0x198   : > { %2267 = vmatprep.subr.bf16.mxu1 %v4126_v16  ;;  %v4201_v16 = vld [vmem:[%s5458_s5 + $0x64] ss:$16 sps:$4 sm:$0xff]  }
 0x199   : > { %2184 = vmatpush1.bf16.msra.mxu0 %v4115_v11  ;;  %v4195_v11 = vld [vmem:[%s5458_s5 + $0x44] ss:$16 sps:$4 sm:$0xff]  }
 0x19a   : > { %2185 = vmatprep.subr.bf16.mxu0 %v4123_v14  ;;  %v4196_v14 = vld [vmem:[%s5458_s5 + $0x48] ss:$16 sps:$4 sm:$0xff]  }
 0x19b   : > { %2268 = vmatpush1.bf16.msra.mxu1 %v4124_v21  ;;  %v4207_v21 = vld [vmem:[%s5458_s5 + $0x84] ss:$16 sps:$4 sm:$0xff]  }
 0x19c   : > { %2269 = vmatprep.subr.bf16.mxu1 %v4132_v7  ;;  %v4205_v7 = vld [vmem:[%s5458_s5 + $0x80] ss:$16 sps:$4 sm:$0xff]  }
 0x19d   : > { %2186 = vmatpush1.bf16.msra.mxu0 %v4121_v18  ;;  %v4199_v18 = vld [vmem:[%s5458_s5 + $0x60] ss:$16 sps:$4 sm:$0xff]  }
 0x19e   : > { %2187 = vmatprep.subr.bf16.mxu0 %v4129_v22  ;;  %v4210_v22 = vld [vmem:[%s5458_s5 + $0x8c] ss:$16 sps:$4 sm:$0xff]  }
 0x19f   : > { %2270 = vmatpush1.bf16.msra.mxu1 %v4130_v26  ;;  %v4211_v26 = vld [vmem:[%s5458_s5 + $0xa0] ss:$16 sps:$4 sm:$0xff]  }
 0x1a0   : > { %2271 = vmatprep.subr.bf16.mxu1 %v4138_v28  ;;  %v4219_v28 = vld [vmem:[%s5458_s5 + $0xc4] ss:$16 sps:$4 sm:$0xff]  }
 0x1a1   : > { %2188 = vmatpush1.bf16.msra.mxu0 %v4127_v25  ;;  %v4216_v25 = vld [vmem:[%s5458_s5 + $0xac] ss:$16 sps:$4 sm:$0xff]  }
 0x1a2   : > { %2189 = vmatprep.subr.bf16.mxu0 %v4135_v27  ;;  %v4214_v27 = vld [vmem:[%s5458_s5 + $0xa8] ss:$16 sps:$4 sm:$0xff]  }
 0x1a3   : > { %2272 = vmatpush1.bf16.msra.mxu1 %v4136_v31  ;;  %v4217_v31 = vld [vmem:[%s5458_s5 + $0xc0] ss:$16 sps:$4 sm:$0xff]  }
 0x1a4   : > { %2273 = vmatprep.subr.bf16.mxu1 %v4144_v33  ;;  %v4225_v33 = vld [vmem:[%s5458_s5 + $0xe4] ss:$16 sps:$4 sm:$0xff]  }
 0x1a5   : > { %2190 = vmatpush1.bf16.msra.mxu0 %v4133_v30  ;;  %v4222_v30 = vld [vmem:[%s5458_s5 + $0xcc] ss:$16 sps:$4 sm:$0xff]  }
 0x1a6   : > { %2191 = vmatprep.subr.bf16.mxu0 %v4141_v32  ;;  %v4220_v32 = vld [vmem:[%s5458_s5 + $0xc8] ss:$16 sps:$4 sm:$0xff]  }
 0x1a7   : > { %2274 = vmatpush1.bf16.msra.mxu1 %v4142_v35  ;;  %v4223_v35 = vld [vmem:[%s5458_s5 + $0xe0] ss:$16 sps:$4 sm:$0xff]  }
 0x1a8   : > { %2275 = vmatprep.subr.bf16.mxu1 %v4150_v37  ;;  %v4231_v37 = vld [vmem:[%s5458_s5 + $0x104] ss:$16 sps:$4 sm:$0xff]  }
 0x1a9   : > { %2192 = vmatpush1.bf16.msra.mxu0 %v4139_v34  ;;  %v4228_v34 = vld [vmem:[%s5458_s5 + $0xec] ss:$16 sps:$4 sm:$0xff]  }
 0x1aa   : > { %2193 = vmatprep.subr.bf16.mxu0 %v4147_v36  ;;  %v4226_v36 = vld [vmem:[%s5458_s5 + $0xe8] ss:$16 sps:$4 sm:$0xff]  }
 0x1ab   : > { %2276 = vmatpush1.bf16.msra.mxu1 %v4148_v39  ;;  %v4229_v39 = vld [vmem:[%s5458_s5 + $0x100] ss:$16 sps:$4 sm:$0xff]  }
 0x1ac   : > { %2277 = vmatprep.subr.bf16.mxu1 %v4156_v41  ;;  %v4237_v41 = vld [vmem:[%s5458_s5 + $0x124] ss:$16 sps:$4 sm:$0xff]  }
 0x1ad   : > { %2194 = vmatpush1.bf16.msra.mxu0 %v4145_v38  ;;  %v4234_v38 = vld [vmem:[%s5458_s5 + $0x10c] ss:$16 sps:$4 sm:$0xff]  }
 0x1ae   : > { %2195 = vmatprep.subr.bf16.mxu0 %v4153_v40  ;;  %v4232_v40 = vld [vmem:[%s5458_s5 + $0x108] ss:$16 sps:$4 sm:$0xff]  }
 0x1af   : > { %2278 = vmatpush1.bf16.msra.mxu1 %v4154_v43  ;;  %v4235_v43 = vld [vmem:[%s5458_s5 + $0x120] ss:$16 sps:$4 sm:$0xff]  }
 0x1b0   : > { %2279 = vmatprep.subr.bf16.mxu1 %v4162_v45  ;;  %v4243_v45 = vld [vmem:[%s5458_s5 + $0x144] ss:$16 sps:$4 sm:$0xff]  }
 0x1b1   : > { %2196 = vmatpush1.bf16.msra.mxu0 %v4151_v42  ;;  %v4240_v42 = vld [vmem:[%s5458_s5 + $0x12c] ss:$16 sps:$4 sm:$0xff]  }
 0x1b2   : > { %2197 = vmatprep.subr.bf16.mxu0 %v4159_v44  ;;  %v4238_v44 = vld [vmem:[%s5458_s5 + $0x128] ss:$16 sps:$4 sm:$0xff]  }
 0x1b3   : > { %2280 = vmatpush1.bf16.msra.mxu1 %v4160_v48  ;;  %v4241_v48 = vld [vmem:[%s5458_s5 + $0x140] ss:$16 sps:$4 sm:$0xff]  }
 0x1b4   : > { %2281 = vmatprep.subr.bf16.mxu1 %v4168_v15  ;;  %v4249_v15 = vld [vmem:[%s5458_s5 + $0x164] ss:$16 sps:$4 sm:$0xff]  }
 0x1b5   : > { %2198 = vmatpush1.bf16.msra.mxu0 %v4157_v47  ;;  %v4246_v47 = vld [vmem:[%s5458_s5 + $0x14c] ss:$16 sps:$4 sm:$0xff]  }
 0x1b6   : > { %2199 = vmatprep.subr.bf16.mxu0 %v4165_v49  ;;  %v4244_v49 = vld [vmem:[%s5458_s5 + $0x148] ss:$16 sps:$4 sm:$0xff]  }
 0x1b7   : > { %2282 = vmatpush1.bf16.msra.mxu1 %v4166_v52  ;;  %v4250_v52 = vld [vmem:[%s5458_s5 + $0x168] ss:$16 sps:$4 sm:$0xff]  }
 0x1b8   : > { %2283 = vmatprep.subr.bf16.mxu1 %v4174_v55  ;;  %v4253_v55 = vld [vmem:[%s5458_s5 + $0x180] ss:$16 sps:$4 sm:$0xff]  }
 0x1b9   : > { %2200 = vmatpush1.bf16.msra.mxu0 %v4163_v50  ;;  %v4252_v50 = vld [vmem:[%s5458_s5 + $0x16c] ss:$16 sps:$4 sm:$0xff]  }
 0x1ba   : > { %2201 = vmatprep.subr.bf16.mxu0 %v4171_v54  ;;  %v4258_v54 = vld [vmem:[%s5458_s5 + $0x18c] ss:$16 sps:$4 sm:$0xff]  }
 0x1bb   : > { %2284 = vmatpush1.bf16.msra.mxu1 %v4172_v57  ;;  %v4264_v57 = vld [vmem:[%s5458_s5 + $0x1ac] ss:$16 sps:$4 sm:$0xff]  }
 0x1bc   : > { %2285 = vmatprep.subr.bf16.mxu1 %v4180_v59  ;;  %v4262_v59 = vld [vmem:[%s5458_s5 + $0x1a8] ss:$16 sps:$4 sm:$0xff]  }
 0x1bd   : > { %2202 = vmatpush1.bf16.msra.mxu0 %v4169_v23  ;;  %v4261_v23 = vld [vmem:[%s5458_s5 + $0x1a4] ss:$16 sps:$4 sm:$0xff]  }
 0x1be   : > { %2203 = vmatprep.subr.bf16.mxu0 %v4177_v58  ;;  %v4259_v58 = vld [vmem:[%s5458_s5 + $0x1a0] ss:$16 sps:$4 sm:$0xff]  }
 0x1bf   : > { %2286 = vmatpush1.bf16.msra.mxu1 %v4178_v62  ;;  %v4265_v62 = vld [vmem:[%s5458_s5 + $0x1c0] ss:$16 sps:$4 sm:$0xff]  }
 0x1c0   : > { %3176 = vmatprep.subr.bf16.mxu1 %v4186_v0  ;;  %v4273_v0 = vld [vmem:[%s5458_s5 + $0x1e4] ss:$16 sps:$4 sm:$0xff]  }
 0x1c1   : > { %2204 = vmatpush1.bf16.msra.mxu0 %v4175_v60  ;;  %v4267_v60 = vld [vmem:[%s5458_s5 + $0x1c4] ss:$16 sps:$4 sm:$0xff]  }
 0x1c2   : > { %3094 = vmatprep.subr.bf16.mxu0 %v4183_v63  ;;  %2288 = vmatmul.mubr.bf16.vlgmr.msra.gmra.mrb[0].mxu1 %v1340_v3  ;;  %v4268_v63 = vld [vmem:[%s5458_s5 + $0x1c8] ss:$16 sps:$4 sm:$0xff]  }
 0x1c3   : > { %3177 = vmatpush1.bf16.msra.mxu1 %v4184_v2  ;;  %v4271_v2 = vld [vmem:[%s5458_s5 + $0x1e0] ss:$16 sps:$4 sm:$0xff]  }
 0x1c4   : > { %2206 = vmatmul.mubr.bf16.vlgmr.msra.gmra.mrb[0].mxu0 %v1340_v3  ;;  %3178 = vmatprep.subr.bf16.mxu1 %v4192_v6  ;;  %v4274_v3 = vld [vmem:[%s5458_s5 + $0x1e8] ss:$16 sps:$4 sm:$0xff]   ;;  %v4282_v6 = vld [vmem:[%s5458_s5 + $0x20c] ss:$16 sps:$4 sm:$0xff]  }
 0x1c5   : > { %3095 = vmatpush1.bf16.msra.mxu0 %v4181_v1  ;;  %v4276_v1 = vld [vmem:[%s5458_s5 + $0x1ec] ss:$16 sps:$4 sm:$0xff]  }
 0x1c6   : > { %3096 = vmatprep.subr.bf16.mxu0 %v4189_v4  ;;  %v4279_v4 = vld [vmem:[%s5458_s5 + $0x204] ss:$16 sps:$4 sm:$0xff]  }
 0x1c7   : > { %3179 = vmatpush1.bf16.msra.mxu1 %v4190_v10 }
 0x1c8   : > { %3180 = vmatprep.subr.bf16.mxu1 %v4198_v12 }
 0x1c9   : > { %3097 = vmatpush1.bf16.msra.mxu0 %v4187_v9  ;;  %v5226_v9 = vld [vmem:[%s5457_s4] sm:$0xf] }
 0x1ca   : > { %3098 = vmatprep.subr.bf16.mxu0 %v4195_v11  ;;  %v1475_v10 = vrot.slane %v5226_v9, %v4780_v29  ;;  %v1479_v11 = vrot.slane %v5226_v9, %v4752_v20  ;;  %v1487_v12 = vrot.slane %v5226_v9, %v4881_v5 }
 0x1cb   : > { %3181 = vmatpush1.bf16.msra.mxu1 %v4196_v14 }
 0x1cc   : > { %3182 = vmatprep.subr.bf16.mxu1 %v4204_v17 }
 0x1cd   : > { %3099 = vmatpush1.bf16.msra.mxu0 %v4193_v13 }
 0x1ce   : > { %3100 = vmatprep.subr.bf16.mxu0 %v4201_v16 }
 0x1cf   : > { %3183 = vmatpush1.bf16.msra.mxu1 %v4202_v19 }
 0x1d0   : > { %3184 = vmatprep.subr.bf16.mxu1 %v4210_v22 }
 0x1d1   : > { %3101 = vmatpush1.bf16.msra.mxu0 %v4199_v18 }
 0x1d2   : > { %3102 = vmatprep.subr.bf16.mxu0 %v4207_v21 }
 0x1d3   : > { %3185 = vmatpush1.bf16.msra.mxu1 %v4208_v24 }
 0x1d4   : > { %3186 = vmatprep.subr.bf16.mxu1 %v4216_v25 }
 0x1d5   : > { %3103 = vmatpush1.bf16.msra.mxu0 %v4205_v7 }
 0x1d6   : > { %3104 = vmatprep.subr.bf16.mxu0 %v4213_v8 }
 0x1d7   : > { %3187 = vmatpush1.bf16.msra.mxu1 %v4214_v27 }
 0x1d8   : > { %3188 = vmatprep.subr.bf16.mxu1 %v4222_v30  ;;  %v4277_v30 = vld [vmem:[%s5458_s5 + $0x200] ss:$16 sps:$4 sm:$0xff]  }
 0x1d9   : > { %3105 = vmatpush1.bf16.msra.mxu0 %v4211_v26 }
 0x1da   : > { %3106 = vmatprep.subr.bf16.mxu0 %v4219_v28 }
 0x1db   : > { %3189 = vmatpush1.bf16.msra.mxu1 %v4220_v32 }
 0x1dc   : > { %3190 = vmatprep.subr.bf16.mxu1 %v4228_v34  ;;  %v4288_v34 = vld [vmem:[%s5458_s5 + $0x22c] ss:$16 sps:$4 sm:$0xff]  }
 0x1dd   : > { %3107 = vmatpush1.bf16.msra.mxu0 %v4217_v31  ;;  %v4280_v31 = vld [vmem:[%s5458_s5 + $0x208] ss:$16 sps:$4 sm:$0xff]  }
 0x1de   : > { %3108 = vmatprep.subr.bf16.mxu0 %v4225_v33  ;;  %v4285_v33 = vld [vmem:[%s5458_s5 + $0x224] ss:$16 sps:$4 sm:$0xff]  }
 0x1df   : > { %3191 = vmatpush1.bf16.msra.mxu1 %v4226_v36  ;;  %v4283_v36 = vld [vmem:[%s5458_s5 + $0x220] ss:$16 sps:$4 sm:$0xff]  }
 0x1e0   : > { %3192 = vmatprep.subr.bf16.mxu1 %v4234_v38  ;;  %v4291_v38 = vld [vmem:[%s5458_s5 + $0x244] ss:$16 sps:$4 sm:$0xff]  }
 0x1e1   : > { %3109 = vmatpush1.bf16.msra.mxu0 %v4223_v35 }
 0x1e2   : > { %3110 = vmatprep.subr.bf16.mxu0 %v4231_v37  ;;  %v4286_v37 = vld [vmem:[%s5458_s5 + $0x228] ss:$16 sps:$4 sm:$0xff]  }
 0x1e3   : > { %3193 = vmatpush1.bf16.msra.mxu1 %v4232_v40  ;;  %v4289_v40 = vld [vmem:[%s5458_s5 + $0x240] ss:$16 sps:$4 sm:$0xff]  }
 0x1e4   : > { %3194 = vmatprep.subr.bf16.mxu1 %v4240_v42  ;;  %v4297_v42 = vld [vmem:[%s5458_s5 + $0x264] ss:$16 sps:$4 sm:$0xff]  }
 0x1e5   : > { %3111 = vmatpush1.bf16.msra.mxu0 %v4229_v39  ;;  %v4294_v39 = vld [vmem:[%s5458_s5 + $0x24c] ss:$16 sps:$4 sm:$0xff]  }
 0x1e6   : > { %3112 = vmatprep.subr.bf16.mxu0 %v4237_v41  ;;  %v4292_v41 = vld [vmem:[%s5458_s5 + $0x248] ss:$16 sps:$4 sm:$0xff]  }
 0x1e7   : > { %3195 = vmatpush1.bf16.msra.mxu1 %v4238_v44  ;;  %v4295_v44 = vld [vmem:[%s5458_s5 + $0x260] ss:$16 sps:$4 sm:$0xff]  }
 0x1e8   : > { %3196 = vmatprep.subr.bf16.mxu1 %v4246_v47  ;;  %v4303_v47 = vld [vmem:[%s5458_s5 + $0x284] ss:$16 sps:$4 sm:$0xff]  }
 0x1e9   : > { %3113 = vmatpush1.bf16.msra.mxu0 %v4235_v43  ;;  %v4300_v43 = vld [vmem:[%s5458_s5 + $0x26c] ss:$16 sps:$4 sm:$0xff]  }
 0x1ea   : > { %3114 = vmatprep.subr.bf16.mxu0 %v4243_v45  ;;  %v4298_v45 = vld [vmem:[%s5458_s5 + $0x268] ss:$16 sps:$4 sm:$0xff]  }
 0x1eb   : > { %3197 = vmatpush1.bf16.msra.mxu1 %v4244_v49  ;;  %v4301_v49 = vld [vmem:[%s5458_s5 + $0x280] ss:$16 sps:$4 sm:$0xff]  }
 0x1ec   : > { %3198 = vmatprep.subr.bf16.mxu1 %v4252_v50  ;;  %v4309_v50 = vld [vmem:[%s5458_s5 + $0x2a4] ss:$16 sps:$4 sm:$0xff]  }
 0x1ed   : > { %3115 = vmatpush1.bf16.msra.mxu0 %v4241_v48  ;;  %v4306_v48 = vld [vmem:[%s5458_s5 + $0x28c] ss:$16 sps:$4 sm:$0xff]  }
 0x1ee   : > { %3116 = vmatprep.subr.bf16.mxu0 %v4249_v15  ;;  %v4304_v15 = vld [vmem:[%s5458_s5 + $0x288] ss:$16 sps:$4 sm:$0xff]  }
 0x1ef   : > { %3199 = vmatpush1.bf16.msra.mxu1 %v4250_v52  ;;  %v4307_v52 = vld [vmem:[%s5458_s5 + $0x2a0] ss:$16 sps:$4 sm:$0xff]  }
 0x1f0   : > { %3200 = vmatprep.subr.bf16.mxu1 %v4258_v54  ;;  %v4315_v54 = vld [vmem:[%s5458_s5 + $0x2c4] ss:$16 sps:$4 sm:$0xff]  }
 0x1f1   : > { %3117 = vmatpush1.bf16.msra.mxu0 %v4247_v51  ;;  %v4312_v51 = vld [vmem:[%s5458_s5 + $0x2ac] ss:$16 sps:$4 sm:$0xff]  }
 0x1f2   : > { %3118 = vmatprep.subr.bf16.mxu0 %v4255_v53  ;;  %v4310_v53 = vld [vmem:[%s5458_s5 + $0x2a8] ss:$16 sps:$4 sm:$0xff]  }
 0x1f3   : > { %3201 = vmatpush1.bf16.msra.mxu1 %v4256_v56  ;;  %v4313_v56 = vld [vmem:[%s5458_s5 + $0x2c0] ss:$16 sps:$4 sm:$0xff]  }
 0x1f4   : > { %3202 = vmatprep.subr.bf16.mxu1 %v4264_v57  ;;  %v4321_v57 = vld [vmem:[%s5458_s5 + $0x2e4] ss:$16 sps:$4 sm:$0xff]  }
 0x1f5   : > { %3119 = vmatpush1.bf16.msra.mxu0 %v4253_v55  ;;  %v4318_v55 = vld [vmem:[%s5458_s5 + $0x2cc] ss:$16 sps:$4 sm:$0xff]  }
 0x1f6   : > { %3120 = vmatprep.subr.bf16.mxu0 %v4261_v23  ;;  %v4316_v23 = vld [vmem:[%s5458_s5 + $0x2c8] ss:$16 sps:$4 sm:$0xff]  }
 0x1f7   : > { %3203 = vmatpush1.bf16.msra.mxu1 %v4262_v59  ;;  %v4319_v59 = vld [vmem:[%s5458_s5 + $0x2e0] ss:$16 sps:$4 sm:$0xff]  }
 0x1f8   : > { %3204 = vmatprep.subr.bf16.mxu1 %v4270_v61  ;;  %v4327_v61 = vld [vmem:[%s5458_s5 + $0x304] ss:$16 sps:$4 sm:$0xff]  }
 0x1f9   : > { %3121 = vmatpush1.bf16.msra.mxu0 %v4259_v58  ;;  %v4324_v58 = vld [vmem:[%s5458_s5 + $0x2ec] ss:$16 sps:$4 sm:$0xff]  }
 0x1fa   : > { %3122 = vmatprep.subr.bf16.mxu0 %v4267_v60  ;;  %v4322_v60 = vld [vmem:[%s5458_s5 + $0x2e8] ss:$16 sps:$4 sm:$0xff]  }
 0x1fb   : > { %3205 = vmatpush1.bf16.msra.mxu1 %v4268_v63  ;;  %v4325_v63 = vld [vmem:[%s5458_s5 + $0x300] ss:$16 sps:$4 sm:$0xff]  }
 0x1fc   : > { %3206 = vmatprep.subr.bf16.mxu1 %v4276_v1  ;;  %v4333_v1 = vld [vmem:[%s5458_s5 + $0x324] ss:$16 sps:$4 sm:$0xff]  }
 0x1fd   : > { %3123 = vmatpush1.bf16.msra.mxu0 %v4265_v62  ;;  %v4330_v62 = vld [vmem:[%s5458_s5 + $0x30c] ss:$16 sps:$4 sm:$0xff]  }
 0x1fe   : > { %3124 = vmatprep.subr.bf16.mxu0 %v4273_v0  ;;  %v4328_v0 = vld [vmem:[%s5458_s5 + $0x308] ss:$16 sps:$4 sm:$0xff]  }
 0x1ff   : > { %3207 = vmatpush1.bf16.msra.mxu1 %v4274_v3  ;;  %v4331_v3 = vld [vmem:[%s5458_s5 + $0x320] ss:$16 sps:$4 sm:$0xff]  }
 0x200   : > { %3217 = vmatprep.subr.bf16.mxu1 %v4282_v6  ;;  %v4339_v6 = vld [vmem:[%s5458_s5 + $0x344] ss:$16 sps:$4 sm:$0xff]  }
 0x201   : > { %3125 = vmatpush1.bf16.msra.mxu0 %v4271_v2  ;;  %v4336_v2 = vld [vmem:[%s5458_s5 + $0x32c] ss:$16 sps:$4 sm:$0xff]  }
 0x202   : > { %3135 = vmatprep.subr.bf16.mxu0 %v4279_v4  ;;  %v4334_v4 = vld [vmem:[%s5458_s5 + $0x328] ss:$16 sps:$4 sm:$0xff]  }
 0x295   : > { %v5234_v14 = vpop.f32.mrb[0].mxu1 }
 0x296   : > { %v2291_v18 = vpop.f32.mrb[1].mxu1 }
 0x297   : > { %v2207_v13 = vpop.f32.mrb[0].mxu0  ;;  %v3747_v21 = vadd.f32 %v2291_v18, %v1487_v12  ;;  %v2293_v7 = vpop.f32.mrb[2].mxu1  ;;  %v4340_v12 = vld [vmem:[%s5458_s5 + $0x348] ss:$16 sps:$4 sm:$0xff]  }
 0x298   : > { %v3744_v16 = vadd.f32 %v2207_v13, %v1475_v10  ;;  %v2209_v17 = vpop.f32.mrb[1].mxu0  ;;  %v2294_v25 = vpop.f32.mrb[3].mxu1  ;;  %v4342_v10 = vld [vmem:[%s5458_s5 + $0x34c] ss:$16 sps:$4 sm:$0xff]   ;;  %v4345_v13 = vld [vmem:[%s5458_s5 + $0x364] ss:$16 sps:$4 sm:$0xff]  }
 0x299   : > { %v3745_v19 = vadd.f32 %v2209_v17, %v1479_v11  ;;  %v2211_v22 = vpop.f32.mrb[2].mxu0  ;;  %v2299_v27 = vmax.f32 %v3747_v21, 0.0  ;;  %v4337_v11 = vld [vmem:[%s5458_s5 + $0x340] ss:$16 sps:$4 sm:$0xff]   ;;  %v4346_v18 = vld [vmem:[%s5458_s5 + $0x368] ss:$16 sps:$4 sm:$0xff]  }
 0x29a   : > { %v2296_v24 = vmax.f32 %v3744_v16, 0.0  ;;  %v2212_v8 = vpop.f32.mrb[3].mxu0  ;;  %v4348_v16 = vld [vmem:[%s5458_s5 + $0x36c] ss:$16 sps:$4 sm:$0xff]   ;;  %v4343_v17 = vld [vmem:[%s5458_s5 + $0x360] ss:$16 sps:$4 sm:$0xff]  }
 0x29b   : > { %v2297_v26 = vmax.f32 %v3745_v19, 0.0  ;;  %v2303_v35 = vpack.c.bf16 %v2299_v27, %v2299_v27  ;;  %v4351_v19 = vld [vmem:[%s5458_s5 + $0x384] ss:$16 sps:$4 sm:$0xff]   ;;  %v4354_v21 = vld [vmem:[%s5458_s5 + $0x38c] ss:$16 sps:$4 sm:$0xff]   ;;  %v1483_v27 = vrot.slane %v5226_v9, %v4979_v46 }
 0x29c   : > { %v2300_v32 = vpack.c.bf16 %v2296_v24, %v2296_v24  ;;  %v4349_v22 = vld [vmem:[%s5458_s5 + $0x380] ss:$16 sps:$4 sm:$0xff]   ;;  %v4352_v7 = vld [vmem:[%s5458_s5 + $0x388] ss:$16 sps:$4 sm:$0xff]   ;;  %v4357_v24 = vld [vmem:[%s5458_s5 + $0x3a4] ss:$16 sps:$4 sm:$0xff]  }
 0x29d   : > { %v2301_v28 = vpack.c.bf16 %v2297_v26, %v2297_v26  ;;  %v4360_v8 = vld [vmem:[%s5458_s5 + $0x3ac] ss:$16 sps:$4 sm:$0xff]   ;;  %v4355_v25 = vld [vmem:[%s5458_s5 + $0x3a0] ss:$16 sps:$4 sm:$0xff]   ;;  %v4358_v26 = vld [vmem:[%s5458_s5 + $0x3a8] ss:$16 sps:$4 sm:$0xff]  }
 0x29e   : > { %v4364_v9 = vld [vmem:[%s5458_s5 + $0x3c8] ss:$16 sps:$4 sm:$0xff]  }
 0x29f   : > { %3126 = vmatprep.mubr.bf16.mxu0 %v2301_v28  ;;  %3208 = vmatprep.mubr.bf16.mxu1 %v2301_v28  ;;  %v4363_v28 = vld [vmem:[%s5458_s5 + $0x3c4] ss:$16 sps:$4 sm:$0xff]  }
 0x2a0   : > { %3127 = vmatmul.mubr.bf16.vlgmr.msra.gmra.mrb[4].mxu0 %v2300_v32  ;;  %3209 = vmatmul.mubr.bf16.vlgmr.msra.gmra.mrb[4].mxu1 %v2300_v32  ;;  %v3746_v32 = vadd.f32 %v5234_v14, %v1483_v27  ;;  %v4370_v14 = vld [vmem:[%s5458_s5 + $0x3e8] ss:$16 sps:$4 sm:$0xff]  }
 0x2a1   : > { %3136 = vmatpush1.bf16.msra.mxu0 %v4277_v30  ;;  %3218 = vmatpush1.bf16.msra.mxu1 %v4280_v31  ;;  %v4366_v30 = vld [vmem:[%s5458_s5 + $0x3cc] ss:$16 sps:$4 sm:$0xff]   ;;  %v4361_v31 = vld [vmem:[%s5458_s5 + $0x3c0] ss:$16 sps:$4 sm:$0xff]  }
 0x2a2   : > { %3167 = vmatprep.mubr.bf16.mxu0 %v2303_v35  ;;  %3249 = vmatprep.mubr.bf16.mxu1 %v2303_v35  ;;  %v4367_v35 = vld [vmem:[%s5458_s5 + $0x3e0] ss:$16 sps:$4 sm:$0xff]  }
 0x2a3   : > { %3137 = vmatprep.subr.bf16.mxu0 %v4285_v33  ;;  %3219 = vmatprep.subr.bf16.mxu1 %v4288_v34  ;;  %v4369_v33 = vld [vmem:[%s5458_s5 + $0x3e4] ss:$16 sps:$4 sm:$0xff]   ;;  %v4372_v34 = vld [vmem:[%s5458_s5 + $0x3ec] ss:$16 sps:$4 sm:$0xff]  }
 0x2a5   : > { %3138 = vmatpush1.bf16.msra.mxu0 %v4283_v36  ;;  %3220 = vmatpush1.bf16.msra.mxu1 %v4286_v37  ;;  %v2298_v36 = vmax.f32 %v3746_v32, 0.0 }
 0x2a6   : > { %3139 = vmatprep.subr.bf16.mxu0 %v4291_v38  ;;  %3221 = vmatprep.subr.bf16.mxu1 %v4294_v39  ;;  %v2432_v38 = vld [vmem:[%s5459_s6] sm:$0xf] }
 0x2a7   : > { %v2302_v37 = vpack.c.bf16 %v2298_v36, %v2298_v36  ;;  %v2437_v39 = vrot.slane %v2432_v38, %v4780_v29 }
 0x2a9   : > { %3140 = vmatpush1.bf16.msra.mxu0 %v4289_v40  ;;  %3222 = vmatpush1.bf16.msra.mxu1 %v4292_v41  ;;  %v2445_v40 = vrot.slane %v2432_v38, %v4979_v46  ;;  %v2441_v41 = vrot.slane %v2432_v38, %v4752_v20 }
 0x2aa   : > { %3141 = vmatprep.subr.bf16.mxu0 %v4297_v42  ;;  %3223 = vmatprep.subr.bf16.mxu1 %v4300_v43  ;;  %v2449_v42 = vrot.slane %v2432_v38, %v4881_v5 }
 0x2ad   : > { %3142 = vmatpush1.bf16.msra.mxu0 %v4295_v44  ;;  %3224 = vmatpush1.bf16.msra.mxu1 %v4298_v45 }
 0x2ae   : > { %3143 = vmatprep.subr.bf16.mxu0 %v4303_v47  ;;  %3225 = vmatprep.subr.bf16.mxu1 %v4306_v48 }
 0x2b1   : > { %3144 = vmatpush1.bf16.msra.mxu0 %v4301_v49  ;;  %3226 = vmatpush1.bf16.msra.mxu1 %v4304_v15 }
 0x2b2   : > { %3145 = vmatprep.subr.bf16.mxu0 %v4309_v50  ;;  %3227 = vmatprep.subr.bf16.mxu1 %v4312_v51 }
 0x2b5   : > { %3146 = vmatpush1.bf16.msra.mxu0 %v4307_v52  ;;  %3228 = vmatpush1.bf16.msra.mxu1 %v4310_v53 }
 0x2b6   : > { %3147 = vmatprep.subr.bf16.mxu0 %v4315_v54  ;;  %3229 = vmatprep.subr.bf16.mxu1 %v4318_v55 }
 0x2b9   : > { %3148 = vmatpush1.bf16.msra.mxu0 %v4313_v56  ;;  %3230 = vmatpush1.bf16.msra.mxu1 %v4316_v23 }
 0x2ba   : > { %3149 = vmatprep.subr.bf16.mxu0 %v4321_v57  ;;  %3231 = vmatprep.subr.bf16.mxu1 %v4324_v58 }
 0x2bd   : > { %3150 = vmatpush1.bf16.msra.mxu0 %v4319_v59  ;;  %3232 = vmatpush1.bf16.msra.mxu1 %v4322_v60 }
 0x2be   : > { %3151 = vmatprep.subr.bf16.mxu0 %v4327_v61  ;;  %3233 = vmatprep.subr.bf16.mxu1 %v4330_v62 }
 0x2c1   : > { %3152 = vmatpush1.bf16.msra.mxu0 %v4325_v63  ;;  %3234 = vmatpush1.bf16.msra.mxu1 %v4328_v0 }
 0x2c2   : > { %3153 = vmatprep.subr.bf16.mxu0 %v4333_v1  ;;  %3235 = vmatprep.subr.bf16.mxu1 %v4336_v2 }
 0x2c5   : > { %3154 = vmatpush1.bf16.msra.mxu0 %v4331_v3  ;;  %3236 = vmatpush1.bf16.msra.mxu1 %v4334_v4 }
 0x2c6   : > { %3155 = vmatprep.subr.bf16.mxu0 %v4339_v6  ;;  %3237 = vmatprep.subr.bf16.mxu1 %v4342_v10 }
 0x2c9   : > { %3156 = vmatpush1.bf16.msra.mxu0 %v4337_v11  ;;  %3238 = vmatpush1.bf16.msra.mxu1 %v4340_v12 }
 0x2ca   : > { %3157 = vmatprep.subr.bf16.mxu0 %v4345_v13  ;;  %3239 = vmatprep.subr.bf16.mxu1 %v4348_v16 }
 0x2cd   : > { %3158 = vmatpush1.bf16.msra.mxu0 %v4343_v17  ;;  %3240 = vmatpush1.bf16.msra.mxu1 %v4346_v18 }
 0x2ce   : > { %3159 = vmatprep.subr.bf16.mxu0 %v4351_v19  ;;  %3241 = vmatprep.subr.bf16.mxu1 %v4354_v21 }
 0x2d1   : > { %3160 = vmatpush1.bf16.msra.mxu0 %v4349_v22  ;;  %3242 = vmatpush1.bf16.msra.mxu1 %v4352_v7 }
 0x2d2   : > { %3161 = vmatprep.subr.bf16.mxu0 %v4357_v24  ;;  %3243 = vmatprep.subr.bf16.mxu1 %v4360_v8 }
 0x2d5   : > { %3162 = vmatpush1.bf16.msra.mxu0 %v4355_v25  ;;  %3244 = vmatpush1.bf16.msra.mxu1 %v4358_v26 }
 0x2d6   : > { %3163 = vmatprep.subr.bf16.mxu0 %v4363_v28  ;;  %3245 = vmatprep.subr.bf16.mxu1 %v4366_v30 }
 0x2d9   : > { %3164 = vmatpush1.bf16.msra.mxu0 %v4361_v31  ;;  %3246 = vmatpush1.bf16.msra.mxu1 %v4364_v9 }
 0x2da   : > { %3165 = vmatprep.subr.bf16.mxu0 %v4369_v33  ;;  %3247 = vmatprep.subr.bf16.mxu1 %v4372_v34 }
 0x2dd   : > { %3166 = vmatpush1.bf16.msra.mxu0 %v4367_v35  ;;  %3248 = vmatpush1.bf16.msra.mxu1 %v4370_v14 }
 0x2e0   : > { %3168 = vmatmul.mubr.bf16.vlgmr.msra.gmra.mrb[4].mxu0 %v2302_v37  ;;  %3250 = vmatmul.mubr.bf16.vlgmr.msra.gmra.mrb[4].mxu1 %v2302_v37 }
 0x3b3   : > { %v3169_v43 = vpop.f32.mrb[4].mxu0  ;;  %v3251_v44 = vpop.f32.mrb[4].mxu1 }
 0x3b4   : > { %v3748_v45 = vadd.f32 %v3169_v43, %v2437_v39  ;;  %v3750_v47 = vadd.f32 %v3251_v44, %v2445_v40  ;;  %v3171_v48 = vpop.f32.mrb[5].mxu0  ;;  %v3253_v49 = vpop.f32.mrb[5].mxu1 }
 0x3b5   : > { %v3749_v15 = vadd.f32 %v3171_v48, %v2441_v41  ;;  %v3751_v50 = vadd.f32 %v3253_v49, %v2449_v42  ;;  %v3173_v51 = vpop.f32.mrb[6].mxu0  ;;  %v3255_v52 = vpop.f32.mrb[6].mxu1 }
 0x3b6   : > { %3258 = vst [vmem:[%s5460_s7] sm:$0xff] %v3748_v45  ;;  %3260 = vst [vmem:[%s5460_s7 + $0x10] sm:$0xff] %v3750_v47  ;;  %v3174_v20 = vpop.f32.mrb[7].mxu0  ;;  %v3256_v29 = vpop.f32.mrb[7].mxu1 }
 0x3b7   : > { %3259 = vst [vmem:[%s5460_s7 + $0x8] sm:$0xff] %v3749_v15  ;;  %3261 = vst [vmem:[%s5460_s7 + $0x18] sm:$0xff] %v3751_v50 }
 0x3b8 PF: > { %s17_s26 = sadd.s32 1, %s4395_s26   ;;  %s5461_s24 = smov %s4391_s25 }
 0x3b9   : > { %p14_p8 = scmp.ge.s32.totalorder %s17_s26, 9   ;;  %s5462_s25 = smov %s5464_s27 }
 0x3bb   :  { %16 = sbr.rel (!%p14_p8) target bundleno = 2 (0x2), region = 89 }

</bundles_post_ra>
